<compile_context>
chip_gen: v7x
topology: tpu7x:2x2x1
jax: 0.10.0
libtpu: 0.0.40
codegen_flags: <defaults>
</compile_context>

<pallas_src>
import numpy as np
import jax
import jax.numpy as jnp
from jax import lax
from jax.experimental import pallas as pl
from jax.experimental.pallas import tpu as pltpu


# ----------------------------------------------------------------------------
# Pallas kernel: full forward pass on the (already gathered, padded) inputs
# ----------------------------------------------------------------------------
def myrnn_kernel(emb_ref,                       # (T, Ep)   f32  embedded tokens (last batch elem)
                 wih1_ref, b1_ref,              # (Ep, Hp), (1, Hp)
                 whh1_ref,                      # (Hp, Hp)
                 wih2_ref, whh2_ref,            # (Hp, Hp), (Hp, Hp)
                 b2_ref,                        # (1, Hp)
                 fc2b_ref,                      # (1, 1)
                 fc1w_hbm, fcsm_hbm,            # (Hp, Hp), (2, Hp)  -- raw HBM refs
                 out_ref,                       # (T, 1)    f32
                 hlast_scr,                     # (T, Hp)   VMEM scratch
                 fc1w_buf, fcsm_buf,            # (Hp, Hp), (2, Hp) VMEM landing buffers
                 dma_sems):                     # DMA semaphores (2,)
    T = emb_ref.shape[0]

    # Late-use fc weights: kick off their HBM->VMEM DMA now and hide it behind
    # the serial recurrence; wait only right before the fc1 matmul.
    cp_fc1w = pltpu.make_async_copy(fc1w_hbm, fc1w_buf, dma_sems.at[0])
    cp_fcsm = pltpu.make_async_copy(fcsm_hbm, fcsm_buf, dma_sems.at[1])
    cp_fc1w.start()
    cp_fcsm.start()

    # Layer-1 input projection for ALL time steps in one MXU pass, off the
    # serial path:  xw1[t] = emb[t] @ Wih1^T + (b_ih1 + b_hh1)
    xw1 = (jnp.dot(emb_ref[...], wih1_ref[...],
                   preferred_element_type=jnp.float32) + b1_ref[...])    # (T, Hp)

    # ---- peeled step t = 0: h1_prev = h2_prev = 0, recurrent terms vanish ----
    h1 = jnp.tanh(xw1[0:1, :])
    h2 = jnp.tanh(jnp.dot(h1, wih2_ref[...],
                          preferred_element_type=jnp.float32) + b2_ref[...])
    hlast_scr[0:1, :] = h2

    # ---- steps 1..T-1, fully unrolled ----------------------------------------
    # Layer-2's two dots are kept independent: rec2 uses only the *previous*
    # h2, so it can run while layer-1's Whh1 matmul / tanh are still in flight.
    for t in range(1, T):
        rec2 = jnp.dot(h2, whh2_ref[...], preferred_element_type=jnp.float32)
        h1 = jnp.tanh(xw1[t:t + 1, :]
                      + jnp.dot(h1, whh1_ref[...],
                                preferred_element_type=jnp.float32))
        h2 = jnp.tanh(jnp.dot(h1, wih2_ref[...],
                              preferred_element_type=jnp.float32)
                      + rec2 + b2_ref[...])
        # record this step's hidden state (last batch element) -> row t
        hlast_scr[t:t + 1, :] = h2

    # fc weights must be resident now (DMA was hidden behind the recurrence).
    cp_fc1w.wait()
    cp_fcsm.wait()

    # fc1 + relu on the collected (T, Hp) slab ...
    hl = hlast_scr[...]
    z = jnp.maximum(jnp.dot(hl, fc1w_buf[...],
                            preferred_element_type=jnp.float32)
                    + fcsm_buf[0:1, :],        # fc1 bias
                    0.0)
    # ... then fc2 (output width 1) as a VPU multiply + lane reduction
    # (avoids an MXU pass with a 1-wide, padded-to-128 output).
    out_ref[...] = (jnp.sum(z * fcsm_buf[1:2, :], axis=-1, keepdims=True)
                    + fc2b_ref[...])


# ----------------------------------------------------------------------------
# One-time weight preprocessing (hoisted out of the per-call path)
# ----------------------------------------------------------------------------
def _pad_to(n, m):
    return ((n + m - 1) // m) * m


def prepare_weights(p):
    """Transpose / zero-pad / fuse the weights once; reuse the result for every
    forward call so no padding / concatenation is re-materialized per call."""
    V, E = p["table"].shape
    H = p["whh1"].shape[0]
    Hp = _pad_to(H, 128)   # 150 -> 256  (one 256x256 MXU tile on v6e/v7x)
    Ep = _pad_to(E, 128)   # 300 -> 384

    padr = lambda a, r: jnp.pad(a, ((0, r - a.shape[0]), (0, 0)))       # sublane pad
    padc = lambda a, c: jnp.pad(a, ((0, 0), (0, c - a.shape[1])))       # lane pad

    w = dict(
        table=jnp.asarray(p["table"], jnp.float32),
        wih1=padc(padr(p["wih1"].T, Ep), Hp),                           # (Ep, Hp)
        b1=padc((p["bih1"] + p["bhh1"]).reshape(1, H), Hp),             # (1, Hp)
        whh1=padc(padr(p["whh1"].T, Hp), Hp),                           # (Hp, Hp)
        wih2=padc(padr(p["wih2"].T, Hp), Hp),                           # (Hp, Hp)
        whh2=padc(padr(p["whh2"].T, Hp), Hp),                           # (Hp, Hp)
        b2=padc((p["bih2"] + p["bhh2"]).reshape(1, H), Hp),             # (1, Hp)
        fc1w=padc(padr(p["fc1w"].T, Hp), Hp),                           # (Hp, Hp)
        fcsm=jnp.concatenate([padc(p["fc1b"].reshape(1, H), Hp),        # (2, Hp):
                              padc(p["fc2w"].reshape(1, H), Hp)],       #  [fc1b ; fc2w]
                             axis=0),
        fc2b=p["fc2b"].reshape(1, 1),                                   # (1, 1)
    )
    # Materialize eagerly -> per-call graphs see ready device arrays only.
    return jax.tree_util.tree_map(jnp.asarray, w)


# ----------------------------------------------------------------------------
# Per-call wrapper: batch slice, embedding gather, pad, pallas_call
# ----------------------------------------------------------------------------
def myrnn_forward(ids, w):
    T, B = ids.shape
    V, E = w["table"].shape
    Ep, Hp = w["wih1"].shape

    # Only batch element B-1 reaches the output (the x[:, -1, :] quirk) and the
    # RNN treats batch elements independently -> drop the rest before the kernel.
    # Clamp ids so an out-of-range token can never read garbage (PyTorch would
    # raise here instead).
    ids_last = jnp.clip(ids[:, B - 1].astype(jnp.int32), 0, V - 1)      # (T,)
    emb = jnp.take(w["table"], ids_last, axis=0)                        # (T, E)
    emb_p = jnp.pad(emb, ((0, 0), (0, Ep - E)))                         # (T, Ep)

    vmem = pl.BlockSpec(memory_space=pltpu.MemorySpace.VMEM)
    hbm = pl.BlockSpec(memory_space=pl.ANY)

    out = pl.pallas_call(
        myrnn_kernel,
        out_shape=jax.ShapeDtypeStruct((T, 1), jnp.float32),
        in_specs=[vmem] * 8 + [hbm, hbm],
        out_specs=vmem,
        scratch_shapes=[
            pltpu.VMEM((T, Hp), jnp.float32),       # per-step hidden states
            pltpu.VMEM((Hp, Hp), jnp.float32),      # fc1w landing buffer
            pltpu.VMEM((2, Hp), jnp.float32),       # [fc1b ; fc2w] landing buffer
            pltpu.SemaphoreType.DMA((2,)),
        ],
    )(emb_p, w["wih1"], w["b1"], w["whh1"], w["wih2"], w["whh2"], w["b2"],
      w["fc2b"], w["fc1w"], w["fcsm"])
    return out.reshape(-1)


# ----------------------------------------------------------------------------
# Pure-JAX reference (mirrors the PyTorch forward exactly)
# ----------------------------------------------------------------------------
def myrnn_reference(ids, p):
    emb = p["table"][ids]                                   # (T, B, E)

    def rnn(xs, wih, whh, bih, bhh):
        h0 = jnp.zeros((xs.shape[1], whh.shape[0]), jnp.float32)

        def step(h, x_t):
            h = jnp.tanh(x_t @ wih.T + bih + h @ whh.T + bhh)
            return h, h

        _, ys = lax.scan(step, h0, xs)
        return ys                                           # (T, B, H)

    y1 = rnn(emb, p["wih1"], p["whh1"], p["bih1"], p["bhh1"])
    y2 = rnn(y1, p["wih2"], p["whh2"], p["bih2"], p["bhh2"])
    last = y2[:, -1, :]                                     # (T, H) — PyTorch quirk
    z = jax.nn.relu(last @ p["fc1w"].T + p["fc1b"])
    return (z @ p["fc2w"].T + p["fc2b"]).reshape(-1)


def init_params(key, vocab=50, emb=300, hid=150):
    ks = jax.random.split(key, 14)
    bnd = 1.0 / np.sqrt(hid)
    u = lambda k, shape: jax.random.uniform(k, shape, jnp.float32, -bnd, bnd)
    return dict(
        table=jax.random.normal(ks[0], (vocab, emb), jnp.float32),
        wih1=u(ks[1], (hid, emb)), whh1=u(ks[2], (hid, hid)),
        bih1=u(ks[3], (hid,)),     bhh1=u(ks[4], (hid,)),
        wih2=u(ks[5], (hid, hid)), whh2=u(ks[6], (hid, hid)),
        bih2=u(ks[7], (hid,)),     bhh2=u(ks[8], (hid,)),
        fc1w=u(ks[9], (hid, hid)), fc1b=u(ks[10], (hid,)),
        fc2w=u(ks[11], (1, hid)),  fc2b=u(ks[12], (1,)),
    )


if __name__ == "__main__":
    key = jax.random.PRNGKey(0)
    kp, ki = jax.random.split(key)
    params = init_params(kp)

    T, B, V = 8, 2, 50
    ids = jax.random.randint(ki, (T, B), 0, V, dtype=jnp.int32)

    prepped = prepare_weights(params)          # one-time, outside the hot path
    fwd = jax.jit(myrnn_forward)

    out = jax.block_until_ready(fwd(ids, prepped))
    ref = myrnn_reference(ids, params)

    assert out.shape == (T,), out.shape
    np.testing.assert_allclose(np.asarray(out), np.asarray(ref), rtol=2e-4, atol=2e-4)
    print("KERNEL_OK")
</pallas_src>

<mosaic_0001>
module attributes {stable_mosaic.version = 11 : i64} {
  func.func @myrnn_kernel(%arg0: memref<8x384xf32, #tpu.memory_space<vmem>>, %arg1: memref<384x256xf32, #tpu.memory_space<vmem>>, %arg2: memref<1x256xf32, #tpu.memory_space<vmem>>, %arg3: memref<256x256xf32, #tpu.memory_space<vmem>>, %arg4: memref<256x256xf32, #tpu.memory_space<vmem>>, %arg5: memref<256x256xf32, #tpu.memory_space<vmem>>, %arg6: memref<1x256xf32, #tpu.memory_space<vmem>>, %arg7: memref<1x1xf32, #tpu.memory_space<vmem>>, %arg8: memref<256x256xf32, #tpu.memory_space<any>>, %arg9: memref<2x256xf32, #tpu.memory_space<any>>, %arg10: memref<8x1xf32, #tpu.memory_space<vmem>>, %arg11: memref<8x256xf32, #tpu.memory_space<vmem>>, %arg12: memref<256x256xf32, #tpu.memory_space<vmem>>, %arg13: memref<2x256xf32, #tpu.memory_space<vmem>>, %arg14: memref<2x!tpu.dma_semaphore, #tpu.memory_space<semaphore_mem>>) attributes {dimension_semantics = [], scalar_prefetch = 0 : i64, scratch_operands = 4 : i64, tpu.core_type = #tpu.core_type<tc>} {
    %c0_i32 = arith.constant 0 : i32
    %0 = tpu.memref_slice %arg14[%c0_i32] : memref<2x!tpu.dma_semaphore, #tpu.memory_space<semaphore_mem>> -> memref<1x!tpu.dma_semaphore, #tpu.memory_space<semaphore_mem>>
    %1 = tpu.memref_squeeze %0 : memref<1x!tpu.dma_semaphore, #tpu.memory_space<semaphore_mem>> -> memref<!tpu.dma_semaphore, #tpu.memory_space<semaphore_mem>>
    tpu.enqueue_dma source(%arg8 : memref<256x256xf32, #tpu.memory_space<any>>) target(%arg12 : memref<256x256xf32, #tpu.memory_space<vmem>>) target_semaphore(%1 : memref<!tpu.dma_semaphore, #tpu.memory_space<semaphore_mem>>)
    %c1_i32 = arith.constant 1 : i32
    %2 = tpu.memref_slice %arg14[%c1_i32] : memref<2x!tpu.dma_semaphore, #tpu.memory_space<semaphore_mem>> -> memref<1x!tpu.dma_semaphore, #tpu.memory_space<semaphore_mem>>
    %3 = tpu.memref_squeeze %2 : memref<1x!tpu.dma_semaphore, #tpu.memory_space<semaphore_mem>> -> memref<!tpu.dma_semaphore, #tpu.memory_space<semaphore_mem>>
    tpu.enqueue_dma source(%arg9 : memref<2x256xf32, #tpu.memory_space<any>>) target(%arg13 : memref<2x256xf32, #tpu.memory_space<vmem>>) target_semaphore(%3 : memref<!tpu.dma_semaphore, #tpu.memory_space<semaphore_mem>>)
    %c0 = arith.constant 0 : index
    %c0_0 = arith.constant 0 : index
    %4 = vector.load %arg0[%c0, %c0_0] : memref<8x384xf32, #tpu.memory_space<vmem>>, vector<8x384xf32>
    %c0_1 = arith.constant 0 : index
    %c0_2 = arith.constant 0 : index
    %5 = vector.load %arg1[%c0_1, %c0_2] : memref<384x256xf32, #tpu.memory_space<vmem>>, vector<384x256xf32>
    %cst = arith.constant dense<0.000000e+00> : vector<8x256xf32>
    %6 = tpu.matmul %4, %5, %cst {dimension_numbers = #tpu.dot_dimension_numbers<[1], [0], [0], [1], [0, 0, 1, 1], [], []>} : vector<8x384xf32>, vector<384x256xf32>, vector<8x256xf32> -> vector<8x256xf32>
    %c0_3 = arith.constant 0 : index
    %c0_4 = arith.constant 0 : index
    %7 = vector.load %arg2[%c0_3, %c0_4] : memref<1x256xf32, #tpu.memory_space<vmem>>, vector<1x256xf32>
    %8 = vector.broadcast %7 : vector<1x256xf32> to vector<8x256xf32>
    %9 = arith.addf %6, %8 : vector<8x256xf32>
    %10 = vector.extract_strided_slice %9 {offsets = [0, 0], sizes = [1, 256], strides = [1, 1]} : vector<8x256xf32> to vector<1x256xf32>
    %11 = math.tanh %10 : vector<1x256xf32>
    %c0_5 = arith.constant 0 : index
    %c0_6 = arith.constant 0 : index
    %12 = vector.load %arg4[%c0_5, %c0_6] : memref<256x256xf32, #tpu.memory_space<vmem>>, vector<256x256xf32>
    %cst_7 = arith.constant dense<0.000000e+00> : vector<1x256xf32>
    %13 = tpu.matmul %11, %12, %cst_7 {dimension_numbers = #tpu.dot_dimension_numbers<[1], [0], [0], [1], [0, 0, 1, 1], [], []>} : vector<1x256xf32>, vector<256x256xf32>, vector<1x256xf32> -> vector<1x256xf32>
    %c0_8 = arith.constant 0 : index
    %c0_9 = arith.constant 0 : index
    %14 = vector.load %arg6[%c0_8, %c0_9] : memref<1x256xf32, #tpu.memory_space<vmem>>, vector<1x256xf32>
    %15 = arith.addf %13, %14 : vector<1x256xf32>
    %16 = math.tanh %15 : vector<1x256xf32>
    %c0_10 = arith.constant 0 : index
    %c0_11 = arith.constant 0 : index
    %17 = vector.load %arg11[%c0_10, %c0_11] : memref<8x256xf32, #tpu.memory_space<vmem>>, vector<1x256xf32>
    tpu.vector_store %arg11[%c0_10, %c0_11], %16 {strides = array<i32>} : memref<8x256xf32, #tpu.memory_space<vmem>>, vector<1x256xf32>,
    %c0_12 = arith.constant 0 : index
    %c0_13 = arith.constant 0 : index
    %18 = vector.load %arg5[%c0_12, %c0_13] : memref<256x256xf32, #tpu.memory_space<vmem>>, vector<256x256xf32>
    %cst_14 = arith.constant dense<0.000000e+00> : vector<1x256xf32>
    %19 = tpu.matmul %16, %18, %cst_14 {dimension_numbers = #tpu.dot_dimension_numbers<[1], [0], [0], [1], [0, 0, 1, 1], [], []>} : vector<1x256xf32>, vector<256x256xf32>, vector<1x256xf32> -> vector<1x256xf32>
    %20 = vector.extract_strided_slice %9 {offsets = [1, 0], sizes = [1, 256], strides = [1, 1]} : vector<8x256xf32> to vector<1x256xf32>
    %c0_15 = arith.constant 0 : index
    %c0_16 = arith.constant 0 : index
    %21 = vector.load %arg3[%c0_15, %c0_16] : memref<256x256xf32, #tpu.memory_space<vmem>>, vector<256x256xf32>
    %cst_17 = arith.constant dense<0.000000e+00> : vector<1x256xf32>
    %22 = tpu.matmul %11, %21, %cst_17 {dimension_numbers = #tpu.dot_dimension_numbers<[1], [0], [0], [1], [0, 0, 1, 1], [], []>} : vector<1x256xf32>, vector<256x256xf32>, vector<1x256xf32> -> vector<1x256xf32>
    %23 = arith.addf %20, %22 : vector<1x256xf32>
    %24 = math.tanh %23 : vector<1x256xf32>
    %c0_18 = arith.constant 0 : index
    %c0_19 = arith.constant 0 : index
    %25 = vector.load %arg4[%c0_18, %c0_19] : memref<256x256xf32, #tpu.memory_space<vmem>>, vector<256x256xf32>
    %cst_20 = arith.constant dense<0.000000e+00> : vector<1x256xf32>
    %26 = tpu.matmul %24, %25, %cst_20 {dimension_numbers = #tpu.dot_dimension_numbers<[1], [0], [0], [1], [0, 0, 1, 1], [], []>} : vector<1x256xf32>, vector<256x256xf32>, vector<1x256xf32> -> vector<1x256xf32>
    %27 = arith.addf %26, %19 : vector<1x256xf32>
    %c0_21 = arith.constant 0 : index
    %c0_22 = arith.constant 0 : index
    %28 = vector.load %arg6[%c0_21, %c0_22] : memref<1x256xf32, #tpu.memory_space<vmem>>, vector<1x256xf32>
    %29 = arith.addf %27, %28 : vector<1x256xf32>
    %30 = math.tanh %29 : vector<1x256xf32>
    %c1 = arith.constant 1 : index
    %c0_23 = arith.constant 0 : index
    %31 = vector.load %arg11[%c1, %c0_23] : memref<8x256xf32, #tpu.memory_space<vmem>>, vector<1x256xf32>
    tpu.vector_store %arg11[%c1, %c0_23], %30 {strides = array<i32>} : memref<8x256xf32, #tpu.memory_space<vmem>>, vector<1x256xf32>,
    %c0_24 = arith.constant 0 : index
    %c0_25 = arith.constant 0 : index
    %32 = vector.load %arg5[%c0_24, %c0_25] : memref<256x256xf32, #tpu.memory_space<vmem>>, vector<256x256xf32>
    %cst_26 = arith.constant dense<0.000000e+00> : vector<1x256xf32>
    %33 = tpu.matmul %30, %32, %cst_26 {dimension_numbers = #tpu.dot_dimension_numbers<[1], [0], [0], [1], [0, 0, 1, 1], [], []>} : vector<1x256xf32>, vector<256x256xf32>, vector<1x256xf32> -> vector<1x256xf32>
    %34 = vector.extract_strided_slice %9 {offsets = [2, 0], sizes = [1, 256], strides = [1, 1]} : vector<8x256xf32> to vector<1x256xf32>
    %c0_27 = arith.constant 0 : index
    %c0_28 = arith.constant 0 : index
    %35 = vector.load %arg3[%c0_27, %c0_28] : memref<256x256xf32, #tpu.memory_space<vmem>>, vector<256x256xf32>
    %cst_29 = arith.constant dense<0.000000e+00> : vector<1x256xf32>
    %36 = tpu.matmul %24, %35, %cst_29 {dimension_numbers = #tpu.dot_dimension_numbers<[1], [0], [0], [1], [0, 0, 1, 1], [], []>} : vector<1x256xf32>, vector<256x256xf32>, vector<1x256xf32> -> vector<1x256xf32>
    %37 = arith.addf %34, %36 : vector<1x256xf32>
    %38 = math.tanh %37 : vector<1x256xf32>
    %c0_30 = arith.constant 0 : index
    %c0_31 = arith.constant 0 : index
    %39 = vector.load %arg4[%c0_30, %c0_31] : memref<256x256xf32, #tpu.memory_space<vmem>>, vector<256x256xf32>
    %cst_32 = arith.constant dense<0.000000e+00> : vector<1x256xf32>
    %40 = tpu.matmul %38, %39, %cst_32 {dimension_numbers = #tpu.dot_dimension_numbers<[1], [0], [0], [1], [0, 0, 1, 1], [], []>} : vector<1x256xf32>, vector<256x256xf32>, vector<1x256xf32> -> vector<1x256xf32>
    %41 = arith.addf %40, %33 : vector<1x256xf32>
    %c0_33 = arith.constant 0 : index
    %c0_34 = arith.constant 0 : index
    %42 = vector.load %arg6[%c0_33, %c0_34] : memref<1x256xf32, #tpu.memory_space<vmem>>, vector<1x256xf32>
    %43 = arith.addf %41, %42 : vector<1x256xf32>
    %44 = math.tanh %43 : vector<1x256xf32>
    %c2 = arith.constant 2 : index
    %c0_35 = arith.constant 0 : index
    %45 = vector.load %arg11[%c2, %c0_35] : memref<8x256xf32, #tpu.memory_space<vmem>>, vector<1x256xf32>
    tpu.vector_store %arg11[%c2, %c0_35], %44 {strides = array<i32>} : memref<8x256xf32, #tpu.memory_space<vmem>>, vector<1x256xf32>,
    %c0_36 = arith.constant 0 : index
    %c0_37 = arith.constant 0 : index
    %46 = vector.load %arg5[%c0_36, %c0_37] : memref<256x256xf32, #tpu.memory_space<vmem>>, vector<256x256xf32>
    %cst_38 = arith.constant dense<0.000000e+00> : vector<1x256xf32>
    %47 = tpu.matmul %44, %46, %cst_38 {dimension_numbers = #tpu.dot_dimension_numbers<[1], [0], [0], [1], [0, 0, 1, 1], [], []>} : vector<1x256xf32>, vector<256x256xf32>, vector<1x256xf32> -> vector<1x256xf32>
    %48 = vector.extract_strided_slice %9 {offsets = [3, 0], sizes = [1, 256], strides = [1, 1]} : vector<8x256xf32> to vector<1x256xf32>
    %c0_39 = arith.constant 0 : index
    %c0_40 = arith.constant 0 : index
    %49 = vector.load %arg3[%c0_39, %c0_40] : memref<256x256xf32, #tpu.memory_space<vmem>>, vector<256x256xf32>
    %cst_41 = arith.constant dense<0.000000e+00> : vector<1x256xf32>
    %50 = tpu.matmul %38, %49, %cst_41 {dimension_numbers = #tpu.dot_dimension_numbers<[1], [0], [0], [1], [0, 0, 1, 1], [], []>} : vector<1x256xf32>, vector<256x256xf32>, vector<1x256xf32> -> vector<1x256xf32>
    %51 = arith.addf %48, %50 : vector<1x256xf32>
    %52 = math.tanh %51 : vector<1x256xf32>
    %c0_42 = arith.constant 0 : index
    %c0_43 = arith.constant 0 : index
    %53 = vector.load %arg4[%c0_42, %c0_43] : memref<256x256xf32, #tpu.memory_space<vmem>>, vector<256x256xf32>
    %cst_44 = arith.constant dense<0.000000e+00> : vector<1x256xf32>
    %54 = tpu.matmul %52, %53, %cst_44 {dimension_numbers = #tpu.dot_dimension_numbers<[1], [0], [0], [1], [0, 0, 1, 1], [], []>} : vector<1x256xf32>, vector<256x256xf32>, vector<1x256xf32> -> vector<1x256xf32>
    %55 = arith.addf %54, %47 : vector<1x256xf32>
    %c0_45 = arith.constant 0 : index
    %c0_46 = arith.constant 0 : index
    %56 = vector.load %arg6[%c0_45, %c0_46] : memref<1x256xf32, #tpu.memory_space<vmem>>, vector<1x256xf32>
    %57 = arith.addf %55, %56 : vector<1x256xf32>
    %58 = math.tanh %57 : vector<1x256xf32>
    %c3 = arith.constant 3 : index
    %c0_47 = arith.constant 0 : index
    %59 = vector.load %arg11[%c3, %c0_47] : memref<8x256xf32, #tpu.memory_space<vmem>>, vector<1x256xf32>
    tpu.vector_store %arg11[%c3, %c0_47], %58 {strides = array<i32>} : memref<8x256xf32, #tpu.memory_space<vmem>>, vector<1x256xf32>,
    %c0_48 = arith.constant 0 : index
    %c0_49 = arith.constant 0 : index
    %60 = vector.load %arg5[%c0_48, %c0_49] : memref<256x256xf32, #tpu.memory_space<vmem>>, vector<256x256xf32>
    %cst_50 = arith.constant dense<0.000000e+00> : vector<1x256xf32>
    %61 = tpu.matmul %58, %60, %cst_50 {dimension_numbers = #tpu.dot_dimension_numbers<[1], [0], [0], [1], [0, 0, 1, 1], [], []>} : vector<1x256xf32>, vector<256x256xf32>, vector<1x256xf32> -> vector<1x256xf32>
    %62 = vector.extract_strided_slice %9 {offsets = [4, 0], sizes = [1, 256], strides = [1, 1]} : vector<8x256xf32> to vector<1x256xf32>
    %c0_51 = arith.constant 0 : index
    %c0_52 = arith.constant 0 : index
    %63 = vector.load %arg3[%c0_51, %c0_52] : memref<256x256xf32, #tpu.memory_space<vmem>>, vector<256x256xf32>
    %cst_53 = arith.constant dense<0.000000e+00> : vector<1x256xf32>
    %64 = tpu.matmul %52, %63, %cst_53 {dimension_numbers = #tpu.dot_dimension_numbers<[1], [0], [0], [1], [0, 0, 1, 1], [], []>} : vector<1x256xf32>, vector<256x256xf32>, vector<1x256xf32> -> vector<1x256xf32>
    %65 = arith.addf %62, %64 : vector<1x256xf32>
    %66 = math.tanh %65 : vector<1x256xf32>
    %c0_54 = arith.constant 0 : index
    %c0_55 = arith.constant 0 : index
    %67 = vector.load %arg4[%c0_54, %c0_55] : memref<256x256xf32, #tpu.memory_space<vmem>>, vector<256x256xf32>
    %cst_56 = arith.constant dense<0.000000e+00> : vector<1x256xf32>
    %68 = tpu.matmul %66, %67, %cst_56 {dimension_numbers = #tpu.dot_dimension_numbers<[1], [0], [0], [1], [0, 0, 1, 1], [], []>} : vector<1x256xf32>, vector<256x256xf32>, vector<1x256xf32> -> vector<1x256xf32>
    %69 = arith.addf %68, %61 : vector<1x256xf32>
    %c0_57 = arith.constant 0 : index
    %c0_58 = arith.constant 0 : index
    %70 = vector.load %arg6[%c0_57, %c0_58] : memref<1x256xf32, #tpu.memory_space<vmem>>, vector<1x256xf32>
    %71 = arith.addf %69, %70 : vector<1x256xf32>
    %72 = math.tanh %71 : vector<1x256xf32>
    %c4 = arith.constant 4 : index
    %c0_59 = arith.constant 0 : index
    %73 = vector.load %arg11[%c4, %c0_59] : memref<8x256xf32, #tpu.memory_space<vmem>>, vector<1x256xf32>
    tpu.vector_store %arg11[%c4, %c0_59], %72 {strides = array<i32>} : memref<8x256xf32, #tpu.memory_space<vmem>>, vector<1x256xf32>,
    %c0_60 = arith.constant 0 : index
    %c0_61 = arith.constant 0 : index
    %74 = vector.load %arg5[%c0_60, %c0_61] : memref<256x256xf32, #tpu.memory_space<vmem>>, vector<256x256xf32>
    %cst_62 = arith.constant dense<0.000000e+00> : vector<1x256xf32>
    %75 = tpu.matmul %72, %74, %cst_62 {dimension_numbers = #tpu.dot_dimension_numbers<[1], [0], [0], [1], [0, 0, 1, 1], [], []>} : vector<1x256xf32>, vector<256x256xf32>, vector<1x256xf32> -> vector<1x256xf32>
    %76 = vector.extract_strided_slice %9 {offsets = [5, 0], sizes = [1, 256], strides = [1, 1]} : vector<8x256xf32> to vector<1x256xf32>
    %c0_63 = arith.constant 0 : index
    %c0_64 = arith.constant 0 : index
    %77 = vector.load %arg3[%c0_63, %c0_64] : memref<256x256xf32, #tpu.memory_space<vmem>>, vector<256x256xf32>
    %cst_65 = arith.constant dense<0.000000e+00> : vector<1x256xf32>
    %78 = tpu.matmul %66, %77, %cst_65 {dimension_numbers = #tpu.dot_dimension_numbers<[1], [0], [0], [1], [0, 0, 1, 1], [], []>} : vector<1x256xf32>, vector<256x256xf32>, vector<1x256xf32> -> vector<1x256xf32>
    %79 = arith.addf %76, %78 : vector<1x256xf32>
    %80 = math.tanh %79 : vector<1x256xf32>
    %c0_66 = arith.constant 0 : index
    %c0_67 = arith.constant 0 : index
    %81 = vector.load %arg4[%c0_66, %c0_67] : memref<256x256xf32, #tpu.memory_space<vmem>>, vector<256x256xf32>
    %cst_68 = arith.constant dense<0.000000e+00> : vector<1x256xf32>
    %82 = tpu.matmul %80, %81, %cst_68 {dimension_numbers = #tpu.dot_dimension_numbers<[1], [0], [0], [1], [0, 0, 1, 1], [], []>} : vector<1x256xf32>, vector<256x256xf32>, vector<1x256xf32> -> vector<1x256xf32>
    %83 = arith.addf %82, %75 : vector<1x256xf32>
    %c0_69 = arith.constant 0 : index
    %c0_70 = arith.constant 0 : index
    %84 = vector.load %arg6[%c0_69, %c0_70] : memref<1x256xf32, #tpu.memory_space<vmem>>, vector<1x256xf32>
    %85 = arith.addf %83, %84 : vector<1x256xf32>
    %86 = math.tanh %85 : vector<1x256xf32>
    %c5 = arith.constant 5 : index
    %c0_71 = arith.constant 0 : index
    %87 = vector.load %arg11[%c5, %c0_71] : memref<8x256xf32, #tpu.memory_space<vmem>>, vector<1x256xf32>
    tpu.vector_store %arg11[%c5, %c0_71], %86 {strides = array<i32>} : memref<8x256xf32, #tpu.memory_space<vmem>>, vector<1x256xf32>,
    %c0_72 = arith.constant 0 : index
    %c0_73 = arith.constant 0 : index
    %88 = vector.load %arg5[%c0_72, %c0_73] : memref<256x256xf32, #tpu.memory_space<vmem>>, vector<256x256xf32>
    %cst_74 = arith.constant dense<0.000000e+00> : vector<1x256xf32>
    %89 = tpu.matmul %86, %88, %cst_74 {dimension_numbers = #tpu.dot_dimension_numbers<[1], [0], [0], [1], [0, 0, 1, 1], [], []>} : vector<1x256xf32>, vector<256x256xf32>, vector<1x256xf32> -> vector<1x256xf32>
    %90 = vector.extract_strided_slice %9 {offsets = [6, 0], sizes = [1, 256], strides = [1, 1]} : vector<8x256xf32> to vector<1x256xf32>
    %c0_75 = arith.constant 0 : index
    %c0_76 = arith.constant 0 : index
    %91 = vector.load %arg3[%c0_75, %c0_76] : memref<256x256xf32, #tpu.memory_space<vmem>>, vector<256x256xf32>
    %cst_77 = arith.constant dense<0.000000e+00> : vector<1x256xf32>
    %92 = tpu.matmul %80, %91, %cst_77 {dimension_numbers = #tpu.dot_dimension_numbers<[1], [0], [0], [1], [0, 0, 1, 1], [], []>} : vector<1x256xf32>, vector<256x256xf32>, vector<1x256xf32> -> vector<1x256xf32>
    %93 = arith.addf %90, %92 : vector<1x256xf32>
    %94 = math.tanh %93 : vector<1x256xf32>
    %c0_78 = arith.constant 0 : index
    %c0_79 = arith.constant 0 : index
    %95 = vector.load %arg4[%c0_78, %c0_79] : memref<256x256xf32, #tpu.memory_space<vmem>>, vector<256x256xf32>
    %cst_80 = arith.constant dense<0.000000e+00> : vector<1x256xf32>
    %96 = tpu.matmul %94, %95, %cst_80 {dimension_numbers = #tpu.dot_dimension_numbers<[1], [0], [0], [1], [0, 0, 1, 1], [], []>} : vector<1x256xf32>, vector<256x256xf32>, vector<1x256xf32> -> vector<1x256xf32>
    %97 = arith.addf %96, %89 : vector<1x256xf32>
    %c0_81 = arith.constant 0 : index
    %c0_82 = arith.constant 0 : index
    %98 = vector.load %arg6[%c0_81, %c0_82] : memref<1x256xf32, #tpu.memory_space<vmem>>, vector<1x256xf32>
    %99 = arith.addf %97, %98 : vector<1x256xf32>
    %100 = math.tanh %99 : vector<1x256xf32>
    %c6 = arith.constant 6 : index
    %c0_83 = arith.constant 0 : index
    %101 = vector.load %arg11[%c6, %c0_83] : memref<8x256xf32, #tpu.memory_space<vmem>>, vector<1x256xf32>
    tpu.vector_store %arg11[%c6, %c0_83], %100 {strides = array<i32>} : memref<8x256xf32, #tpu.memory_space<vmem>>, vector<1x256xf32>,
    %c0_84 = arith.constant 0 : index
    %c0_85 = arith.constant 0 : index
    %102 = vector.load %arg5[%c0_84, %c0_85] : memref<256x256xf32, #tpu.memory_space<vmem>>, vector<256x256xf32>
    %cst_86 = arith.constant dense<0.000000e+00> : vector<1x256xf32>
    %103 = tpu.matmul %100, %102, %cst_86 {dimension_numbers = #tpu.dot_dimension_numbers<[1], [0], [0], [1], [0, 0, 1, 1], [], []>} : vector<1x256xf32>, vector<256x256xf32>, vector<1x256xf32> -> vector<1x256xf32>
    %104 = vector.extract_strided_slice %9 {offsets = [7, 0], sizes = [1, 256], strides = [1, 1]} : vector<8x256xf32> to vector<1x256xf32>
    %c0_87 = arith.constant 0 : index
    %c0_88 = arith.constant 0 : index
    %105 = vector.load %arg3[%c0_87, %c0_88] : memref<256x256xf32, #tpu.memory_space<vmem>>, vector<256x256xf32>
    %cst_89 = arith.constant dense<0.000000e+00> : vector<1x256xf32>
    %106 = tpu.matmul %94, %105, %cst_89 {dimension_numbers = #tpu.dot_dimension_numbers<[1], [0], [0], [1], [0, 0, 1, 1], [], []>} : vector<1x256xf32>, vector<256x256xf32>, vector<1x256xf32> -> vector<1x256xf32>
    %107 = arith.addf %104, %106 : vector<1x256xf32>
    %108 = math.tanh %107 : vector<1x256xf32>
    %c0_90 = arith.constant 0 : index
    %c0_91 = arith.constant 0 : index
    %109 = vector.load %arg4[%c0_90, %c0_91] : memref<256x256xf32, #tpu.memory_space<vmem>>, vector<256x256xf32>
    %cst_92 = arith.constant dense<0.000000e+00> : vector<1x256xf32>
    %110 = tpu.matmul %108, %109, %cst_92 {dimension_numbers = #tpu.dot_dimension_numbers<[1], [0], [0], [1], [0, 0, 1, 1], [], []>} : vector<1x256xf32>, vector<256x256xf32>, vector<1x256xf32> -> vector<1x256xf32>
    %111 = arith.addf %110, %103 : vector<1x256xf32>
    %c0_93 = arith.constant 0 : index
    %c0_94 = arith.constant 0 : index
    %112 = vector.load %arg6[%c0_93, %c0_94] : memref<1x256xf32, #tpu.memory_space<vmem>>, vector<1x256xf32>
    %113 = arith.addf %111, %112 : vector<1x256xf32>
    %114 = math.tanh %113 : vector<1x256xf32>
    %c7 = arith.constant 7 : index
    %c0_95 = arith.constant 0 : index
    %115 = vector.load %arg11[%c7, %c0_95] : memref<8x256xf32, #tpu.memory_space<vmem>>, vector<1x256xf32>
    tpu.vector_store %arg11[%c7, %c0_95], %114 {strides = array<i32>} : memref<8x256xf32, #tpu.memory_space<vmem>>, vector<1x256xf32>,
    %c0_i32_96 = arith.constant 0 : i32
    %116 = tpu.memref_slice %arg14[%c0_i32_96] : memref<2x!tpu.dma_semaphore, #tpu.memory_space<semaphore_mem>> -> memref<1x!tpu.dma_semaphore, #tpu.memory_space<semaphore_mem>>
    %117 = tpu.memref_squeeze %116 : memref<1x!tpu.dma_semaphore, #tpu.memory_space<semaphore_mem>> -> memref<!tpu.dma_semaphore, #tpu.memory_space<semaphore_mem>>
    tpu.wait_dma2 semaphore(%117 : memref<!tpu.dma_semaphore, #tpu.memory_space<semaphore_mem>>) src(%arg8 : memref<256x256xf32, #tpu.memory_space<any>>) dst(%arg12 : memref<256x256xf32, #tpu.memory_space<vmem>>)
    %c1_i32_97 = arith.constant 1 : i32
    %118 = tpu.memref_slice %arg14[%c1_i32_97] : memref<2x!tpu.dma_semaphore, #tpu.memory_space<semaphore_mem>> -> memref<1x!tpu.dma_semaphore, #tpu.memory_space<semaphore_mem>>
    %119 = tpu.memref_squeeze %118 : memref<1x!tpu.dma_semaphore, #tpu.memory_space<semaphore_mem>> -> memref<!tpu.dma_semaphore, #tpu.memory_space<semaphore_mem>>
    tpu.wait_dma2 semaphore(%119 : memref<!tpu.dma_semaphore, #tpu.memory_space<semaphore_mem>>) src(%arg9 : memref<2x256xf32, #tpu.memory_space<any>>) dst(%arg13 : memref<2x256xf32, #tpu.memory_space<vmem>>)
    %c0_98 = arith.constant 0 : index
    %c0_99 = arith.constant 0 : index
    %120 = vector.load %arg11[%c0_98, %c0_99] : memref<8x256xf32, #tpu.memory_space<vmem>>, vector<8x256xf32>
    %c0_100 = arith.constant 0 : index
    %c0_101 = arith.constant 0 : index
    %121 = vector.load %arg12[%c0_100, %c0_101] : memref<256x256xf32, #tpu.memory_space<vmem>>, vector<256x256xf32>
    %cst_102 = arith.constant dense<0.000000e+00> : vector<8x256xf32>
    %122 = tpu.matmul %120, %121, %cst_102 {dimension_numbers = #tpu.dot_dimension_numbers<[1], [0], [0], [1], [0, 0, 1, 1], [], []>} : vector<8x256xf32>, vector<256x256xf32>, vector<8x256xf32> -> vector<8x256xf32>
    %c0_103 = arith.constant 0 : index
    %c0_104 = arith.constant 0 : index
    %123 = vector.load %arg13[%c0_103, %c0_104] : memref<2x256xf32, #tpu.memory_space<vmem>>, vector<1x256xf32>
    %124 = vector.broadcast %123 : vector<1x256xf32> to vector<8x256xf32>
    %125 = arith.addf %122, %124 : vector<8x256xf32>
    %cst_105 = arith.constant 0.000000e+00 : f32
    %126 = vector.broadcast %cst_105 : f32 to vector<8x256xf32>
    %127 = arith.maximumf %125, %126 : vector<8x256xf32>
    %c1_106 = arith.constant 1 : index
    %c0_107 = arith.constant 0 : index
    %128 = vector.load %arg13[%c1_106, %c0_107] : memref<2x256xf32, #tpu.memory_space<vmem>>, vector<1x256xf32>
    %129 = vector.broadcast %128 : vector<1x256xf32> to vector<8x256xf32>
    %130 = arith.mulf %127, %129 : vector<8x256xf32>
    %cst_108 = arith.constant dense<0.000000e+00> : vector<8xf32>
    %131 = vector.multi_reduction <add>, %130, %cst_108 [1] : vector<8x256xf32> to vector<8xf32>
    %132 = vector.shape_cast %131 : vector<8xf32> to vector<8x1xf32>
    %c0_109 = arith.constant 0 : index
    %c0_110 = arith.constant 0 : index
    %133 = vector.load %arg7[%c0_109, %c0_110] : memref<1x1xf32, #tpu.memory_space<vmem>>, vector<1x1xf32>
    %134 = vector.broadcast %133 : vector<1x1xf32> to vector<8x1xf32>
    %135 = arith.addf %132, %134 : vector<8x1xf32>
    %c0_111 = arith.constant 0 : index
    %c0_112 = arith.constant 0 : index
    %136 = vector.load %arg10[%c0_111, %c0_112] : memref<8x1xf32, #tpu.memory_space<vmem>>, vector<8x1xf32>
    tpu.vector_store %arg10[%c0_111, %c0_112], %135 {strides = array<i32>} : memref<8x1xf32, #tpu.memory_space<vmem>>, vector<8x1xf32>,
    return
  }
}

</mosaic_0001>

<bundles_post_ra>
// kernel: myrnn_forward.1
= control target key start
LH: loop header
LB: loop body
LE: loop exit
PB: predicated region body
PF: predicated region fallthrough
CT: control target
= control target key end

     0   :  { %s7181_s0 = inlined_call_operand.vmem [shape: f32[8,384], index: 0, kind: input, shape index: {}]   ;;  %s7182_s1 = inlined_call_operand.hbm [shape: f32[384,256], index: 1, kind: input, shape index: {}]   ;;  %s7183_s2 = inlined_call_operand.vmem [shape: f32[1,256], index: 2, kind: input, shape index: {}]   ;;  %s7184_s3 = inlined_call_operand.hbm [shape: f32[256,256], index: 3, kind: input, shape index: {}]   ;;  %s7185_s4 = inlined_call_operand.hbm [shape: f32[256,256], index: 4, kind: input, shape index: {}]   ;;  %s7186_s5 = inlined_call_operand.hbm [shape: f32[256,256], index: 5, kind: input, shape index: {}]   ;;  %s7187_s6 = inlined_call_operand.vmem [shape: f32[1,256], index: 6, kind: input, shape index: {}]   ;;  %s7188_s7 = inlined_call_operand.<no memory space> [shape: f32[1,1], index: 7, kind: input, shape index: {}]   ;;  %s7189_s8 = inlined_call_operand.hbm [shape: f32[256,256], index: 8, kind: input, shape index: {}]   ;;  %s7190_s9 = inlined_call_operand.vmem [shape: f32[2,256], index: 9, kind: input, shape index: {}]   ;;  %s7191_s10 = inlined_call_operand.vmem [shape: f32[8,1], index: 10, kind: output, shape index: {}]  }
   0x1   :  { %v15_v0 = vstv %s7188_s7 }
   0x2   :  { %16 = vst [vmem:[#allocation6] sm:$0x1] %v15_v0 }
   0x3   :  { %17 = vsyncpa [#allocation8], 0 }
   0x4   :  { %18 = vsyncpa [#allocation10], 0 }
   0x5   :  { %19 = vsyncpa [#allocation13], 0  ;;  %s5777_s15 = smov [#allocation9]   ;;  %s5778_s17 = smov [#allocation7]  }
   0x6   :  { %s41_s16 = sshll.u32 %s5777_s15, 4  ;;  %s27_s18 = sshll.u32 %s5778_s17, 4  ;;  %s42_s16 = int_to_ptr.vmem [resolvable:$true] %s41_s16  ;;  %s5844_s18 = int_to_ptr.vmem [resolvable:$true] %s27_s18 }
   0x7   :  { %s5657_s21 = scalar_lea.hbm %s7184_s3, 8192 }
   0x8   :  { %p5658_p0 = scmp.ne.s32.totalorder %s7184_s3, %s5657_s21  ;;  %p5661_p1 = scmp.lt.u32.totalorder %s5657_s21, %s7184_s3 }
   0xa   :  { %p5663_p2 = pnand %p5661_p1, %p5658_p0 }
   0xc   :  { %5666 = shalt.err (!%p5663_p2)
}
   0xd   :  { %s5667_s25 = scalar_lea.vmem %s42_s16, 8192  ;;  %p5672_p4 = scmp.lt.s32.totalorder %s42_s16, %s42_s16 }
   0xe   :  { %p5668_p3 = scmp.ne.s32.totalorder %s42_s16, %s5667_s25  ;;  %p5673_p5 = scmp.lt.s32.totalorder %s5667_s25, %s5667_s25 }
  0x10   :  { %p5674_p6 = por %p5673_p5, %p5672_p4 }
  0x12   :  { %p5675_p7 = pnand %p5674_p6, %p5668_p3 }
  0x14   :  { %5678 = shalt.err (!%p5675_p7)
}
  0x15   :  { %s5779_s26 = smov 256   ;;  %s5780_s27 = smov 16  }
  0x16   :  { %47 = dma.hbm_to_vmem [thread:$0]  %s7184_s3, 8192, %s42_s16, [#allocation10], %s5779_s26, %s5779_s26, %s5780_s27  }
  0x17   :  { %s5679_s12 = scalar_lea.hbm %s7182_s1, 12288 }
  0x18   :  { %p5680_p8 = scmp.ne.s32.totalorder %s7182_s1, %s5679_s12  ;;  %p5683_p9 = scmp.lt.u32.totalorder %s5679_s12, %s7182_s1 }
  0x1a   :  { %p5685_p10 = pnand %p5683_p9, %p5680_p8 }
  0x1c   :  { %5688 = shalt.err (!%p5685_p10)
}
  0x1d   :  { %s5689_s19 = scalar_lea.vmem %s5844_s18, 12288  ;;  %p5694_p12 = scmp.lt.s32.totalorder %s5844_s18, %s5844_s18 }
  0x1e   :  { %p5690_p11 = scmp.ne.s32.totalorder %s5844_s18, %s5689_s19  ;;  %p5695_p13 = scmp.lt.s32.totalorder %s5689_s19, %s5689_s19 }
  0x20   :  { %p5696_p0 = por %p5695_p13, %p5694_p12 }
  0x22   :  { %p5697_p1 = pnand %p5696_p0, %p5690_p11 }
  0x24   :  { %5700 = shalt.err (!%p5697_p1)
}
  0x25   :  { %33 = dma.hbm_to_vmem [thread:$0]  %s7182_s1, 12288, %s5844_s18, [#allocation8], %s5779_s26, %s5779_s26, %s5780_s27  }
  0x26   :  { %s5781_s20 = smov [#allocation11]   ;;  %s5782_s22 = smov [#allocation12]  }
  0x27   :  { %s53_s21 = sshll.u32 %s5781_s20, 4  ;;  %s65_s23 = sshll.u32 %s5782_s22, 4  ;;  %s54_s21 = int_to_ptr.vmem [resolvable:$true] %s53_s21  ;;  %s5881_s23 = int_to_ptr.vmem [resolvable:$true] %s65_s23 }
  0x28   :  { %s5701_s25 = scalar_lea.hbm %s7185_s4, 8192 }
  0x29   :  { %p5702_p2 = scmp.ne.s32.totalorder %s7185_s4, %s5701_s25  ;;  %p5705_p3 = scmp.lt.u32.totalorder %s5701_s25, %s7185_s4 }
  0x2b   :  { %p5707_p4 = pnand %p5705_p3, %p5702_p2 }
  0x2d   :  { %5710 = shalt.err (!%p5707_p4)
}
  0x2e   :  { %s5711_s1 = scalar_lea.vmem %s54_s21, 8192  ;;  %p5716_p6 = scmp.lt.s32.totalorder %s54_s21, %s54_s21 }
  0x2f   :  { %p5712_p5 = scmp.ne.s32.totalorder %s54_s21, %s5711_s1  ;;  %p5717_p7 = scmp.lt.s32.totalorder %s5711_s1, %s5711_s1 }
  0x31   :  { %p5718_p8 = por %p5717_p7, %p5716_p6 }
  0x33   :  { %p5719_p9 = pnand %p5718_p8, %p5712_p5 }
  0x35   :  { %5722 = shalt.err (!%p5719_p9)
}
  0x36   :  { %59 = dma.hbm_to_vmem [thread:$0]  %s7185_s4, 8192, %s54_s21, [#allocation10], %s5779_s26, %s5779_s26, %s5780_s27  }
  0x37   :  { %s5723_s15 = scalar_lea.hbm %s7186_s5, 8192 }
  0x38   :  { %p5724_p10 = scmp.ne.s32.totalorder %s7186_s5, %s5723_s15  ;;  %p5727_p11 = scmp.lt.u32.totalorder %s5723_s15, %s7186_s5 }
  0x3a   :  { %p5729_p12 = pnand %p5727_p11, %p5724_p10 }
  0x3c   :  { %5732 = shalt.err (!%p5729_p12)
}
  0x3d   :  { %s5733_s20 = scalar_lea.vmem %s5881_s23, 8192  ;;  %p5738_p0 = scmp.lt.s32.totalorder %s5881_s23, %s5881_s23 }
  0x3e   :  { %p5734_p13 = scmp.ne.s32.totalorder %s5881_s23, %s5733_s20  ;;  %p5739_p1 = scmp.lt.s32.totalorder %s5733_s20, %s5733_s20 }
  0x40   :  { %p5740_p2 = por %p5739_p1, %p5738_p0 }
  0x42   :  { %p5741_p3 = pnand %p5740_p2, %p5734_p13 }
  0x44   :  { %5744 = shalt.err (!%p5741_p3)
}
  0x45   :  { %71 = dma.hbm_to_vmem [thread:$0]  %s7186_s5, 8192, %s5881_s23, [#allocation13], %s5779_s26, %s5779_s26, %s5780_s27  }
  0x46   :  { %5767 = dma.done.wait [#allocation8], 12288  }
  0x47   :  { %5768 = vsyncadd [#allocation8], 4294955008 }
  0x48   :  { %5769 = dma.done.wait [#allocation10], 16384  }
  0x49   :  { %5770 = vsyncadd [#allocation10], 4294950912 }
  0x4a   :  { %5771 = dma.done.wait [#allocation13], 8192  }
  0x4b   :  { %5772 = vsyncadd [#allocation13], 4294959104  ;;  %s5783_s22 = smov [#allocation3]   ;;  %s5745_s28 = scalar_lea.hbm %s7189_s8, 8192 }
  0x4c   :  { %s95_s7 = sshll.u32 %s5783_s22, 4  ;;  %p5746_p4 = scmp.ne.s32.totalorder %s7189_s8, %s5745_s28  ;;  %s96_s7 = int_to_ptr.vmem [resolvable:$true] %s95_s7 }
  0x4d   :  { %p5749_p5 = scmp.lt.u32.totalorder %s5745_s28, %s7189_s8 }
  0x4f   :  { %p5751_p6 = pnand %p5749_p5, %p5746_p4 }
  0x51   :  { %5754 = shalt.err (!%p5751_p6)  }
  0x52   :  { %s5755_s5 = scalar_lea.vmem %s96_s7, 8192  ;;  %p5760_p8 = scmp.lt.s32.totalorder %s96_s7, %s96_s7 }
  0x53   :  { %p5756_p7 = scmp.ne.s32.totalorder %s96_s7, %s5755_s5  ;;  %p5761_p9 = scmp.lt.s32.totalorder %s5755_s5, %s5755_s5 }
  0x55   :  { %p5762_p10 = por %p5761_p9, %p5760_p8 }
  0x57   :  { %p5763_p11 = pnand %p5762_p10, %p5756_p7 }
  0x59   :  { %5766 = shalt.err (!%p5763_p11)  }
  0x5a   :  { %98 = dma.hbm_to_vmem [thread:$0]  %s7189_s8, 8192, %s96_s7, [#allocation5]  ;;  %v117_v1 = vld [vmem:[%s7190_s9] sm:$0xf] }
  0x5b   :  { %118 = vst [vmem:[#allocation4] sm:$0xf] %v117_v1 }
  0x5c   :  { %143 = vsyncadd [#allocation5 + $0x1], 64  ;;  %v148_v2 = vld [vmem:[#allocation7 + $0x8] sm:$0xff]  ;;  %v150_v3 = vld [vmem:[#allocation7 + $0x18] sm:$0xff] }
  0x5d   :  { %v3998_v4 = vpack.c.bf16 %v150_v3, %v148_v2  ;;  %v147_v5 = vld [vmem:[#allocation7] sm:$0xff]  ;;  %v149_v6 = vld [vmem:[#allocation7 + $0x10] sm:$0xff]  ;;  %v152_v7 = vld [vmem:[#allocation7 + $0x28] sm:$0xff] }
  0x5e   :  { %v4000_v8 = vpack.c.bf16 %v149_v6, %v147_v5  ;;  %v154_v9 = vld [vmem:[#allocation7 + $0x38] sm:$0xff]  ;;  %v151_v10 = vld [vmem:[#allocation7 + $0x20] sm:$0xff]  ;;  %v153_v11 = vld [vmem:[#allocation7 + $0x30] sm:$0xff] }
  0x5f   :  { %3999 = vmatprep.subr.bf16.mxu0 %v3998_v4  ;;  %v4002_v12 = vpack.c.bf16 %v154_v9, %v152_v7  ;;  %v156_v13 = vld [vmem:[#allocation7 + $0x48] sm:$0xff]  ;;  %v158_v14 = vld [vmem:[#allocation7 + $0x58] sm:$0xff]  ;;  %v4004_v15 = vpack.c.bf16 %v153_v11, %v151_v10  ;;  %v155_v17 = vld [vmem:[#allocation7 + $0x40] sm:$0xff] }
  0x60   :  { %4001 = vmatpush1.bf16.msra.mxu0 %v4000_v8  ;;  %v4006_v16 = vpack.c.bf16 %v158_v14, %v156_v13  ;;  %v157_v18 = vld [vmem:[#allocation7 + $0x50] sm:$0xff]  ;;  %v160_v19 = vld [vmem:[#allocation7 + $0x68] sm:$0xff]  ;;  %v162_v20 = vld [vmem:[#allocation7 + $0x78] sm:$0xff] }
  0x61   :  { %4003 = vmatprep.subr.bf16.mxu0 %v4002_v12  ;;  %v4008_v21 = vpack.c.bf16 %v157_v18, %v155_v17  ;;  %v4010_v22 = vpack.c.bf16 %v162_v20, %v160_v19  ;;  %v159_v23 = vld [vmem:[#allocation7 + $0x60] sm:$0xff]  ;;  %v161_v24 = vld [vmem:[#allocation7 + $0x70] sm:$0xff]  ;;  %v164_v25 = vld [vmem:[#allocation7 + $0x88] sm:$0xff] }
  0x62   :  { %v166_v26 = vld [vmem:[#allocation7 + $0x98] sm:$0xff]  ;;  %v4012_v27 = vpack.c.bf16 %v161_v24, %v159_v23  ;;  %v163_v29 = vld [vmem:[#allocation7 + $0x80] sm:$0xff]  ;;  %v165_v30 = vld [vmem:[#allocation7 + $0x90] sm:$0xff] }
  0x63   :  { %v4014_v28 = vpack.c.bf16 %v166_v26, %v164_v25  ;;  %v168_v31 = vld [vmem:[#allocation7 + $0xa8] sm:$0xff]  ;;  %v170_v32 = vld [vmem:[#allocation7 + $0xb8] sm:$0xff]  ;;  %v4016_v33 = vpack.c.bf16 %v165_v30, %v163_v29  ;;  %v167_v35 = vld [vmem:[#allocation7 + $0xa0] sm:$0xff] }
  0x64   :  { %4005 = vmatpush1.bf16.msra.mxu0 %v4004_v15  ;;  %v4018_v34 = vpack.c.bf16 %v170_v32, %v168_v31  ;;  %v169_v36 = vld [vmem:[#allocation7 + $0xb0] sm:$0xff]  ;;  %v172_v37 = vld [vmem:[#allocation7 + $0xc8] sm:$0xff]  ;;  %v174_v38 = vld [vmem:[#allocation7 + $0xd8] sm:$0xff] }
  0x65   :  { %4007 = vmatprep.subr.bf16.mxu0 %v4006_v16  ;;  %v4020_v39 = vpack.c.bf16 %v169_v36, %v167_v35  ;;  %v4022_v40 = vpack.c.bf16 %v174_v38, %v172_v37  ;;  %v171_v41 = vld [vmem:[#allocation7 + $0xc0] sm:$0xff]  ;;  %v173_v42 = vld [vmem:[#allocation7 + $0xd0] sm:$0xff]  ;;  %v176_v44 = vld [vmem:[#allocation7 + $0xe8] sm:$0xff] }
  0x66   :  { %v145_v43 = vld [vmem:[%s7181_s0 + $0x8] sm:$0xff]  ;;  %v4024_v46 = vpack.c.bf16 %v173_v42, %v171_v41  ;;  %v175_v48 = vld [vmem:[#allocation7 + $0xe0] sm:$0xff]  ;;  %v180_v50 = vld [vmem:[#allocation7 + $0x108] sm:$0xff] }
  0x67   :  { %v178_v45 = vld [vmem:[#allocation7 + $0xf8] sm:$0xff]  ;;  %319 = vmatprep.mubr.f32.mxu0 %v145_v43  ;;  %v177_v49 = vld [vmem:[#allocation7 + $0xf0] sm:$0xff]  ;;  %v179_v54 = vld [vmem:[#allocation7 + $0x100] sm:$0xff] }
  0x68   :  { %4009 = vmatpush1.bf16.msra.mxu0 %v4008_v21  ;;  %v4026_v47 = vpack.c.bf16 %v178_v45, %v176_v44  ;;  %v182_v51 = vld [vmem:[#allocation7 + $0x118] sm:$0xff]  ;;  %v4028_v52 = vpack.c.bf16 %v177_v49, %v175_v48  ;;  %v181_v55 = vld [vmem:[#allocation7 + $0x110] sm:$0xff]  ;;  %v184_v56 = vld [vmem:[#allocation7 + $0x128] sm:$0xff] }
  0x69   :  { %4011 = vmatprep.subr.bf16.mxu0 %v4010_v22  ;;  %v4030_v53 = vpack.c.bf16 %v182_v51, %v180_v50  ;;  %v186_v57 = vld [vmem:[#allocation7 + $0x138] sm:$0xff]  ;;  %v4032_v58 = vpack.c.bf16 %v181_v55, %v179_v54  ;;  %v183_v59 = vld [vmem:[#allocation7 + $0x120] sm:$0xff]  ;;  %v185_v61 = vld [vmem:[#allocation7 + $0x130] sm:$0xff] }
  0x6a   :  { %v4034_v60 = vpack.c.bf16 %v186_v57, %v184_v56  ;;  %v400_v62 = vld [vmem:[#allocation11 + $0x8] sm:$0xff]  ;;  %v402_v63 = vld [vmem:[#allocation11 + $0x18] sm:$0xff]  ;;  %v399_v3 = vld [vmem:[#allocation11] sm:$0xff]  ;;  %v4036_v5 = vpack.c.bf16 %v185_v61, %v183_v59 }
  0x6b   :  { %v188_v0 = vld [vmem:[#allocation7 + $0x148] sm:$0xff]  ;;  %v190_v1 = vld [vmem:[#allocation7 + $0x158] sm:$0xff]  ;;  %v5936_v2 = vpack.c.bf16 %v402_v63, %v400_v62  ;;  %v401_v4 = vld [vmem:[#allocation11 + $0x10] sm:$0xff] }
  0x6c   :  { %4013 = vmatpush1.bf16.msra.mxu0 %v4012_v27  ;;  %v187_v6 = vld [vmem:[#allocation7 + $0x140] sm:$0xff]  ;;  %v5939_v7 = vpack.c.bf16 %v401_v4, %v399_v3  ;;  %v404_v8 = vld [vmem:[#allocation11 + $0x28] sm:$0xff]  ;;  %v406_v9 = vld [vmem:[#allocation11 + $0x38] sm:$0xff]  ;;  %v4038_v10 = vpack.c.bf16 %v190_v1, %v188_v0 }
  0x6d   :  { %4015 = vmatprep.subr.bf16.mxu0 %v4014_v28  ;;  %4095 = vmatprep.subr.bf16.mxu1 %v5936_v2  ;;  %v189_v11 = vld [vmem:[#allocation7 + $0x150] sm:$0xff]  ;;  %v5941_v12 = vpack.c.bf16 %v406_v9, %v404_v8  ;;  %v403_v13 = vld [vmem:[#allocation11 + $0x20] sm:$0xff]  ;;  %v192_v15 = vld [vmem:[#allocation7 + $0x168] sm:$0xff] }
  0x6e   :  { %v405_v14 = vld [vmem:[#allocation11 + $0x30] sm:$0xff]  ;;  %v194_v16 = vld [vmem:[#allocation7 + $0x178] sm:$0xff]  ;;  %4097 = vmatpush1.bf16.msra.mxu1 %v5939_v7  ;;  %v408_v18 = vld [vmem:[#allocation11 + $0x48] sm:$0xff]  ;;  %v4040_v20 = vpack.c.bf16 %v189_v11, %v187_v6 }
  0x6f   :  { %v5944_v17 = vpack.c.bf16 %v405_v14, %v403_v13  ;;  %4099 = vmatprep.subr.bf16.mxu1 %v5941_v12  ;;  %v410_v19 = vld [vmem:[#allocation11 + $0x58] sm:$0xff]  ;;  %v191_v21 = vld [vmem:[#allocation7 + $0x160] sm:$0xff]  ;;  %v409_v24 = vld [vmem:[#allocation11 + $0x50] sm:$0xff]  ;;  %v4042_v25 = vpack.c.bf16 %v194_v16, %v192_v15 }
  0x70   :  { %4017 = vmatpush1.bf16.msra.mxu0 %v4016_v33  ;;  %v5947_v22 = vpack.c.bf16 %v410_v19, %v408_v18  ;;  %v407_v23 = vld [vmem:[#allocation11 + $0x40] sm:$0xff]  ;;  %v193_v26 = vld [vmem:[#allocation7 + $0x170] sm:$0xff]  ;;  %v412_v27 = vld [vmem:[#allocation11 + $0x68] sm:$0xff] }
  0x71   :  { %4019 = vmatprep.subr.bf16.mxu0 %v4018_v34  ;;  %v414_v28 = vld [vmem:[#allocation11 + $0x78] sm:$0xff]  ;;  %v196_v29 = vld [vmem:[#allocation7 + $0x188] sm:$0xff]  ;;  %v5950_v31 = vpack.c.bf16 %v409_v24, %v407_v23  ;;  %v411_v33 = vld [vmem:[#allocation11 + $0x60] sm:$0xff]  ;;  %v4044_v35 = vpack.c.bf16 %v193_v26, %v191_v21 }
  0x72   :  { %v198_v30 = vld [vmem:[#allocation7 + $0x198] sm:$0xff]  ;;  %4101 = vmatpush1.bf16.msra.mxu1 %v5944_v17  ;;  %v5953_v32 = vpack.c.bf16 %v414_v28, %v412_v27  ;;  %v413_v34 = vld [vmem:[#allocation11 + $0x70] sm:$0xff]  ;;  %v416_v36 = vld [vmem:[#allocation11 + $0x88] sm:$0xff] }
  0x73   :  { %4103 = vmatprep.subr.bf16.mxu1 %v5947_v22  ;;  %v418_v37 = vld [vmem:[#allocation11 + $0x98] sm:$0xff]  ;;  %v4046_v38 = vpack.c.bf16 %v198_v30, %v196_v29  ;;  %v200_v41 = vld [vmem:[#allocation7 + $0x1a8] sm:$0xff]  ;;  %v5956_v43 = vpack.c.bf16 %v413_v34, %v411_v33  ;;  %v415_v45 = vld [vmem:[#allocation11 + $0x80] sm:$0xff] }
  0x74   :  { %4021 = vmatpush1.bf16.msra.mxu0 %v4020_v39  ;;  %v195_v39 = vld [vmem:[#allocation7 + $0x180] sm:$0xff]  ;;  %v202_v42 = vld [vmem:[#allocation7 + $0x1b8] sm:$0xff]  ;;  %v5959_v44 = vpack.c.bf16 %v418_v37, %v416_v36  ;;  %v420_v48 = vld [vmem:[#allocation11 + $0xa8] sm:$0xff] }
  0x75   :  { %4023 = vmatprep.subr.bf16.mxu0 %v4022_v40  ;;  %v197_v40 = vld [vmem:[#allocation7 + $0x190] sm:$0xff]  ;;  %v422_v49 = vld [vmem:[#allocation11 + $0xb8] sm:$0xff]  ;;  %v4050_v50 = vpack.c.bf16 %v202_v42, %v200_v41  ;;  %v199_v51 = vld [vmem:[#allocation7 + $0x1a0] sm:$0xff] }
  0x76   :  { %4105 = vmatpush1.bf16.msra.mxu1 %v5950_v31  ;;  %v206_v54 = vld [vmem:[#allocation7 + $0x1d8] sm:$0xff]  ;;  %v5965_v56 = vpack.c.bf16 %v422_v49, %v420_v48  ;;  %v419_v57 = vld [vmem:[#allocation11 + $0xa0] sm:$0xff]  ;;  %v205_v0 = vld [vmem:[#allocation7 + $0x1d0] sm:$0xff] }
  0x77   :  { %4107 = vmatprep.subr.bf16.mxu1 %v5953_v32  ;;  %v426_v61 = vld [vmem:[#allocation11 + $0xd8] sm:$0xff]  ;;  %v203_v63 = vld [vmem:[#allocation7 + $0x1c0] sm:$0xff]  ;;  %v208_v1 = vld [vmem:[#allocation7 + $0x1e8] sm:$0xff] }
  0x78   :  { %4025 = vmatpush1.bf16.msra.mxu0 %v4024_v46  ;;  %v417_v46 = vld [vmem:[#allocation11 + $0x90] sm:$0xff]  ;;  %v210_v3 = vld [vmem:[#allocation7 + $0x1f8] sm:$0xff]  ;;  %v423_v6 = vld [vmem:[#allocation11 + $0xc0] sm:$0xff]  ;;  %v4056_v9 = vpack.c.bf16 %v205_v0, %v203_v63 }
  0x79   :  { %4027 = vmatprep.subr.bf16.mxu0 %v4026_v47  ;;  %v4048_v47 = vpack.c.bf16 %v197_v40, %v195_v39  ;;  %v5962_v55 = vpack.c.bf16 %v417_v46, %v415_v45  ;;  %v425_v8 = vld [vmem:[#allocation11 + $0xd0] sm:$0xff]  ;;  %v430_v11 = vld [vmem:[#allocation11 + $0xf8] sm:$0xff]  ;;  %v4058_v13 = vpack.c.bf16 %v210_v3, %v208_v1  ;;  %v207_v14 = vld [vmem:[#allocation7 + $0x1e0] sm:$0xff] }
  0x7a   :  { %4109 = vmatpush1.bf16.msra.mxu1 %v5956_v43  ;;  %v209_v15 = vld [vmem:[#allocation7 + $0x1f0] sm:$0xff]  ;;  %v212_v16 = vld [vmem:[#allocation7 + $0x208] sm:$0xff]  ;;  %v214_v18 = vld [vmem:[#allocation7 + $0x218] sm:$0xff]  ;;  %v5974_v19 = vpack.c.bf16 %v425_v8, %v423_v6 }
  0x7b   :  { %4111 = vmatprep.subr.bf16.mxu1 %v5959_v44  ;;  %v427_v21 = vld [vmem:[#allocation11 + $0xe0] sm:$0xff]  ;;  %v429_v23 = vld [vmem:[#allocation11 + $0xf0] sm:$0xff]  ;;  %v4060_v24 = vpack.c.bf16 %v209_v15, %v207_v14  ;;  %v434_v26 = vld [vmem:[#allocation11 + $0x118] sm:$0xff]  ;;  %v4062_v27 = vpack.c.bf16 %v214_v18, %v212_v16 }
  0x7c   :  { %4029 = vmatpush1.bf16.msra.mxu0 %v4028_v52  ;;  %v201_v52 = vld [vmem:[#allocation7 + $0x1b0] sm:$0xff]  ;;  %v211_v28 = vld [vmem:[#allocation7 + $0x200] sm:$0xff]  ;;  %v216_v30 = vld [vmem:[#allocation7 + $0x228] sm:$0xff]  ;;  %v5980_v34 = vpack.c.bf16 %v429_v23, %v427_v21 }
  0x7d   :  { %4031 = vmatprep.subr.bf16.mxu0 %v4030_v53  ;;  %v204_v53 = vld [vmem:[#allocation7 + $0x1c8] sm:$0xff]  ;;  %v4052_v59 = vpack.c.bf16 %v201_v52, %v199_v51  ;;  %v213_v29 = vld [vmem:[#allocation7 + $0x210] sm:$0xff]  ;;  %v218_v33 = vld [vmem:[#allocation7 + $0x238] sm:$0xff] }
  0x7e   :  { %v4054_v62 = vpack.c.bf16 %v206_v54, %v204_v53  ;;  %4113 = vmatpush1.bf16.msra.mxu1 %v5962_v55  ;;  %v431_v36 = vld [vmem:[#allocation11 + $0x100] sm:$0xff]  ;;  %v433_v37 = vld [vmem:[#allocation11 + $0x110] sm:$0xff]  ;;  %v4064_v39 = vpack.c.bf16 %v213_v29, %v211_v28  ;;  %v436_v40 = vld [vmem:[#allocation11 + $0x128] sm:$0xff]  ;;  %v4066_v42 = vpack.c.bf16 %v218_v33, %v216_v30  ;;  %v5784_v54 = vmov 0.0  }
  0x7f   :  { %4115 = vmatprep.subr.bf16.mxu1 %v5965_v56  ;;  %v438_v41 = vld [vmem:[#allocation11 + $0x138] sm:$0xff]  ;;  %v215_v45 = vld [vmem:[#allocation7 + $0x220] sm:$0xff]  ;;  %v217_v46 = vld [vmem:[#allocation7 + $0x230] sm:$0xff]  ;;  %v5989_v49 = vpack.c.bf16 %v433_v37, %v431_v36 }
  0x80   :  { %4033 = vmatpush1.bf16.msra.mxu0 %v4032_v58  ;;  %v421_v58 = vld [vmem:[#allocation11 + $0xb0] sm:$0xff]  ;;  %v222_v48 = vld [vmem:[#allocation7 + $0x258] sm:$0xff]  ;;  %v435_v51 = vld [vmem:[#allocation11 + $0x120] sm:$0xff]  ;;  %v4068_v53 = vpack.c.bf16 %v217_v46, %v215_v45 }
  0x81   :  { %4035 = vmatprep.subr.bf16.mxu0 %v4034_v60  ;;  %v424_v60 = vld [vmem:[#allocation11 + $0xc8] sm:$0xff]  ;;  %v5968_v4 = vpack.c.bf16 %v421_v58, %v419_v57  ;;  %v437_v52 = vld [vmem:[#allocation11 + $0x130] sm:$0xff]  ;;  %v442_v58 = vld [vmem:[#allocation11 + $0x158] sm:$0xff] }
  0x82   :  { %v440_v57 = vld [vmem:[#allocation11 + $0x148] sm:$0xff]  ;;  %v226_v63 = vld [vmem:[#allocation7 + $0x278] sm:$0xff]  ;;  %v5995_v0 = vpack.c.bf16 %v437_v52, %v435_v51  ;;  %v439_v3 = vld [vmem:[#allocation11 + $0x140] sm:$0xff] }
  0x83   :  { %4117 = vmatpush1.bf16.msra.mxu1 %v5968_v4  ;;  %v5998_v1 = vpack.c.bf16 %v442_v58, %v440_v57  ;;  %v441_v6 = vld [vmem:[#allocation11 + $0x150] sm:$0xff]  ;;  %v228_v15 = vld [vmem:[#allocation7 + $0x288] sm:$0xff]  ;;  %v230_v16 = vld [vmem:[#allocation7 + $0x298] sm:$0xff] }
  0x84   :  { %4037 = vmatpush1.bf16.msra.mxu0 %v4036_v5  ;;  %v5971_v5 = vpack.c.bf16 %v426_v61, %v424_v60  ;;  %v219_v60 = vld [vmem:[#allocation7 + $0x240] sm:$0xff]  ;;  %v221_v61 = vld [vmem:[#allocation7 + $0x250] sm:$0xff]  ;;  %v6001_v18 = vpack.c.bf16 %v441_v6, %v439_v3  ;;  %v232_v29 = vld [vmem:[#allocation7 + $0x2a8] sm:$0xff] }
  0x85   :  { %4039 = vmatprep.subr.bf16.mxu0 %v4038_v10  ;;  %v428_v10 = vld [vmem:[#allocation11 + $0xe8] sm:$0xff]  ;;  %v4072_v8 = vpack.c.bf16 %v221_v61, %v219_v60  ;;  %v225_v14 = vld [vmem:[#allocation7 + $0x270] sm:$0xff]  ;;  %v443_v23 = vld [vmem:[#allocation11 + $0x160] sm:$0xff] }
  0x86   :  { %4119 = vmatprep.subr.bf16.mxu1 %v5971_v5  ;;  %v229_v28 = vld [vmem:[#allocation7 + $0x290] sm:$0xff]  ;;  %v234_v30 = vld [vmem:[#allocation7 + $0x2b8] sm:$0xff]  ;;  %v235_v46 = vld [vmem:[#allocation7 + $0x2c0] sm:$0xff] }
  0x87   :  { %4121 = vmatpush1.bf16.msra.mxu1 %v5974_v19  ;;  %v4082_v37 = vpack.c.bf16 %v234_v30, %v232_v29  ;;  %v242_v51 = vld [vmem:[#allocation7 + $0x2f8] sm:$0xff]  ;;  %v241_v57 = vld [vmem:[#allocation7 + $0x2f0] sm:$0xff]  ;;  %v708_v58 = vld [vmem:[#allocation9 + $0x8] sm:$0xff] }
  0x88   :  { %4041 = vmatpush1.bf16.msra.mxu0 %v4040_v20  ;;  %v5977_v20 = vpack.c.bf16 %v430_v11, %v428_v10  ;;  %v446_v10 = vld [vmem:[#allocation11 + $0x178] sm:$0xff]  ;;  %v712_v3 = vld [vmem:[#allocation9 + $0x28] sm:$0xff]  ;;  %v719_v30 = vld [vmem:[#allocation9 + $0x60] sm:$0xff] }
  0x89   :  { %4043 = vmatprep.subr.bf16.mxu0 %v4042_v25  ;;  %v432_v25 = vld [vmem:[#allocation11 + $0x108] sm:$0xff]  ;;  %v714_v6 = vld [vmem:[#allocation9 + $0x38] sm:$0xff] }
  0x8a   :  { %4123 = vmatprep.subr.bf16.mxu1 %v5977_v20 }
  0x8b   :  { %4125 = vmatpush1.bf16.msra.mxu1 %v5980_v34 }
  0x8c   :  { %4045 = vmatpush1.bf16.msra.mxu0 %v4044_v35  ;;  %v5983_v35 = vpack.c.bf16 %v434_v26, %v432_v25  ;;  %v4078_v26 = vpack.c.bf16 %v230_v16, %v228_v15  ;;  %v718_v15 = vld [vmem:[#allocation9 + $0x58] sm:$0xff] }
  0x8d   :  { %4047 = vmatprep.subr.bf16.mxu0 %v4046_v38  ;;  %v144_v38 = vld [vmem:[%s7181_s0] sm:$0xff] }
  0x8e   :  { %4127 = vmatprep.subr.bf16.mxu1 %v5983_v35 }
  0x8f   :  { %4129 = vmatpush1.bf16.msra.mxu1 %v5989_v49 }
  0x90   :  { %4049 = vmatpush1.bf16.msra.mxu0 %v4048_v47  ;;  %v220_v47 = vld [vmem:[#allocation7 + $0x248] sm:$0xff] }
  0x91   :  { %4051 = vmatprep.subr.bf16.mxu0 %v4050_v50  ;;  %v5992_v50 = vpack.c.bf16 %v438_v41, %v436_v40  ;;  %v236_v40 = vld [vmem:[#allocation7 + $0x2c8] sm:$0xff]  ;;  %v238_v41 = vld [vmem:[#allocation7 + $0x2d8] sm:$0xff] }
  0x92   :  { %v4086_v45 = vpack.c.bf16 %v238_v41, %v236_v40  ;;  %v723_v41 = vld [vmem:[#allocation9 + $0x80] sm:$0xff] }
  0x93   :  { %4131 = vmatprep.subr.bf16.mxu1 %v5992_v50 }
  0x94   :  { %4053 = vmatpush1.bf16.msra.mxu0 %v4052_v59  ;;  %v4070_v59 = vpack.c.bf16 %v222_v48, %v220_v47  ;;  %4133 = vmatpush1.bf16.msra.mxu1 %v5995_v0  ;;  %v237_v47 = vld [vmem:[#allocation7 + $0x2d0] sm:$0xff]  ;;  %v240_v48 = vld [vmem:[#allocation7 + $0x2e8] sm:$0xff] }
  0x95   :  { %4055 = vmatprep.subr.bf16.mxu0 %v4054_v62  ;;  %v224_v62 = vld [vmem:[#allocation7 + $0x268] sm:$0xff]  ;;  %4135 = vmatprep.subr.bf16.mxu1 %v5998_v1  ;;  %v4088_v52 = vpack.c.bf16 %v237_v47, %v235_v46  ;;  %v730_v46 = vld [vmem:[#allocation9 + $0xb8] sm:$0xff] }
  0x96   :  { %v4074_v11 = vpack.c.bf16 %v226_v63, %v224_v62  ;;  %v707_v62 = vld [vmem:[#allocation9] sm:$0xff]  ;;  %v709_v63 = vld [vmem:[#allocation9 + $0x10] sm:$0xff] }
  0x98   :  { %4057 = vmatpush1.bf16.msra.mxu0 %v4056_v9  ;;  %v444_v9 = vld [vmem:[#allocation11 + $0x168] sm:$0xff]  ;;  %4137 = vmatpush1.bf16.msra.mxu1 %v6001_v18 }
  0x99   :  { %4059 = vmatprep.subr.bf16.mxu0 %v4058_v13  ;;  %v223_v13 = vld [vmem:[#allocation7 + $0x260] sm:$0xff]  ;;  %v6004_v21 = vpack.c.bf16 %v446_v10, %v444_v9  ;;  %v4224_v9 = vpack.c.bf16 %v709_v63, %v707_v62  ;;  %v4226_v10 = vpack.c.bf16 %v714_v6, %v712_v3  ;;  %v738_v62 = vld [vmem:[#allocation9 + $0xf8] sm:$0xff] }
  0x9a   :  { %v4076_v25 = vpack.c.bf16 %v225_v14, %v223_v13  ;;  %v713_v13 = vld [vmem:[#allocation9 + $0x30] sm:$0xff]  ;;  %v716_v14 = vld [vmem:[#allocation9 + $0x48] sm:$0xff]  ;;  %v735_v6 = vld [vmem:[#allocation9 + $0xe0] sm:$0xff] }
  0x9b   :  { %4139 = vmatprep.subr.bf16.mxu1 %v6004_v21 }
  0x9c   :  { %4061 = vmatpush1.bf16.msra.mxu0 %v4060_v24  ;;  %v445_v24 = vld [vmem:[#allocation11 + $0x170] sm:$0xff] }
  0x9d   :  { %4063 = vmatprep.subr.bf16.mxu0 %v4062_v27  ;;  %v227_v27 = vld [vmem:[#allocation7 + $0x280] sm:$0xff]  ;;  %v6007_v33 = vpack.c.bf16 %v445_v24, %v443_v23  ;;  %v4230_v23 = vpack.c.bf16 %v718_v15, %v716_v14  ;;  %v741_v15 = vld [vmem:[#allocation9 + $0x110] sm:$0xff] }
  0x9e   :  { %v4080_v36 = vpack.c.bf16 %v229_v28, %v227_v27  ;;  %v715_v24 = vld [vmem:[#allocation9 + $0x40] sm:$0xff]  ;;  %v722_v27 = vld [vmem:[#allocation9 + $0x78] sm:$0xff] }
  0x9f   :  { %320 = vmatmul.mubr.f32.vlgmr.msra.gmra.mrb[0].mxu0 %v144_v38  ;;  %v231_v38 = vld [vmem:[#allocation7 + $0x2a0] sm:$0xff]  ;;  %4141 = vmatpush1.bf16.msra.mxu1 %v6007_v33 }
  0xa0   :  { %4065 = vmatpush1.bf16.msra.mxu0 %v4064_v39  ;;  %390 = vmatprep.mubr.f32.mxu0 %v5784_v54  ;;  %v233_v39 = vld [vmem:[#allocation7 + $0x2b0] sm:$0xff]  ;;  %v239_v54 = vld [vmem:[#allocation7 + $0x2e0] sm:$0xff] }
  0xa1   :  { %4067 = vmatprep.subr.bf16.mxu0 %v4066_v42  ;;  %v4084_v42 = vpack.c.bf16 %v233_v39, %v231_v38  ;;  %v4092_v60 = vpack.c.bf16 %v241_v57, %v239_v54  ;;  %v726_v38 = vld [vmem:[#allocation9 + $0x98] sm:$0xff]  ;;  %v739_v14 = vld [vmem:[#allocation9 + $0x100] sm:$0xff] }
  0xa2   :  { %v734_v54 = vld [vmem:[#allocation9 + $0xd8] sm:$0xff] }
  0xa4   :  { %4069 = vmatpush1.bf16.msra.mxu0 %v4068_v53  ;;  %v4090_v53 = vpack.c.bf16 %v242_v51, %v240_v48  ;;  %v727_v51 = vld [vmem:[#allocation9 + $0xa0] sm:$0xff] }
  0xa5   :  { %4071 = vmatprep.subr.bf16.mxu0 %v4070_v59  ;;  %v710_v59 = vld [vmem:[#allocation9 + $0x18] sm:$0xff] }
  0xa6   :  { %v4222_v61 = vpack.c.bf16 %v710_v59, %v708_v58  ;;  %v731_v59 = vld [vmem:[#allocation9 + $0xc0] sm:$0xff] }
  0xa8   :  { %4073 = vmatpush1.bf16.msra.mxu0 %v4072_v8  ;;  %v146_v8 = vld [vmem:[%s7181_s0 + $0x10] sm:$0xff] }
  0xa9   :  { %4075 = vmatprep.subr.bf16.mxu0 %v4074_v11  ;;  %v711_v11 = vld [vmem:[#allocation9 + $0x20] sm:$0xff] }
  0xaa   :  { %v4228_v16 = vpack.c.bf16 %v713_v13, %v711_v11 }
  0xac   :  { %4077 = vmatpush1.bf16.msra.mxu0 %v4076_v25  ;;  %v717_v25 = vld [vmem:[#allocation9 + $0x50] sm:$0xff] }
  0xad   :  { %4079 = vmatprep.subr.bf16.mxu0 %v4078_v26  ;;  %v720_v26 = vld [vmem:[#allocation9 + $0x68] sm:$0xff]  ;;  %v4232_v28 = vpack.c.bf16 %v717_v25, %v715_v24  ;;  %v6028_v24 = vpack.c.bf16 %v741_v15, %v739_v14 }
  0xae   :  { %v4234_v29 = vpack.c.bf16 %v722_v27, %v720_v26  ;;  %v743_v26 = vld [vmem:[#allocation9 + $0x120] sm:$0xff]  ;;  %v745_v27 = vld [vmem:[#allocation9 + $0x130] sm:$0xff]  ;;  %v760_v14 = vld [vmem:[#allocation9 + $0x1a8] sm:$0xff] }
  0xb0   :  { %4081 = vmatpush1.bf16.msra.mxu0 %v4080_v36  ;;  %v721_v36 = vld [vmem:[#allocation9 + $0x70] sm:$0xff] }
  0xb1   :  { %4083 = vmatprep.subr.bf16.mxu0 %v4082_v37  ;;  %v724_v37 = vld [vmem:[#allocation9 + $0x88] sm:$0xff]  ;;  %v4236_v39 = vpack.c.bf16 %v721_v36, %v719_v30  ;;  %v6034_v30 = vpack.c.bf16 %v745_v27, %v743_v26  ;;  %v453_v26 = vld [vmem:[#allocation11 + $0x1b0] sm:$0xff] }
  0xb2   :  { %v4238_v40 = vpack.c.bf16 %v726_v38, %v724_v37  ;;  %v747_v37 = vld [vmem:[#allocation9 + $0x140] sm:$0xff]  ;;  %v749_v38 = vld [vmem:[#allocation9 + $0x150] sm:$0xff] }
  0xb4   :  { %4085 = vmatpush1.bf16.msra.mxu0 %v4084_v42  ;;  %v725_v42 = vld [vmem:[#allocation9 + $0x90] sm:$0xff] }
  0xb5   :  { %4087 = vmatprep.subr.bf16.mxu0 %v4086_v45  ;;  %v728_v45 = vld [vmem:[#allocation9 + $0xa8] sm:$0xff]  ;;  %v4240_v47 = vpack.c.bf16 %v725_v42, %v723_v41  ;;  %v6040_v41 = vpack.c.bf16 %v749_v38, %v747_v37  ;;  %v761_v37 = vld [vmem:[#allocation9 + $0x1b0] sm:$0xff] }
  0xb6   :  { %v4242_v48 = vpack.c.bf16 %v730_v46, %v728_v45  ;;  %v751_v45 = vld [vmem:[#allocation9 + $0x160] sm:$0xff]  ;;  %v753_v46 = vld [vmem:[#allocation9 + $0x170] sm:$0xff]  ;;  %v456_v38 = vld [vmem:[#allocation11 + $0x1c8] sm:$0xff] }
  0xb7   :  { %7263 = vst [vmem:[#allocation24_spill] sm:$0xff] %v6040_v41 }
  0xb8   :  { %4089 = vmatpush1.bf16.msra.mxu0 %v4088_v52  ;;  %v729_v52 = vld [vmem:[#allocation9 + $0xb0] sm:$0xff] }
  0xb9   :  { %4091 = vmatprep.subr.bf16.mxu0 %v4090_v53  ;;  %v732_v53 = vld [vmem:[#allocation9 + $0xc8] sm:$0xff]  ;;  %v4244_v57 = vpack.c.bf16 %v729_v52, %v727_v51  ;;  %v450_v51 = vld [vmem:[#allocation11 + $0x198] sm:$0xff] }
  0xba   :  { %v6014_v58 = vpack.c.bf16 %v734_v54, %v732_v53  ;;  %v756_v52 = vld [vmem:[#allocation9 + $0x188] sm:$0xff]  ;;  %v758_v54 = vld [vmem:[#allocation9 + $0x198] sm:$0xff] }
  0xbc   :  { %4093 = vmatpush1.bf16.msra.mxu0 %v4092_v60  ;;  %v733_v60 = vld [vmem:[#allocation9 + $0xd0] sm:$0xff] }
  0xbd   :  { %4223 = vmatprep.subr.bf16.mxu0 %v4222_v61  ;;  %v736_v61 = vld [vmem:[#allocation9 + $0xe8] sm:$0xff]  ;;  %v6016_v63 = vpack.c.bf16 %v733_v60, %v731_v59  ;;  %v449_v59 = vld [vmem:[#allocation11 + $0x190] sm:$0xff]  ;;  %v6052_v60 = vpack.c.bf16 %v758_v54, %v756_v52  ;;  %v455_v52 = vld [vmem:[#allocation11 + $0x1c0] sm:$0xff] }
  0xbe   :  { %v6019_v3 = vpack.c.bf16 %v738_v62, %v736_v61  ;;  %v755_v62 = vld [vmem:[#allocation9 + $0x180] sm:$0xff]  ;;  %v457_v54 = vld [vmem:[#allocation11 + $0x1d0] sm:$0xff] }
  0xbf   :  { %391 = vmatmul.mubr.f32.vlgmr.msra.gmra.mrb[0].mxu0 %v146_v8  ;;  %v737_v8 = vld [vmem:[#allocation9 + $0xf0] sm:$0xff]  ;;  %7266 = vst [vmem:[#allocation27_spill] sm:$0xff] %v6052_v60 }
  0xc0   :  { %4225 = vmatpush1.bf16.msra.mxu0 %v4224_v9  ;;  %v740_v9 = vld [vmem:[#allocation9 + $0x108] sm:$0xff]  ;;  %v6022_v11 = vpack.c.bf16 %v737_v8, %v735_v6  ;;  %v757_v6 = vld [vmem:[#allocation9 + $0x190] sm:$0xff] }
  0xc1   :  { %4227 = vmatprep.subr.bf16.mxu0 %v4226_v10  ;;  %v742_v10 = vld [vmem:[#allocation9 + $0x118] sm:$0xff]  ;;  %v6057_v8 = vpack.c.bf16 %v757_v6, %v755_v62  ;;  %v765_v62 = vld [vmem:[#allocation9 + $0x1d0] sm:$0xff]  ;;  %v460_v6 = vld [vmem:[#allocation11 + $0x1e8] sm:$0xff] }
  0xc2   :  { %v6025_v13 = vpack.c.bf16 %v742_v10, %v740_v9  ;;  %v452_v9 = vld [vmem:[#allocation11 + $0x1a8] sm:$0xff]  ;;  %v454_v10 = vld [vmem:[#allocation11 + $0x1b8] sm:$0xff] }
  0xc3   :  { %7267 = vst [vmem:[#allocation28_spill] sm:$0xff] %v6057_v8  ;;  %v6062_v15 = vpack.c.bf16 %v454_v10, %v452_v9  ;;  %v462_v9 = vld [vmem:[#allocation11 + $0x1f8] sm:$0xff] }
  0xc4   :  { %4229 = vmatpush1.bf16.msra.mxu0 %v4228_v16  ;;  %v744_v16 = vld [vmem:[#allocation9 + $0x128] sm:$0xff] }
  0xc5   :  { %4231 = vmatprep.subr.bf16.mxu0 %v4230_v23  ;;  %v746_v23 = vld [vmem:[#allocation9 + $0x138] sm:$0xff] }
  0xc6   :  { %v6031_v25 = vpack.c.bf16 %v746_v23, %v744_v16  ;;  %v762_v16 = vld [vmem:[#allocation9 + $0x1b8] sm:$0xff]  ;;  %v451_v23 = vld [vmem:[#allocation11 + $0x1a0] sm:$0xff] }
  0xc7   :  { %v6064_v27 = vpack.c.bf16 %v762_v16, %v760_v14  ;;  %v6084_v14 = vpack.c.bf16 %v462_v9, %v460_v6  ;;  %v768_v16 = vld [vmem:[#allocation9 + $0x1e8] sm:$0xff] }
  0xc8   :  { %4233 = vmatpush1.bf16.msra.mxu0 %v4232_v28  ;;  %v748_v28 = vld [vmem:[#allocation9 + $0x148] sm:$0xff] }
  0xc9   :  { %4235 = vmatprep.subr.bf16.mxu0 %v4234_v29  ;;  %v750_v29 = vld [vmem:[#allocation9 + $0x158] sm:$0xff]  ;;  %7268 = vst [vmem:[#allocation29_spill] sm:$0xff] %v6064_v27 }
  0xca   :  { %v6037_v36 = vpack.c.bf16 %v750_v29, %v748_v28  ;;  %v6066_v28 = vpack.c.bf16 %v453_v26, %v451_v23  ;;  %v759_v29 = vld [vmem:[#allocation9 + $0x1a0] sm:$0xff]  ;;  %v770_v23 = vld [vmem:[#allocation9 + $0x1f8] sm:$0xff] }
  0xcb   :  { %v459_v26 = vld [vmem:[#allocation11 + $0x1e0] sm:$0xff] }
  0xcc   :  { %4237 = vmatpush1.bf16.msra.mxu0 %v4236_v39  ;;  %v752_v39 = vld [vmem:[#allocation9 + $0x168] sm:$0xff] }
  0xcd   :  { %4239 = vmatprep.subr.bf16.mxu0 %v4238_v40  ;;  %v754_v40 = vld [vmem:[#allocation9 + $0x178] sm:$0xff] }
  0xce   :  { %v6043_v42 = vpack.c.bf16 %v754_v40, %v752_v39  ;;  %v6069_v39 = vpack.c.bf16 %v761_v37, %v759_v29  ;;  %v458_v40 = vld [vmem:[#allocation11 + $0x1d8] sm:$0xff]  ;;  %v6086_v29 = vpack.c.bf16 %v770_v23, %v768_v16  ;;  %v461_v37 = vld [vmem:[#allocation11 + $0x1f0] sm:$0xff]  ;;  %v243_v16 = vld [vmem:[%s7183_s2] sm:$0x3] }
  0xd0   :  { %4241 = vmatpush1.bf16.msra.mxu0 %v4240_v47  ;;  %7264 = vst [vmem:[#allocation25_spill] sm:$0xff] %v6043_v42  ;;  %v6046_v47 = vpack.c.bf16 %v753_v46, %v751_v45  ;;  %7269 = vst [vmem:[#allocation30_spill] sm:$0xff] %v6069_v39  ;;  %v764_v45 = vld [vmem:[#allocation9 + $0x1c8] sm:$0xff]  ;;  %v766_v46 = vld [vmem:[#allocation9 + $0x1d8] sm:$0xff] }
  0xd1   :  { %4243 = vmatprep.subr.bf16.mxu0 %v4242_v48  ;;  %v448_v48 = vld [vmem:[#allocation11 + $0x188] sm:$0xff]  ;;  %7272 = vst [vmem:[#allocation33_spill] sm:$0xff] %v6086_v29 }
  0xd2   :  { %7265 = vst [vmem:[#allocation26_spill] sm:$0xff] %v6046_v47  ;;  %v6050_v53 = vpack.c.bf16 %v450_v51, %v448_v48  ;;  %v6073_v48 = vpack.c.bf16 %v458_v40, %v456_v38  ;;  %v6075_v51 = vpack.c.bf16 %v766_v46, %v764_v45  ;;  %v767_v38 = vld [vmem:[#allocation9 + $0x1e0] sm:$0xff]  ;;  %v769_v40 = vld [vmem:[#allocation9 + $0x1f0] sm:$0xff]  ;;  %v6089_v45 = vpack.c.bf16 %v461_v37, %v459_v26 }
  0xd3   :  { %v6093_v46 = vpack.c.bf16 %v769_v40, %v767_v38 }
  0xd4   :  { %4245 = vmatpush1.bf16.msra.mxu0 %v4244_v57  ;;  %v447_v57 = vld [vmem:[#allocation11 + $0x180] sm:$0xff]  ;;  %4143 = vmatprep.subr.bf16.mxu1 %v6050_v53  ;;  %7270 = vst [vmem:[#allocation31_spill] sm:$0xff] %v6075_v51 }
  0xd5   :  { %4247 = vmatprep.subr.bf16.mxu0 %v6014_v58  ;;  %v6054_v61 = vpack.c.bf16 %v449_v59, %v447_v57  ;;  %v763_v57 = vld [vmem:[#allocation9 + $0x1c0] sm:$0xff]  ;;  %v6078_v59 = vpack.c.bf16 %v457_v54, %v455_v52  ;;  %7273 = vst [vmem:[#allocation34_spill] sm:$0xff] %v6093_v46  ;;  %v573_v52 = vld [vmem:[#allocation12 + $0x8] sm:$0xff]  ;;  %v575_v54 = vld [vmem:[#allocation12 + $0x18] sm:$0xff] }
  0xd6   :  { %v6082_v10 = vpack.c.bf16 %v765_v62, %v763_v57  ;;  %v4158_v57 = vpack.c.bf16 %v575_v54, %v573_v52  ;;  %v7192_v62 = vlaneseq }
  0xd7   :  { %4145 = vmatpush1.bf16.msra.mxu1 %v6054_v61 }
  0xd8   :  { %4249 = vmatpush1.bf16.msra.mxu0 %v6016_v63  ;;  %4147 = vmatprep.subr.bf16.mxu1 %v6062_v15  ;;  %7271 = vst [vmem:[#allocation32_spill] sm:$0xff] %v6082_v10  ;;  %v6099_v6 = vshrl.u32 %v7192_v62, 7  ;;  %v574_v62 = vld [vmem:[#allocation12 + $0x10] sm:$0xff] }
  0xd9   :  { %4251 = vmatprep.subr.bf16.mxu0 %v6019_v3 }
  0xda   :  { %v6102_v9 = vsub.s32 0, %v6099_v6  ;;  %v6108_v23 = vsub.s32 1, %v6099_v6 }
  0xdb   :  { %4149 = vmatpush1.bf16.msra.mxu1 %v6066_v28 }
  0xdc   :  { %4253 = vmatpush1.bf16.msra.mxu0 %v6022_v11  ;;  %4151 = vmatprep.subr.bf16.mxu1 %v6073_v48  ;;  %v248_v26 = vrot.slane %v243_v16, %v6102_v9  ;;  %v252_v37 = vrot.slane %v243_v16, %v6108_v23 }
  0xdd   :  { %4255 = vmatprep.subr.bf16.mxu0 %v6025_v13 }
  0xdf   :  { %4153 = vmatpush1.bf16.msra.mxu1 %v6078_v59 }
  0xe0   :  { %4257 = vmatpush1.bf16.msra.mxu0 %v6028_v24  ;;  %4155 = vmatprep.subr.bf16.mxu1 %v6084_v14 }
  0xe1   :  { %4259 = vmatprep.subr.bf16.mxu0 %v6031_v25 }
  0xe3   :  { %4157 = vmatpush1.bf16.msra.mxu1 %v6089_v45 }
  0xe4   :  { %4261 = vmatpush1.bf16.msra.mxu0 %v6034_v30  ;;  %4159 = vmatprep.subr.bf16.mxu1 %v4158_v57 }
  0xe5   :  { %4263 = vmatprep.subr.bf16.mxu0 %v6037_v36 }
  0xe8   :  { %4265 = vmatpush1.bf16.msra.mxu0 %v6040_v41  ;;  %v589_v41 = vld [vmem:[#allocation12 + $0x88] sm:$0xff] }
  0xe9   :  { %4267 = vmatprep.subr.bf16.mxu0 %v6043_v42  ;;  %v586_v42 = vld [vmem:[#allocation12 + $0x70] sm:$0xff] }
  0xec   :  { %4269 = vmatpush1.bf16.msra.mxu0 %v6046_v47  ;;  %v582_v47 = vld [vmem:[#allocation12 + $0x50] sm:$0xff] }
  0xed   :  { %4271 = vmatprep.subr.bf16.mxu0 %v6052_v60  ;;  %v580_v60 = vld [vmem:[#allocation12 + $0x40] sm:$0xff] }
  0xf0   :  { %4273 = vmatpush1.bf16.msra.mxu0 %v6057_v8  ;;  %v578_v8 = vld [vmem:[#allocation12 + $0x30] sm:$0xff] }
  0xf1   :  { %4275 = vmatprep.subr.bf16.mxu0 %v6064_v27  ;;  %v576_v27 = vld [vmem:[#allocation12 + $0x20] sm:$0xff] }
  0xf4   :  { %4277 = vmatpush1.bf16.msra.mxu0 %v6069_v39 }
  0xf5   :  { %4279 = vmatprep.subr.bf16.mxu0 %v6075_v51 }
  0xf8   :  { %4281 = vmatpush1.bf16.msra.mxu0 %v6082_v10 }
  0xf9   :  { %4283 = vmatprep.subr.bf16.mxu0 %v6086_v29  ;;  %v579_v29 = vld [vmem:[#allocation12 + $0x38] sm:$0xff] }
  0xfc   :  { %4285 = vmatpush1.bf16.msra.mxu0 %v6093_v46  ;;  %v577_v46 = vld [vmem:[#allocation12 + $0x28] sm:$0xff] }
  0xfd   :  { %4351 = vmatprep.subr.bf16.mxu0 %v4158_v57  ;;  %v572_v57 = vld [vmem:[#allocation12] sm:$0xff]  ;;  %v4162_v39 = vpack.c.bf16 %v579_v29, %v577_v46  ;;  %v4168_v29 = vpack.c.bf16 %v582_v47, %v580_v60 }
  0xfe   :  { %v4160_v10 = vpack.c.bf16 %v574_v62, %v572_v57  ;;  %v585_v62 = vld [vmem:[#allocation12 + $0x68] sm:$0xff]  ;;  %v587_v57 = vld [vmem:[#allocation12 + $0x78] sm:$0xff] }
  0xff   :  { %v4170_v46 = vpack.c.bf16 %v587_v57, %v585_v62  ;;  %v594_v62 = vld [vmem:[#allocation12 + $0xb0] sm:$0xff]  ;;  %v599_v57 = vld [vmem:[#allocation12 + $0xd8] sm:$0xff] }
 0x192   :  { %v392_v38 = vpop.f32.mrb[0].mxu0 }
 0x193   :  { %v6112_v40 = vadd.f32 %v392_v38, %v248_v26  ;;  %v394_v52 = vpop.f32.mrb[1].mxu0  ;;  %v581_v26 = vld [vmem:[#allocation12 + $0x48] sm:$0xff]  ;;  %v583_v38 = vld [vmem:[#allocation12 + $0x58] sm:$0xff] }
 0x194   :  { %v6114_v54 = vadd.f32 %v394_v52, %v252_v37  ;;  %v4164_v37 = vpack.c.bf16 %v578_v8, %v576_v27  ;;  %v4166_v52 = vpack.c.bf16 %v583_v38, %v581_v26  ;;  %v590_v26 = vld [vmem:[#allocation12 + $0x90] sm:$0xff]  ;;  %v595_v38 = vld [vmem:[#allocation12 + $0xb8] sm:$0xff] }
 0x196   :  { %5593 = vtanh.f32 %v6114_v54 }
 0x197   :  { %5595 = vtanh.f32 %v6112_v40 }
 0x1a0   :  { %v5594_v51 = vpop.eup %5593 }
 0x1a1   :  { %v5596_v16 = vpop.eup %5595  ;;  %539 = vmatprep.mubr.f32.mxu1 %v5594_v51  ;;  %835 = vmatprep.mubr.f32.mxu0 %v5594_v51  ;;  %v584_v51 = vld [vmem:[#allocation12 + $0x60] sm:$0xff] }
 0x1a2   :  { %540 = vmatmul.mubr.f32.vlgmr.msra.gmra.mrb[0].mxu1 %v5596_v16  ;;  %836 = vmatmul.mubr.f32.vlgmr.msra.gmra.mrb[2].mxu0 %v5596_v16  ;;  %v591_v16 = vld [vmem:[#allocation12 + $0x98] sm:$0xff]  ;;  %v4172_v8 = vpack.c.bf16 %v586_v42, %v584_v51  ;;  %v598_v51 = vld [vmem:[#allocation12 + $0xd0] sm:$0xff] }
 0x1a3   :  { %4161 = vmatpush1.bf16.msra.mxu1 %v4160_v10  ;;  %4353 = vmatpush1.bf16.msra.mxu0 %v4160_v10  ;;  %v4174_v27 = vpack.c.bf16 %v591_v16, %v589_v41  ;;  %v588_v10 = vld [vmem:[#allocation12 + $0x80] sm:$0xff]  ;;  %v603_v16 = vld [vmem:[#allocation12 + $0xf8] sm:$0xff] }
 0x1a4   :  { %4163 = vmatprep.subr.bf16.mxu1 %v4162_v39  ;;  %4355 = vmatprep.subr.bf16.mxu0 %v4162_v39  ;;  %v593_v39 = vld [vmem:[#allocation12 + $0xa8] sm:$0xff]  ;;  %v4176_v47 = vpack.c.bf16 %v590_v26, %v588_v10  ;;  %v600_v26 = vld [vmem:[#allocation12 + $0xe0] sm:$0xff] }
 0x1a5   :  { %v4178_v60 = vpack.c.bf16 %v595_v38, %v593_v39  ;;  %v602_v39 = vld [vmem:[#allocation12 + $0xf0] sm:$0xff]  ;;  %v607_v38 = vld [vmem:[#allocation12 + $0x118] sm:$0xff] }
 0x1a7   :  { %4165 = vmatpush1.bf16.msra.mxu1 %v4164_v37  ;;  %4357 = vmatpush1.bf16.msra.mxu0 %v4164_v37  ;;  %v592_v37 = vld [vmem:[#allocation12 + $0xa0] sm:$0xff] }
 0x1a8   :  { %4167 = vmatprep.subr.bf16.mxu1 %v4166_v52  ;;  %4359 = vmatprep.subr.bf16.mxu0 %v4166_v52  ;;  %v597_v52 = vld [vmem:[#allocation12 + $0xc8] sm:$0xff]  ;;  %v4180_v42 = vpack.c.bf16 %v594_v62, %v592_v37  ;;  %v4188_v37 = vpack.c.bf16 %v602_v39, %v600_v26  ;;  %v604_v62 = vld [vmem:[#allocation12 + $0x100] sm:$0xff] }
 0x1a9   :  { %v4182_v41 = vpack.c.bf16 %v599_v57, %v597_v52  ;;  %v606_v52 = vld [vmem:[#allocation12 + $0x110] sm:$0xff]  ;;  %v611_v57 = vld [vmem:[#allocation12 + $0x138] sm:$0xff]  ;;  %v612_v39 = vld [vmem:[#allocation12 + $0x140] sm:$0xff] }
 0x1ab   :  { %4169 = vmatpush1.bf16.msra.mxu1 %v4168_v29  ;;  %4361 = vmatpush1.bf16.msra.mxu0 %v4168_v29  ;;  %v596_v29 = vld [vmem:[#allocation12 + $0xc0] sm:$0xff] }
 0x1ac   :  { %4171 = vmatprep.subr.bf16.mxu1 %v4170_v46  ;;  %4363 = vmatprep.subr.bf16.mxu0 %v4170_v46  ;;  %v601_v46 = vld [vmem:[#allocation12 + $0xe8] sm:$0xff]  ;;  %v4184_v10 = vpack.c.bf16 %v598_v51, %v596_v29  ;;  %v4192_v29 = vpack.c.bf16 %v606_v52, %v604_v62  ;;  %v608_v51 = vld [vmem:[#allocation12 + $0x120] sm:$0xff] }
 0x1ad   :  { %v616_v52 = vld [vmem:[#allocation12 + $0x160] sm:$0xff] }
 0x1af   :  { %4173 = vmatpush1.bf16.msra.mxu1 %v4172_v8  ;;  %4365 = vmatpush1.bf16.msra.mxu0 %v4172_v8  ;;  %v4186_v8 = vpack.c.bf16 %v603_v16, %v601_v46  ;;  %v610_v46 = vld [vmem:[#allocation12 + $0x130] sm:$0xff]  ;;  %v615_v16 = vld [vmem:[#allocation12 + $0x158] sm:$0xff] }
 0x1b0   :  { %4175 = vmatprep.subr.bf16.mxu1 %v4174_v27  ;;  %4367 = vmatprep.subr.bf16.mxu0 %v4174_v27  ;;  %v605_v27 = vld [vmem:[#allocation12 + $0x108] sm:$0xff]  ;;  %v4196_v26 = vpack.c.bf16 %v610_v46, %v608_v51  ;;  %v622_v46 = vld [vmem:[#allocation12 + $0x190] sm:$0xff] }
 0x1b3   :  { %4177 = vmatpush1.bf16.msra.mxu1 %v4176_v47  ;;  %4369 = vmatpush1.bf16.msra.mxu0 %v4176_v47  ;;  %v4190_v47 = vpack.c.bf16 %v607_v38, %v605_v27  ;;  %v614_v27 = vld [vmem:[#allocation12 + $0x150] sm:$0xff]  ;;  %v619_v38 = vld [vmem:[#allocation12 + $0x178] sm:$0xff] }
 0x1b4   :  { %4179 = vmatprep.subr.bf16.mxu1 %v4178_v60  ;;  %4371 = vmatprep.subr.bf16.mxu0 %v4178_v60  ;;  %v609_v60 = vld [vmem:[#allocation12 + $0x128] sm:$0xff]  ;;  %v4200_v62 = vpack.c.bf16 %v614_v27, %v612_v39  ;;  %v624_v39 = vld [vmem:[#allocation12 + $0x1a0] sm:$0xff]  ;;  %v626_v27 = vld [vmem:[#allocation12 + $0x1b0] sm:$0xff] }
 0x1b7   :  { %4181 = vmatpush1.bf16.msra.mxu1 %v4180_v42  ;;  %4373 = vmatpush1.bf16.msra.mxu0 %v4180_v42  ;;  %v4194_v42 = vpack.c.bf16 %v611_v57, %v609_v60  ;;  %v618_v60 = vld [vmem:[#allocation12 + $0x170] sm:$0xff]  ;;  %v623_v57 = vld [vmem:[#allocation12 + $0x198] sm:$0xff] }
 0x1b8   :  { %4183 = vmatprep.subr.bf16.mxu1 %v4182_v41  ;;  %4375 = vmatprep.subr.bf16.mxu0 %v4182_v41  ;;  %v613_v41 = vld [vmem:[#allocation12 + $0x148] sm:$0xff]  ;;  %v4204_v51 = vpack.c.bf16 %v618_v60, %v616_v52  ;;  %v628_v52 = vld [vmem:[#allocation12 + $0x1c0] sm:$0xff]  ;;  %v630_v60 = vld [vmem:[#allocation12 + $0x1d0] sm:$0xff] }
 0x1bb   :  { %4185 = vmatpush1.bf16.msra.mxu1 %v4184_v10  ;;  %4377 = vmatpush1.bf16.msra.mxu0 %v4184_v10  ;;  %v4198_v10 = vpack.c.bf16 %v615_v16, %v613_v41  ;;  %v625_v16 = vld [vmem:[#allocation12 + $0x1a8] sm:$0xff] }
 0x1bc   :  { %4187 = vmatprep.subr.bf16.mxu1 %v4186_v8  ;;  %4379 = vmatprep.subr.bf16.mxu0 %v4186_v8  ;;  %v617_v8 = vld [vmem:[#allocation12 + $0x168] sm:$0xff] }
 0x1bf   :  { %4189 = vmatpush1.bf16.msra.mxu1 %v4188_v37  ;;  %4381 = vmatpush1.bf16.msra.mxu0 %v4188_v37  ;;  %v4202_v37 = vpack.c.bf16 %v619_v38, %v617_v8  ;;  %v4212_v8 = vpack.c.bf16 %v626_v27, %v624_v39  ;;  %v629_v38 = vld [vmem:[#allocation12 + $0x1c8] sm:$0xff] }
 0x1c0   :  { %4191 = vmatprep.subr.bf16.mxu1 %v4190_v47  ;;  %4383 = vmatprep.subr.bf16.mxu0 %v4190_v47  ;;  %v621_v47 = vld [vmem:[#allocation12 + $0x188] sm:$0xff] }
 0x1c3   :  { %4193 = vmatpush1.bf16.msra.mxu1 %v4192_v29  ;;  %4385 = vmatpush1.bf16.msra.mxu0 %v4192_v29  ;;  %v4206_v29 = vpack.c.bf16 %v623_v57, %v621_v47  ;;  %v4216_v47 = vpack.c.bf16 %v630_v60, %v628_v52  ;;  %v633_v57 = vld [vmem:[#allocation12 + $0x1e8] sm:$0xff] }
 0x1c4   :  { %4195 = vmatprep.subr.bf16.mxu1 %v4194_v42  ;;  %4387 = vmatprep.subr.bf16.mxu0 %v4194_v42  ;;  %v620_v42 = vld [vmem:[#allocation12 + $0x180] sm:$0xff] }
 0x1c5   :  { %v4208_v41 = vpack.c.bf16 %v622_v46, %v620_v42  ;;  %v632_v42 = vld [vmem:[#allocation12 + $0x1e0] sm:$0xff]  ;;  %v634_v46 = vld [vmem:[#allocation12 + $0x1f0] sm:$0xff] }
 0x1c7   :  { %4197 = vmatpush1.bf16.msra.mxu1 %v4196_v26  ;;  %4389 = vmatpush1.bf16.msra.mxu0 %v4196_v26  ;;  %v627_v26 = vld [vmem:[#allocation12 + $0x1b8] sm:$0xff] }
 0x1c8   :  { %4199 = vmatprep.subr.bf16.mxu1 %v4198_v10  ;;  %4391 = vmatprep.subr.bf16.mxu0 %v4198_v10  ;;  %v4210_v10 = vpack.c.bf16 %v627_v26, %v625_v16  ;;  %v463_v16 = vld [vmem:[%s7187_s6] sm:$0x3] }
 0x1c9   :  { %v468_v26 = vrot.slane %v463_v16, %v6102_v9 }
 0x1cb   :  { %4201 = vmatpush1.bf16.msra.mxu1 %v4200_v62  ;;  %4393 = vmatpush1.bf16.msra.mxu0 %v4200_v62  ;;  %v631_v62 = vld [vmem:[#allocation12 + $0x1d8] sm:$0xff] }
 0x1cc   :  { %4203 = vmatprep.subr.bf16.mxu1 %v4202_v37  ;;  %4395 = vmatprep.subr.bf16.mxu0 %v4202_v37  ;;  %v4214_v37 = vpack.c.bf16 %v631_v62, %v629_v38 }
 0x1cf   :  { %4205 = vmatpush1.bf16.msra.mxu1 %v4204_v51  ;;  %4397 = vmatpush1.bf16.msra.mxu0 %v4204_v51  ;;  %v635_v51 = vld [vmem:[#allocation12 + $0x1f8] sm:$0xff] }
 0x1d0   :  { %4207 = vmatprep.subr.bf16.mxu1 %v4206_v29  ;;  %4399 = vmatprep.subr.bf16.mxu0 %v4206_v29  ;;  %v4218_v29 = vpack.c.bf16 %v635_v51, %v633_v57 }
 0x1d3   :  { %4209 = vmatpush1.bf16.msra.mxu1 %v4208_v41  ;;  %4401 = vmatpush1.bf16.msra.mxu0 %v4208_v41  ;;  %v4220_v41 = vpack.c.bf16 %v634_v46, %v632_v42 }
 0x1d4   :  { %4211 = vmatprep.subr.bf16.mxu1 %v4210_v10  ;;  %4403 = vmatprep.subr.bf16.mxu0 %v4210_v10  ;;  %v472_v10 = vrot.slane %v463_v16, %v6108_v23 }
 0x1d7   :  { %4213 = vmatpush1.bf16.msra.mxu1 %v4212_v8  ;;  %4405 = vmatpush1.bf16.msra.mxu0 %v4212_v8 }
 0x1d8   :  { %4215 = vmatprep.subr.bf16.mxu1 %v4214_v37  ;;  %4407 = vmatprep.subr.bf16.mxu0 %v4214_v37 }
 0x1db   :  { %4217 = vmatpush1.bf16.msra.mxu1 %v4216_v47  ;;  %4409 = vmatpush1.bf16.msra.mxu0 %v4216_v47 }
 0x1dc   :  { %4219 = vmatprep.subr.bf16.mxu1 %v4218_v29  ;;  %4411 = vmatprep.subr.bf16.mxu0 %v4218_v29 }
 0x1df   :  { %4221 = vmatpush1.bf16.msra.mxu1 %v4220_v41  ;;  %4413 = vmatpush1.bf16.msra.mxu0 %v4220_v41 }
 0x1e0   :  { %4287 = vmatprep.subr.bf16.mxu1 %v5936_v2  ;;  %v5785_v2 = vmov 1966171168  }
 0x1e1   :  { %v552_v47 = vunpack.c.l.s4 %v5785_v2  ;;  %v1187_v2 = vld [vmem:[#allocation9 + $0xb0] sm:$0xff] }
 0x1e3   :  { %v553_v57 = vunpack.c.0.s8 %v552_v47 }
 0x1e5   :  { %v6126_v29 = vsub.s32 %v553_v57, %v6099_v6  ;;  %v7277_v57 = vld [vmem:[#allocation24_spill] sm:$0xff] }
 0x275   :  { %v541_v39 = vpop.f32.mrb[0].mxu1  ;;  %v837_v27 = vpop.f32.mrb[2].mxu0 }
 0x276   :  { %v542_v8 = vadd.f32 %v541_v39, %v468_v26  ;;  %v543_v38 = vpop.f32.mrb[1].mxu1  ;;  %v839_v62 = vpop.f32.mrb[3].mxu0 }
 0x277   :  { %v544_v37 = vadd.f32 %v543_v38, %v472_v10  ;;  %v845_v52 = vrot.slane %v839_v62, 7  ;;  %v7274_v10 = vlaneseq  ;;  %v1186_v38 = vld [vmem:[#allocation9 + $0xa8] sm:$0xff]  ;;  %v1188_v62 = vld [vmem:[#allocation9 + $0xb8] sm:$0xff] }
 0x278   :  { %5597 = vtanh.f32 %v542_v8  ;;  %v1183_v8 = vld [vmem:[#allocation9 + $0x90] sm:$0xff] }
 0x279   :  { %5599 = vtanh.f32 %v544_v37  ;;  %v849_v60 = vadd.f32 %v6114_v54, %v845_v52  ;;  %vm6131_vm0 = vcmp.lt.s32.totalorder %v7274_v10, 256  ;;  %v6201_v52 = vpack.c.bf16 %v1188_v62, %v1186_v38  ;;  %v1322_v38 = vld [vmem:[#allocation11 + $0x60] sm:$0xff]  ;;  %v1324_v62 = vld [vmem:[#allocation11 + $0x70] sm:$0xff] }
 0x27b   :  { %5601 = vtanh.f32 %v849_v60  ;;  %v1185_v60 = vld [vmem:[#allocation9 + $0xa0] sm:$0xff] }
 0x27c   :  { %v6204_v47 = vpack.c.bf16 %v1187_v2, %v1185_v60  ;;  %v1489_v60 = vld [vmem:[#allocation12 + $0x8] sm:$0xff]  ;;  %v1491_v2 = vld [vmem:[#allocation12 + $0x18] sm:$0xff] }
 0x282   :  { %v5598_v51 = vpop.eup %5597 }
 0x283   :  { %v5600_v42 = vpop.eup %5599 }
 0x284   :  { %v550_v46 = vcombine.low %v5598_v51, %v5600_v42  ;;  %700 = vmatprep.mubr.f32.mxu1 %v5600_v42  ;;  %v1311_v42 = vld [vmem:[#allocation11 + $0x8] sm:$0xff] }
 0x285   :  { %v5602_v41 = vpop.eup %5601  ;;  %701 = vmatmul.mubr.f32.vlgmr.msra.gmra.mrb[2].mxu1 %v5598_v51  ;;  %v7278_v51 = vld [vmem:[#allocation25_spill] sm:$0xff] }
 0x286   :  { %v557_v16 = vrot.slane %v550_v46, %v6126_v29  ;;  %4289 = vmatpush1.bf16.msra.mxu1 %v5939_v7  ;;  %v919_v26 = vrot.slane %v5602_v41, 1  ;;  %v844_v7 = vrot.slane %v837_v27, 7  ;;  %v1181_v27 = vld [vmem:[#allocation9 + $0x80] sm:$0xff]  ;;  %v1313_v46 = vld [vmem:[#allocation11 + $0x18] sm:$0xff] }
 0x287   :  { %4291 = vmatprep.subr.bf16.mxu1 %v5941_v12  ;;  %v6198_v37 = vpack.c.bf16 %v1183_v8, %v1181_v27  ;;  %v6228_v41 = vpack.c.bf16 %v1313_v46, %v1311_v42  ;;  %v1323_v27 = vld [vmem:[#allocation11 + $0x68] sm:$0xff]  ;;  %v1325_v8 = vld [vmem:[#allocation11 + $0x78] sm:$0xff] }
 0x288   :  { %v564_v6 = vrot.slane %v557_v16, %v6126_v29  ;;  %986 = vmatprep.mubr.f32.mxu1 %v919_v26  ;;  %v848_v12 = vadd.f32 %v6112_v40, %v844_v7  ;;  %v993_v16 = vld [vmem:[%s7187_s6] sm:$0x3] }
 0x289   :  { %4479 = vmatprep.subr.bf16.mxu0 %v6228_v41  ;;  %v1002_v10 = vrot.slane %v993_v16, %v6108_v23  ;;  %v1497_v42 = vld [vmem:[#allocation12 + $0x48] sm:$0xff] }
 0x28a   :  { %570 = vst.msk [vmem:[#allocation2] ss:$8 sm:$0x3] %vm6131_vm0, %v564_v6  ;;  %4293 = vmatpush1.bf16.msra.mxu1 %v5944_v17  ;;  %5603 = vtanh.f32 %v848_v12  ;;  %v1166_v17 = vld [vmem:[#allocation9 + $0x8] sm:$0xff] }
 0x28b   :  { %4295 = vmatprep.subr.bf16.mxu1 %v5947_v22  ;;  %v1168_v22 = vld [vmem:[#allocation9 + $0x18] sm:$0xff]  ;;  %v1327_v46 = vld [vmem:[#allocation11 + $0x88] sm:$0xff] }
 0x28e   :  { %4297 = vmatpush1.bf16.msra.mxu1 %v5950_v31  ;;  %v6168_v31 = vpack.c.bf16 %v1168_v22, %v1166_v17  ;;  %v1310_v22 = vld [vmem:[#allocation11] sm:$0xff] }
 0x28f   :  { %4299 = vmatprep.subr.bf16.mxu1 %v5953_v32  ;;  %v1165_v32 = vld [vmem:[#allocation9] sm:$0xff] }
 0x292   :  { %4301 = vmatpush1.bf16.msra.mxu1 %v5956_v43  ;;  %v1167_v43 = vld [vmem:[#allocation9 + $0x10] sm:$0xff] }
 0x293   :  { %4303 = vmatprep.subr.bf16.mxu1 %v5959_v44 }
 0x294   :  { %v6170_v44 = vpop.eup %5603 }
 0x296   :  { %4305 = vmatpush1.bf16.msra.mxu1 %v5962_v55  ;;  %v1170_v55 = vld [vmem:[#allocation9 + $0x28] sm:$0xff] }
 0x297   :  { %4307 = vmatprep.subr.bf16.mxu1 %v5965_v56  ;;  %v1172_v56 = vld [vmem:[#allocation9 + $0x38] sm:$0xff] }
 0x29a   :  { %4309 = vmatpush1.bf16.msra.mxu1 %v5968_v4  ;;  %v6173_v4 = vpack.c.bf16 %v1167_v43, %v1165_v32  ;;  %v1312_v32 = vld [vmem:[#allocation11 + $0x10] sm:$0xff]  ;;  %v1315_v43 = vld [vmem:[#allocation11 + $0x28] sm:$0xff] }
 0x29b   :  { %4311 = vmatprep.subr.bf16.mxu1 %v5971_v5  ;;  %v918_v5 = vrot.slane %v6170_v44, 1  ;;  %v1317_v44 = vld [vmem:[#allocation11 + $0x38] sm:$0xff] }
 0x29e   :  { %4313 = vmatpush1.bf16.msra.mxu1 %v5974_v19  ;;  %v6177_v19 = vpack.c.bf16 %v1172_v56, %v1170_v55  ;;  %v6236_v56 = vpack.c.bf16 %v1312_v32, %v1310_v22  ;;  %v1498_v22 = vld [vmem:[#allocation12 + $0x50] sm:$0xff] }
 0x29f   :  { %4315 = vmatprep.subr.bf16.mxu1 %v5977_v20  ;;  %v1169_v20 = vld [vmem:[#allocation9 + $0x20] sm:$0xff] }
 0x2a2   :  { %4317 = vmatpush1.bf16.msra.mxu1 %v5980_v34  ;;  %v1171_v34 = vld [vmem:[#allocation9 + $0x30] sm:$0xff] }
 0x2a3   :  { %4319 = vmatprep.subr.bf16.mxu1 %v5983_v35  ;;  %v1174_v35 = vld [vmem:[#allocation9 + $0x48] sm:$0xff] }
 0x2a6   :  { %4321 = vmatpush1.bf16.msra.mxu1 %v5989_v49  ;;  %v1176_v49 = vld [vmem:[#allocation9 + $0x58] sm:$0xff] }
 0x2a7   :  { %4323 = vmatprep.subr.bf16.mxu1 %v5992_v50  ;;  %v6180_v50 = vpack.c.bf16 %v1171_v34, %v1169_v20  ;;  %v6238_v20 = vpack.c.bf16 %v1317_v44, %v1315_v43  ;;  %v1314_v34 = vld [vmem:[#allocation11 + $0x20] sm:$0xff]  ;;  %v1328_v43 = vld [vmem:[#allocation11 + $0x90] sm:$0xff]  ;;  %v1501_v44 = vld [vmem:[#allocation12 + $0x68] sm:$0xff] }
 0x2aa   :  { %4325 = vmatpush1.bf16.msra.mxu1 %v5995_v0  ;;  %v6183_v0 = vpack.c.bf16 %v1176_v49, %v1174_v35  ;;  %v1316_v35 = vld [vmem:[#allocation11 + $0x30] sm:$0xff] }
 0x2ab   :  { %4327 = vmatprep.subr.bf16.mxu1 %v5998_v1  ;;  %v1173_v1 = vld [vmem:[#allocation9 + $0x40] sm:$0xff] }
 0x2ae   :  { %4329 = vmatpush1.bf16.msra.mxu1 %v6001_v18  ;;  %v1175_v18 = vld [vmem:[#allocation9 + $0x50] sm:$0xff] }
 0x2af   :  { %4331 = vmatprep.subr.bf16.mxu1 %v6004_v21  ;;  %v1178_v21 = vld [vmem:[#allocation9 + $0x68] sm:$0xff] }
 0x2b2   :  { %4333 = vmatpush1.bf16.msra.mxu1 %v6007_v33  ;;  %v1180_v33 = vld [vmem:[#allocation9 + $0x78] sm:$0xff] }
 0x2b3   :  { %4335 = vmatprep.subr.bf16.mxu1 %v6050_v53  ;;  %v6186_v53 = vpack.c.bf16 %v1175_v18, %v1173_v1  ;;  %v1319_v1 = vld [vmem:[#allocation11 + $0x48] sm:$0xff]  ;;  %v1321_v18 = vld [vmem:[#allocation11 + $0x58] sm:$0xff] }
 0x2b6   :  { %4337 = vmatpush1.bf16.msra.mxu1 %v6054_v61  ;;  %v6189_v61 = vpack.c.bf16 %v1180_v33, %v1178_v21  ;;  %v6242_v33 = vpack.c.bf16 %v1316_v35, %v1314_v34  ;;  %v1333_v34 = vld [vmem:[#allocation11 + $0xb8] sm:$0xff] }
 0x2b7   :  { %4339 = vmatprep.subr.bf16.mxu1 %v6062_v15  ;;  %v1177_v15 = vld [vmem:[#allocation9 + $0x60] sm:$0xff] }
 0x2ba   :  { %4341 = vmatpush1.bf16.msra.mxu1 %v6066_v28  ;;  %v1179_v28 = vld [vmem:[#allocation9 + $0x70] sm:$0xff] }
 0x2bb   :  { %4343 = vmatprep.subr.bf16.mxu1 %v6073_v48  ;;  %v1182_v48 = vld [vmem:[#allocation9 + $0x88] sm:$0xff] }
 0x2be   :  { %4345 = vmatpush1.bf16.msra.mxu1 %v6078_v59  ;;  %v1184_v59 = vld [vmem:[#allocation9 + $0x98] sm:$0xff] }
 0x2bf   :  { %4347 = vmatprep.subr.bf16.mxu1 %v6084_v14  ;;  %v6192_v14 = vpack.c.bf16 %v1179_v28, %v1177_v15  ;;  %v6245_v15 = vpack.c.bf16 %v1321_v18, %v1319_v1  ;;  %v1318_v28 = vld [vmem:[#allocation11 + $0x40] sm:$0xff] }
 0x2c0   :  { %v1330_v1 = vld [vmem:[#allocation11 + $0xa0] sm:$0xff] }
 0x2c1   :  { %7288 = vst [vmem:[#allocation24_spill] sm:$0xff] %v6245_v15 }
 0x2c2   :  { %4349 = vmatpush1.bf16.msra.mxu1 %v6089_v45  ;;  %v6195_v45 = vpack.c.bf16 %v1184_v59, %v1182_v48  ;;  %v1320_v48 = vld [vmem:[#allocation11 + $0x50] sm:$0xff] }
 0x2c3   :  { %4415 = vmatprep.subr.bf16.mxu1 %v6168_v31 }
 0x2c5   :  { %987 = vmatmul.mubr.f32.vlgmr.msra.gmra.mrb[2].mxu1 %v918_v5 }
 0x2c6   :  { %4417 = vmatpush1.bf16.msra.mxu1 %v6173_v4  ;;  %1293 = vmatprep.mubr.f32.mxu1 %v919_v26  ;;  %v998_v26 = vrot.slane %v993_v16, %v6102_v9  ;;  %v1329_v16 = vld [vmem:[#allocation11 + $0x98] sm:$0xff] }
 0x2c7   :  { %4419 = vmatprep.subr.bf16.mxu1 %v6177_v19  ;;  %v6273_v32 = vpack.c.bf16 %v1329_v16, %v1327_v46  ;;  %v1511_v46 = vld [vmem:[#allocation12 + $0xb8] sm:$0xff]  ;;  %v1339_v16 = vld [vmem:[#allocation11 + $0xe8] sm:$0xff] }
 0x2ca   :  { %4421 = vmatpush1.bf16.msra.mxu1 %v6180_v50 }
 0x2cb   :  { %4423 = vmatprep.subr.bf16.mxu1 %v6183_v0 }
 0x2ce   :  { %4425 = vmatpush1.bf16.msra.mxu1 %v6186_v53 }
 0x2cf   :  { %4427 = vmatprep.subr.bf16.mxu1 %v6189_v61 }
 0x2d2   :  { %4429 = vmatpush1.bf16.msra.mxu1 %v6192_v14 }
 0x2d3   :  { %4431 = vmatprep.subr.bf16.mxu1 %v6195_v45 }
 0x2d6   :  { %4433 = vmatpush1.bf16.msra.mxu1 %v6198_v37 }
 0x2d7   :  { %4435 = vmatprep.subr.bf16.mxu1 %v6201_v52 }
 0x2da   :  { %4437 = vmatpush1.bf16.msra.mxu1 %v6204_v47 }
 0x2db   :  { %4439 = vmatprep.subr.bf16.mxu1 %v6014_v58  ;;  %v7279_v58 = vld [vmem:[#allocation26_spill] sm:$0xff] }
 0x2de   :  { %4441 = vmatpush1.bf16.msra.mxu1 %v6016_v63  ;;  %v7280_v63 = vld [vmem:[#allocation27_spill] sm:$0xff] }
 0x2df   :  { %4443 = vmatprep.subr.bf16.mxu1 %v6019_v3  ;;  %v7281_v3 = vld [vmem:[#allocation28_spill] sm:$0xff] }
 0x2e0   :  { %7292 = vst [vmem:[#allocation28_spill] sm:$0xff] %v6273_v32 }
 0x2e2   :  { %4445 = vmatpush1.bf16.msra.mxu1 %v6022_v11  ;;  %v7282_v11 = vld [vmem:[#allocation29_spill] sm:$0xff] }
 0x2e3   :  { %4447 = vmatprep.subr.bf16.mxu1 %v6025_v13  ;;  %v7283_v13 = vld [vmem:[#allocation30_spill] sm:$0xff] }
 0x2e6   :  { %4449 = vmatpush1.bf16.msra.mxu1 %v6028_v24  ;;  %v7284_v24 = vld [vmem:[#allocation31_spill] sm:$0xff] }
 0x2e7   :  { %4451 = vmatprep.subr.bf16.mxu1 %v6031_v25  ;;  %v7285_v25 = vld [vmem:[#allocation32_spill] sm:$0xff] }
 0x2ea   :  { %4453 = vmatpush1.bf16.msra.mxu1 %v6034_v30  ;;  %v7286_v30 = vld [vmem:[#allocation33_spill] sm:$0xff] }
 0x2eb   :  { %4455 = vmatprep.subr.bf16.mxu1 %v6037_v36  ;;  %v7287_v36 = vld [vmem:[#allocation34_spill] sm:$0xff] }
 0x2ee   :  { %4457 = vmatpush1.bf16.msra.mxu1 %v7277_v57  ;;  %v1488_v57 = vld [vmem:[#allocation12] sm:$0xff] }
 0x2ef   :  { %4459 = vmatprep.subr.bf16.mxu1 %v7278_v51  ;;  %v6251_v51 = vpack.c.bf16 %v1320_v48, %v1318_v28  ;;  %v1502_v28 = vld [vmem:[#allocation12 + $0x70] sm:$0xff] }
 0x2f1   :  { %7289 = vst [vmem:[#allocation25_spill] sm:$0xff] %v6251_v51 }
 0x2f2   :  { %4461 = vmatpush1.bf16.msra.mxu1 %v7279_v58  ;;  %v6253_v58 = vpack.c.bf16 %v1491_v2, %v1489_v60 }
 0x2f3   :  { %4463 = vmatprep.subr.bf16.mxu1 %v7280_v63  ;;  %v1490_v63 = vld [vmem:[#allocation12 + $0x10] sm:$0xff] }
 0x2f6   :  { %4465 = vmatpush1.bf16.msra.mxu1 %v7281_v3  ;;  %v1493_v3 = vld [vmem:[#allocation12 + $0x28] sm:$0xff] }
 0x2f7   :  { %4467 = vmatprep.subr.bf16.mxu1 %v7282_v11  ;;  %v1495_v11 = vld [vmem:[#allocation12 + $0x38] sm:$0xff] }
 0x2fa   :  { %4469 = vmatpush1.bf16.msra.mxu1 %v7283_v13  ;;  %v6256_v13 = vpack.c.bf16 %v1325_v8, %v1323_v27  ;;  %v1505_v27 = vld [vmem:[#allocation12 + $0x88] sm:$0xff]  ;;  %v1507_v8 = vld [vmem:[#allocation12 + $0x98] sm:$0xff] }
 0x2fb   :  { %4471 = vmatprep.subr.bf16.mxu1 %v7284_v24  ;;  %v6258_v24 = vpack.c.bf16 %v1490_v63, %v1488_v57  ;;  %v1334_v57 = vld [vmem:[#allocation11 + $0xc0] sm:$0xff]  ;;  %v6294_v63 = vpack.c.bf16 %v1507_v8, %v1505_v27 }
 0x2fc   :  { %7290 = vst [vmem:[#allocation26_spill] sm:$0xff] %v6256_v13 }
 0x2fe   :  { %4473 = vmatpush1.bf16.msra.mxu1 %v7285_v25  ;;  %v6260_v25 = vpack.c.bf16 %v1495_v11, %v1493_v3  ;;  %v1504_v3 = vld [vmem:[#allocation12 + $0x80] sm:$0xff]  ;;  %v1506_v11 = vld [vmem:[#allocation12 + $0x90] sm:$0xff] }
 0x2ff   :  { %4475 = vmatprep.subr.bf16.mxu1 %v7286_v30  ;;  %v1492_v30 = vld [vmem:[#allocation12 + $0x20] sm:$0xff] }
 0x302   :  { %4477 = vmatpush1.bf16.msra.mxu1 %v7287_v36  ;;  %v1494_v36 = vld [vmem:[#allocation12 + $0x30] sm:$0xff] }
 0x303   :  { %4543 = vmatprep.subr.bf16.mxu1 %v6253_v58 }
 0x305   :  { %1294 = vmatmul.mubr.f32.vlgmr.msra.gmra.mrb[4].mxu1 %v918_v5 }
 0x306   :  { %4545 = vmatpush1.bf16.msra.mxu1 %v6258_v24 }
 0x307   :  { %4547 = vmatprep.subr.bf16.mxu1 %v6260_v25 }
 0x398   :  { %v988_v6 = vpop.f32.mrb[2].mxu1 }
 0x399   :  { %v1005_v7 = vadd.f32 %v998_v26, %v988_v6  ;;  %v990_v12 = vpop.f32.mrb[3].mxu1  ;;  %v1499_v26 = vld [vmem:[#allocation12 + $0x58] sm:$0xff]  ;;  %v6267_v6 = vpack.c.bf16 %v1324_v62, %v1322_v38  ;;  %v1335_v38 = vld [vmem:[#allocation11 + $0xc8] sm:$0xff] }
 0x39a   :  { %v1006_v17 = vadd.f32 %v1002_v10, %v990_v12  ;;  %v6264_v10 = vpack.c.bf16 %v1494_v36, %v1492_v30  ;;  %v6270_v12 = vpack.c.bf16 %v1499_v26, %v1497_v42  ;;  %v1337_v62 = vld [vmem:[#allocation11 + $0xd8] sm:$0xff]  ;;  %v1336_v36 = vld [vmem:[#allocation11 + $0xd0] sm:$0xff]  ;;  %v1509_v42 = vld [vmem:[#allocation12 + $0xa8] sm:$0xff] }
 0x39b   :  { %5605 = vtanh.f32 %v1005_v7  ;;  %7291 = vst [vmem:[#allocation27_spill] sm:$0xff] %v6267_v6  ;;  %v1326_v7 = vld [vmem:[#allocation11 + $0x80] sm:$0xff]  ;;  %v6297_v30 = vpack.c.bf16 %v1337_v62, %v1335_v38  ;;  %v1341_v26 = vld [vmem:[#allocation11 + $0xf8] sm:$0xff] }
 0x39c   :  { %5607 = vtanh.f32 %v1006_v17  ;;  %v1496_v17 = vld [vmem:[#allocation12 + $0x40] sm:$0xff]  ;;  %4549 = vmatpush1.bf16.msra.mxu1 %v6264_v10 }
 0x39d   :  { %v6276_v35 = vpack.c.bf16 %v1498_v22, %v1496_v17  ;;  %4551 = vmatprep.subr.bf16.mxu1 %v6270_v12  ;;  %7296 = vst [vmem:[#allocation32_spill] sm:$0xff] %v6297_v30  ;;  %v6303_v17 = vpack.c.bf16 %v1336_v36, %v1334_v57  ;;  %v1338_v22 = vld [vmem:[#allocation11 + $0xe0] sm:$0xff]  ;;  %v1344_v36 = vld [vmem:[#allocation11 + $0x110] sm:$0xff] }
 0x39e   :  { %v1342_v38 = vld [vmem:[#allocation11 + $0x100] sm:$0xff] }
 0x39f   :  { %7297 = vst [vmem:[#allocation33_spill] sm:$0xff] %v6303_v17  ;;  %v1512_v57 = vld [vmem:[#allocation12 + $0xc0] sm:$0xff] }
 0x3a0   :  { %4553 = vmatpush1.bf16.msra.mxu1 %v6276_v35 }
 0x3a5   :  { %v5606_v55 = vpop.eup %5605 }
 0x3a6   :  { %v5608_v5 = vpop.eup %5607 }
 0x3a7   :  { %v1011_v49 = vcombine.low %v5606_v55, %v5608_v5  ;;  %1158 = vmatprep.mubr.f32.mxu0 %v5608_v5  ;;  %v1331_v5 = vld [vmem:[#allocation11 + $0xa8] sm:$0xff] }
 0x3a8   :  { %1159 = vmatmul.mubr.f32.vlgmr.msra.gmra.mrb[4].mxu0 %v5606_v55  ;;  %v1503_v55 = vld [vmem:[#allocation12 + $0x78] sm:$0xff]  ;;  %v6285_v48 = vpack.c.bf16 %v1333_v34, %v1331_v5  ;;  %v6309_v5 = vpack.c.bf16 %v1341_v26, %v1339_v16  ;;  %v1340_v34 = vld [vmem:[#allocation11 + $0xf0] sm:$0xff]  ;;  %v1347_v16 = vld [vmem:[#allocation11 + $0x128] sm:$0xff] }
 0x3a9   :  { %v1018_v21 = vrot.slane %v1011_v49, %v6126_v29  ;;  %4481 = vmatpush1.bf16.msra.mxu0 %v6236_v56  ;;  %v6279_v49 = vpack.c.bf16 %v1328_v43, %v1326_v7  ;;  %v6282_v18 = vpack.c.bf16 %v1503_v55, %v1501_v44  ;;  %v6300_v7 = vpack.c.bf16 %v1506_v11, %v1504_v3  ;;  %v1508_v44 = vld [vmem:[#allocation12 + $0xa0] sm:$0xff]  ;;  %v1510_v55 = vld [vmem:[#allocation12 + $0xb0] sm:$0xff]  ;;  %v1349_v26 = vld [vmem:[#allocation11 + $0x138] sm:$0xff] }
 0x3aa   :  { %4483 = vmatprep.subr.bf16.mxu0 %v6238_v20  ;;  %7294 = vst [vmem:[#allocation30_spill] sm:$0xff] %v6285_v48  ;;  %v6306_v43 = vpack.c.bf16 %v1511_v46, %v1509_v42  ;;  %7298 = vst [vmem:[#allocation34_spill] sm:$0xff] %v6309_v5  ;;  %v6312_v27 = vpack.c.bf16 %v1510_v55, %v1508_v44  ;;  %v6315_v8 = vpack.c.bf16 %v1340_v34, %v1338_v22  ;;  %v1514_v3 = vld [vmem:[#allocation12 + $0xd0] sm:$0xff]  ;;  %v1517_v42 = vld [vmem:[#allocation12 + $0xe8] sm:$0xff] }
 0x3ab   :  { %v1025_v59 = vrot.slane %v1018_v21, %v6126_v29  ;;  %7293 = vst [vmem:[#allocation29_spill] sm:$0xff] %v6279_v49  ;;  %v1500_v21 = vld [vmem:[#allocation12 + $0x60] sm:$0xff]  ;;  %4555 = vmatprep.subr.bf16.mxu1 %v6282_v18  ;;  %v1519_v46 = vld [vmem:[#allocation12 + $0xf8] sm:$0xff]  ;;  %v6324_v22 = vpack.c.bf16 %v1514_v3, %v1512_v57  ;;  %v6327_v44 = vpack.c.bf16 %v1344_v36, %v1342_v38  ;;  %v1351_v57 = vld [vmem:[#allocation11 + $0x148] sm:$0xff] }
 0x3ac   :  { %v6288_v60 = vpack.c.bf16 %v1502_v28, %v1500_v21  ;;  %v1515_v21 = vld [vmem:[#allocation12 + $0xd8] sm:$0xff]  ;;  %v1343_v28 = vld [vmem:[#allocation11 + $0x108] sm:$0xff]  ;;  %7299 = vst [vmem:[#allocation35_spill] sm:$0xff] %v6315_v8  ;;  %v1346_v55 = vld [vmem:[#allocation11 + $0x120] sm:$0xff]  ;;  %v6330_v34 = vpack.c.bf16 %v1519_v46, %v1517_v42 }
 0x3ad   :  { %1028 = vst.msk [vmem:[#allocation2 + $0x1] ss:$8 sm:$0x3] %vm6131_vm0, %v1025_v59  ;;  %4485 = vmatpush1.bf16.msra.mxu0 %v6242_v33  ;;  %v1332_v59 = vld [vmem:[#allocation11 + $0xb0] sm:$0xff]  ;;  %7301 = vst [vmem:[#allocation37_spill] sm:$0xff] %v6327_v44  ;;  %v1353_v3 = vld [vmem:[#allocation11 + $0x158] sm:$0xff] }
 0x3ae   :  { %4487 = vmatprep.subr.bf16.mxu0 %v6245_v15  ;;  %v6291_v2 = vpack.c.bf16 %v1332_v59, %v1330_v1  ;;  %4557 = vmatpush1.bf16.msra.mxu1 %v6288_v60  ;;  %v1513_v1 = vld [vmem:[#allocation12 + $0xc8] sm:$0xff]  ;;  %v1345_v59 = vld [vmem:[#allocation11 + $0x118] sm:$0xff]  ;;  %v1350_v42 = vld [vmem:[#allocation11 + $0x140] sm:$0xff] }
 0x3af   :  { %4559 = vmatprep.subr.bf16.mxu1 %v6294_v63  ;;  %v6318_v62 = vpack.c.bf16 %v1515_v21, %v1513_v1  ;;  %v6321_v11 = vpack.c.bf16 %v1345_v59, %v1343_v28  ;;  %v1516_v1 = vld [vmem:[#allocation12 + $0xe0] sm:$0xff]  ;;  %v1518_v21 = vld [vmem:[#allocation12 + $0xf0] sm:$0xff]  ;;  %v6333_v28 = vpack.c.bf16 %v1349_v26, %v1347_v16  ;;  %v1371_v15 = vld [vmem:[#allocation11 + $0x1e8] sm:$0xff] }
 0x3b0   :  { %7295 = vst [vmem:[#allocation31_spill] sm:$0xff] %v6291_v2  ;;  %v1348_v59 = vld [vmem:[#allocation11 + $0x130] sm:$0xff]  ;;  %v6336_v38 = vpack.c.bf16 %v1518_v21, %v1516_v1  ;;  %v1520_v16 = vld [vmem:[#allocation12 + $0x100] sm:$0xff]  ;;  %v1355_v1 = vld [vmem:[#allocation11 + $0x168] sm:$0xff] }
 0x3b1   :  { %4489 = vmatpush1.bf16.msra.mxu0 %v6251_v51  ;;  %7300 = vst [vmem:[#allocation36_spill] sm:$0xff] %v6321_v11  ;;  %7302 = vst [vmem:[#allocation38_spill] sm:$0xff] %v6333_v28  ;;  %v6339_v36 = vpack.c.bf16 %v1348_v59, %v1346_v55  ;;  %v1522_v26 = vld [vmem:[#allocation12 + $0x110] sm:$0xff]  ;;  %v1357_v21 = vld [vmem:[#allocation11 + $0x178] sm:$0xff] }
 0x3b2   :  { %4491 = vmatprep.subr.bf16.mxu0 %v6256_v13  ;;  %4561 = vmatpush1.bf16.msra.mxu1 %v6300_v7  ;;  %v6348_v55 = vpack.c.bf16 %v1522_v26, %v1520_v16  ;;  %v1359_v16 = vld [vmem:[#allocation11 + $0x188] sm:$0xff]  ;;  %v1361_v26 = vld [vmem:[#allocation11 + $0x198] sm:$0xff] }
 0x3b3   :  { %4563 = vmatprep.subr.bf16.mxu1 %v6306_v43  ;;  %7303 = vst [vmem:[#allocation39_spill] sm:$0xff] %v6339_v36  ;;  %v1367_v13 = vld [vmem:[#allocation11 + $0x1c8] sm:$0xff]  ;;  %v1369_v51 = vld [vmem:[#allocation11 + $0x1d8] sm:$0xff] }
 0x3b5   :  { %4493 = vmatpush1.bf16.msra.mxu0 %v6267_v6  ;;  %v1535_v6 = vld [vmem:[#allocation12 + $0x178] sm:$0xff] }
 0x3b6   :  { %4495 = vmatprep.subr.bf16.mxu0 %v6273_v32  ;;  %4565 = vmatpush1.bf16.msra.mxu1 %v6312_v27  ;;  %v1533_v32 = vld [vmem:[#allocation12 + $0x168] sm:$0xff] }
 0x3b7   :  { %4567 = vmatprep.subr.bf16.mxu1 %v6318_v62 }
 0x3b9   :  { %4497 = vmatpush1.bf16.msra.mxu0 %v6279_v49  ;;  %v1531_v49 = vld [vmem:[#allocation12 + $0x158] sm:$0xff] }
 0x3ba   :  { %4499 = vmatprep.subr.bf16.mxu0 %v6285_v48  ;;  %4569 = vmatpush1.bf16.msra.mxu1 %v6324_v22  ;;  %v1529_v48 = vld [vmem:[#allocation12 + $0x148] sm:$0xff] }
 0x3bb   :  { %4571 = vmatprep.subr.bf16.mxu1 %v6330_v34 }
 0x3bd   :  { %4501 = vmatpush1.bf16.msra.mxu0 %v6291_v2  ;;  %v1527_v2 = vld [vmem:[#allocation12 + $0x138] sm:$0xff] }
 0x3be   :  { %4503 = vmatprep.subr.bf16.mxu0 %v6297_v30  ;;  %v1525_v30 = vld [vmem:[#allocation12 + $0x128] sm:$0xff]  ;;  %4573 = vmatpush1.bf16.msra.mxu1 %v6336_v38 }
 0x3c1   :  { %4505 = vmatpush1.bf16.msra.mxu0 %v6303_v17  ;;  %v1523_v17 = vld [vmem:[#allocation12 + $0x118] sm:$0xff] }
 0x3c2   :  { %4507 = vmatprep.subr.bf16.mxu0 %v6309_v5  ;;  %v1521_v5 = vld [vmem:[#allocation12 + $0x108] sm:$0xff] }
 0x3c3   :  { %v6342_v46 = vpack.c.bf16 %v1523_v17, %v1521_v5  ;;  %v1354_v17 = vld [vmem:[#allocation11 + $0x160] sm:$0xff]  ;;  %v6354_v5 = vpack.c.bf16 %v1527_v2, %v1525_v30  ;;  %v6366_v30 = vpack.c.bf16 %v1531_v49, %v1529_v48  ;;  %v6378_v49 = vpack.c.bf16 %v1535_v6, %v1533_v32 }
 0x3c4   :  { %v1358_v2 = vld [vmem:[#allocation11 + $0x180] sm:$0xff] }
 0x3c5   :  { %4509 = vmatpush1.bf16.msra.mxu0 %v6315_v8  ;;  %v1352_v8 = vld [vmem:[#allocation11 + $0x150] sm:$0xff]  ;;  %4575 = vmatprep.subr.bf16.mxu1 %v6342_v46  ;;  %v1532_v48 = vld [vmem:[#allocation12 + $0x160] sm:$0xff] }
 0x3c6   :  { %4511 = vmatprep.subr.bf16.mxu0 %v6321_v11  ;;  %v6345_v11 = vpack.c.bf16 %v1353_v3, %v1351_v57  ;;  %v6351_v59 = vpack.c.bf16 %v1352_v8, %v1350_v42  ;;  %v1524_v57 = vld [vmem:[#allocation12 + $0x120] sm:$0xff]  ;;  %v1526_v3 = vld [vmem:[#allocation12 + $0x130] sm:$0xff]  ;;  %4577 = vmatpush1.bf16.msra.mxu1 %v6348_v55 }
 0x3c7   :  { %v6360_v8 = vpack.c.bf16 %v1526_v3, %v1524_v57  ;;  %4579 = vmatprep.subr.bf16.mxu1 %v6354_v5  ;;  %v1363_v57 = vld [vmem:[#allocation11 + $0x1a8] sm:$0xff]  ;;  %v1365_v3 = vld [vmem:[#allocation11 + $0x1b8] sm:$0xff] }
 0x3c8   :  { %7304 = vst [vmem:[#allocation40_spill] sm:$0xff] %v6345_v11  ;;  %7305 = vst [vmem:[#allocation41_spill] sm:$0xff] %v6351_v59 }
 0x3c9   :  { %4513 = vmatpush1.bf16.msra.mxu0 %v6327_v44  ;;  %v1356_v44 = vld [vmem:[#allocation11 + $0x170] sm:$0xff] }
 0x3ca   :  { %4515 = vmatprep.subr.bf16.mxu0 %v6333_v28  ;;  %v6357_v28 = vpack.c.bf16 %v1357_v21, %v1355_v1  ;;  %v6363_v42 = vpack.c.bf16 %v1356_v44, %v1354_v17  ;;  %v1528_v1 = vld [vmem:[#allocation12 + $0x140] sm:$0xff]  ;;  %v1530_v21 = vld [vmem:[#allocation12 + $0x150] sm:$0xff]  ;;  %4581 = vmatpush1.bf16.msra.mxu1 %v6360_v8 }
 0x3cb   :  { %v6372_v44 = vpack.c.bf16 %v1530_v21, %v1528_v1  ;;  %4583 = vmatprep.subr.bf16.mxu1 %v6366_v30 }
 0x3cc   :  { %7306 = vst [vmem:[#allocation42_spill] sm:$0xff] %v6357_v28  ;;  %7307 = vst [vmem:[#allocation43_spill] sm:$0xff] %v6363_v42 }
 0x3cd   :  { %4517 = vmatpush1.bf16.msra.mxu0 %v6339_v36  ;;  %v1360_v36 = vld [vmem:[#allocation11 + $0x190] sm:$0xff] }
 0x3ce   :  { %4519 = vmatprep.subr.bf16.mxu0 %v6345_v11  ;;  %v6369_v11 = vpack.c.bf16 %v1361_v26, %v1359_v16  ;;  %v6375_v17 = vpack.c.bf16 %v1360_v36, %v1358_v2  ;;  %v1534_v16 = vld [vmem:[#allocation12 + $0x170] sm:$0xff]  ;;  %v6381_v26 = vpack.c.bf16 %v1365_v3, %v1363_v57  ;;  %4585 = vmatpush1.bf16.msra.mxu1 %v6372_v44  ;;  %v1366_v3 = vld [vmem:[#allocation11 + $0x1c0] sm:$0xff] }
 0x3cf   :  { %v6384_v21 = vpack.c.bf16 %v1534_v16, %v1532_v48  ;;  %4587 = vmatprep.subr.bf16.mxu1 %v6378_v49  ;;  %v6391_v57 = vpack.c.bf16 %v1369_v51, %v1367_v13  ;;  %v1373_v48 = vld [vmem:[#allocation11 + $0x1f8] sm:$0xff]  ;;  %v1370_v13 = vld [vmem:[#allocation11 + $0x1e0] sm:$0xff] }
 0x3d0   :  { %7308 = vst [vmem:[#allocation44_spill] sm:$0xff] %v6369_v11  ;;  %v6400_v51 = vpack.c.bf16 %v1373_v48, %v1371_v15  ;;  %v1650_v15 = vld [vmem:[#allocation9 + $0xd8] sm:$0xff] }
 0x3d1   :  { %4521 = vmatpush1.bf16.msra.mxu0 %v6351_v59  ;;  %v1364_v59 = vld [vmem:[#allocation11 + $0x1b0] sm:$0xff] }
 0x3d2   :  { %4523 = vmatprep.subr.bf16.mxu0 %v6357_v28  ;;  %v1362_v28 = vld [vmem:[#allocation11 + $0x1a0] sm:$0xff]  ;;  %4589 = vmatpush1.bf16.msra.mxu1 %v6384_v21 }
 0x3d3   :  { %v6387_v6 = vpack.c.bf16 %v1364_v59, %v1362_v28  ;;  %v1372_v59 = vld [vmem:[#allocation11 + $0x1f0] sm:$0xff] }
 0x3d5   :  { %4525 = vmatpush1.bf16.msra.mxu0 %v6363_v42 }
 0x3d6   :  { %4527 = vmatprep.subr.bf16.mxu0 %v6369_v11  ;;  %v1368_v11 = vld [vmem:[#allocation11 + $0x1d0] sm:$0xff] }
 0x3d7   :  { %v6397_v28 = vpack.c.bf16 %v1368_v11, %v1366_v3  ;;  %v1656_v3 = vld [vmem:[#allocation9 + $0x108] sm:$0xff] }
 0x3d8   :  { %v1295_v1 = vpop.f32.mrb[4].mxu1 }
 0x3d9   :  { %v1302_v36 = vrot.slane %v1295_v1, 6  ;;  %v1297_v2 = vpop.f32.mrb[5].mxu1  ;;  %4529 = vmatpush1.bf16.msra.mxu0 %v6375_v17  ;;  %v6403_v1 = vpack.c.bf16 %v1372_v59, %v1370_v13  ;;  %v1660_v13 = vld [vmem:[#allocation9 + $0x128] sm:$0xff]  ;;  %v1662_v59 = vld [vmem:[#allocation9 + $0x138] sm:$0xff] }
 0x3da   :  { %v1303_v32 = vrot.slane %v1297_v2, 6  ;;  %4531 = vmatprep.subr.bf16.mxu0 %v6381_v26 }
 0x3db   :  { %v1306_v42 = vadd.f32 %v6112_v40, %v1302_v36 }
 0x3dc   :  { %v1307_v16 = vadd.f32 %v6114_v54, %v1303_v32  ;;  %v1652_v32 = vld [vmem:[#allocation9 + $0xe8] sm:$0xff] }
 0x3dd   :  { %5609 = vtanh.f32 %v1306_v42  ;;  %4533 = vmatpush1.bf16.msra.mxu0 %v6387_v6 }
 0x3de   :  { %5611 = vtanh.f32 %v1307_v16  ;;  %4535 = vmatprep.subr.bf16.mxu0 %v6391_v57  ;;  %v1655_v16 = vld [vmem:[#allocation9 + $0x100] sm:$0xff] }
 0x3e1   :  { %4537 = vmatpush1.bf16.msra.mxu0 %v6397_v28 }
 0x3e2   :  { %4539 = vmatprep.subr.bf16.mxu0 %v6400_v51 }
 0x3e5   :  { %4541 = vmatpush1.bf16.msra.mxu0 %v6403_v1 }
 0x3e6   :  { %4607 = vmatprep.subr.bf16.mxu0 %v6168_v31  ;;  %v1648_v31 = vld [vmem:[#allocation9 + $0xc8] sm:$0xff] }
 0x3e7   :  { %v6408_v42 = vpop.eup %5609 }
 0x3e8   :  { %v5612_v11 = vpop.eup %5611  ;;  %v7225_v2 = vrot.slane %v6408_v42, 2 }
 0x3e9   :  { %v1377_v36 = vrot.slane %v5612_v11, 2 }
 0x3eb   :  { %1444 = vmatprep.mubr.f32.mxu0 %v1377_v36 }
 0x3ec   :  { %1445 = vmatmul.mubr.f32.vlgmr.msra.gmra.mrb[4].mxu0 %v7225_v2  ;;  %v1671_v2 = vld [vmem:[#allocation9 + $0x180] sm:$0xff] }
 0x3ed   :  { %4609 = vmatpush1.bf16.msra.mxu0 %v6173_v4  ;;  %1751 = vmatprep.mubr.f32.mxu0 %v1377_v36  ;;  %v6423_v4 = vpack.c.bf16 %v1650_v15, %v1648_v31  ;;  %v6441_v36 = vpack.c.bf16 %v1662_v59, %v1660_v13  ;;  %v1659_v31 = vld [vmem:[#allocation9 + $0x120] sm:$0xff]  ;;  %v1661_v15 = vld [vmem:[#allocation9 + $0x130] sm:$0xff] }
 0x3ee   :  { %4611 = vmatprep.subr.bf16.mxu0 %v6177_v19  ;;  %v1647_v19 = vld [vmem:[#allocation9 + $0xc0] sm:$0xff]  ;;  %v1669_v59 = vld [vmem:[#allocation9 + $0x170] sm:$0xff] }
 0x3ef   :  { %v1667_v13 = vld [vmem:[#allocation9 + $0x160] sm:$0xff] }
 0x3f1   :  { %4613 = vmatpush1.bf16.msra.mxu0 %v6180_v50  ;;  %v1649_v50 = vld [vmem:[#allocation9 + $0xd0] sm:$0xff] }
 0x3f2   :  { %4615 = vmatprep.subr.bf16.mxu0 %v6183_v0  ;;  %v1654_v0 = vld [vmem:[#allocation9 + $0xf8] sm:$0xff] }
 0x3f5   :  { %4617 = vmatpush1.bf16.msra.mxu0 %v6186_v53  ;;  %v6426_v53 = vpack.c.bf16 %v1649_v50, %v1647_v19  ;;  %v1664_v19 = vld [vmem:[#allocation9 + $0x148] sm:$0xff]  ;;  %v1666_v50 = vld [vmem:[#allocation9 + $0x158] sm:$0xff] }
 0x3f6   :  { %4619 = vmatprep.subr.bf16.mxu0 %v6189_v61  ;;  %v6429_v61 = vpack.c.bf16 %v1654_v0, %v1652_v32  ;;  %v6444_v32 = vpack.c.bf16 %v1661_v15, %v1659_v31  ;;  %v6447_v0 = vpack.c.bf16 %v1666_v50, %v1664_v19  ;;  %v1672_v31 = vld [vmem:[#allocation9 + $0x188] sm:$0xff]  ;;  %v1674_v15 = vld [vmem:[#allocation9 + $0x198] sm:$0xff]  ;;  %v6456_v19 = vpack.c.bf16 %v1669_v59, %v1667_v13 }
 0x3f7   :  { %v6459_v50 = vpack.c.bf16 %v1674_v15, %v1672_v31  ;;  %v1680_v13 = vld [vmem:[#allocation9 + $0x1c8] sm:$0xff]  ;;  %v1682_v59 = vld [vmem:[#allocation9 + $0x1d8] sm:$0xff] }
 0x3f8   :  { %7309 = vst [vmem:[#allocation45_spill] sm:$0xff] %v6444_v32  ;;  %7310 = vst [vmem:[#allocation46_spill] sm:$0xff] %v6447_v0  ;;  %v6471_v15 = vpack.c.bf16 %v1682_v59, %v1680_v13  ;;  %v1546_v13 = vld [vmem:[#allocation12 + $0x1d0] sm:$0xff] }
 0x3f9   :  { %4621 = vmatpush1.bf16.msra.mxu0 %v6192_v14  ;;  %v1651_v14 = vld [vmem:[#allocation9 + $0xe0] sm:$0xff]  ;;  %7313 = vst [vmem:[#allocation49_spill] sm:$0xff] %v6456_v19  ;;  %7314 = vst [vmem:[#allocation50_spill] sm:$0xff] %v6459_v50 }
 0x3fa   :  { %4623 = vmatprep.subr.bf16.mxu0 %v6195_v45  ;;  %v1653_v45 = vld [vmem:[#allocation9 + $0xf0] sm:$0xff] }
 0x3fd   :  { %4625 = vmatpush1.bf16.msra.mxu0 %v6198_v37  ;;  %v1658_v37 = vld [vmem:[#allocation9 + $0x118] sm:$0xff] }
 0x3fe   :  { %4627 = vmatprep.subr.bf16.mxu0 %v6201_v52  ;;  %v6432_v52 = vpack.c.bf16 %v1653_v45, %v1651_v14  ;;  %v6435_v48 = vpack.c.bf16 %v1658_v37, %v1656_v3  ;;  %v1663_v14 = vld [vmem:[#allocation9 + $0x140] sm:$0xff]  ;;  %v1665_v45 = vld [vmem:[#allocation9 + $0x150] sm:$0xff]  ;;  %v1668_v3 = vld [vmem:[#allocation9 + $0x168] sm:$0xff] }
 0x3ff   :  { %v1670_v37 = vld [vmem:[#allocation9 + $0x178] sm:$0xff] }
 0x401   :  { %4629 = vmatpush1.bf16.msra.mxu0 %v6204_v47  ;;  %v1657_v47 = vld [vmem:[#allocation9 + $0x110] sm:$0xff] }
 0x402   :  { %4631 = vmatprep.subr.bf16.mxu0 %v6423_v4  ;;  %v6438_v11 = vpack.c.bf16 %v1657_v47, %v1655_v16  ;;  %v6450_v16 = vpack.c.bf16 %v1665_v45, %v1663_v14  ;;  %v6453_v47 = vpack.c.bf16 %v1670_v37, %v1668_v3  ;;  %v1676_v14 = vld [vmem:[#allocation9 + $0x1a8] sm:$0xff]  ;;  %v1678_v45 = vld [vmem:[#allocation9 + $0x1b8] sm:$0xff] }
 0x403   :  { %v6465_v37 = vpack.c.bf16 %v1678_v45, %v1676_v14 }
 0x404   :  { %7311 = vst [vmem:[#allocation47_spill] sm:$0xff] %v6450_v16  ;;  %7312 = vst [vmem:[#allocation48_spill] sm:$0xff] %v6453_v47 }
 0x405   :  { %4633 = vmatpush1.bf16.msra.mxu0 %v6426_v53 }
 0x406   :  { %4635 = vmatprep.subr.bf16.mxu0 %v6429_v61 }
 0x409   :  { %4637 = vmatpush1.bf16.msra.mxu0 %v6432_v52 }
 0x40a   :  { %4639 = vmatprep.subr.bf16.mxu0 %v6435_v48 }
 0x40d   :  { %4641 = vmatpush1.bf16.msra.mxu0 %v6438_v11 }
 0x40e   :  { %4643 = vmatprep.subr.bf16.mxu0 %v6441_v36 }
 0x411   :  { %4645 = vmatpush1.bf16.msra.mxu0 %v6444_v32  ;;  %v1673_v32 = vld [vmem:[#allocation9 + $0x190] sm:$0xff] }
 0x412   :  { %4647 = vmatprep.subr.bf16.mxu0 %v6447_v0  ;;  %v6462_v3 = vpack.c.bf16 %v1673_v32, %v1671_v2  ;;  %v1675_v0 = vld [vmem:[#allocation9 + $0x1a0] sm:$0xff]  ;;  %v1684_v2 = vld [vmem:[#allocation9 + $0x1e8] sm:$0xff]  ;;  %v1686_v32 = vld [vmem:[#allocation9 + $0x1f8] sm:$0xff] }
 0x413   :  { %v6477_v45 = vpack.c.bf16 %v1686_v32, %v1684_v2  ;;  %v1551_v2 = vld [vmem:[#allocation12 + $0x1f8] sm:$0xff]  ;;  %v1548_v32 = vld [vmem:[#allocation12 + $0x1e0] sm:$0xff] }
 0x414   :  { %7315 = vst [vmem:[#allocation51_spill] sm:$0xff] %v6462_v3 }
 0x415   :  { %4649 = vmatpush1.bf16.msra.mxu0 %v6450_v16  ;;  %v1677_v16 = vld [vmem:[#allocation9 + $0x1b0] sm:$0xff] }
 0x416   :  { %4651 = vmatprep.subr.bf16.mxu0 %v6453_v47  ;;  %v6468_v31 = vpack.c.bf16 %v1677_v16, %v1675_v0  ;;  %v1679_v47 = vld [vmem:[#allocation9 + $0x1c0] sm:$0xff]  ;;  %v7316_v16 = vrot.slane %v6408_v42, 2 }
 0x419   :  { %4653 = vmatpush1.bf16.msra.mxu0 %v6456_v19  ;;  %v1681_v19 = vld [vmem:[#allocation9 + $0x1d0] sm:$0xff] }
 0x41a   :  { %4655 = vmatprep.subr.bf16.mxu0 %v6459_v50  ;;  %v6474_v14 = vpack.c.bf16 %v1681_v19, %v1679_v47  ;;  %v1683_v50 = vld [vmem:[#allocation9 + $0x1e0] sm:$0xff]  ;;  %v1539_v47 = vld [vmem:[#allocation12 + $0x198] sm:$0xff]  ;;  %v1538_v19 = vld [vmem:[#allocation12 + $0x190] sm:$0xff] }
 0x41d   :  { %4657 = vmatpush1.bf16.msra.mxu0 %v6462_v3  ;;  %v1685_v3 = vld [vmem:[#allocation9 + $0x1f0] sm:$0xff] }
 0x41e   :  { %4659 = vmatprep.subr.bf16.mxu0 %v6465_v37  ;;  %v6480_v0 = vpack.c.bf16 %v1685_v3, %v1683_v50  ;;  %v1547_v50 = vld [vmem:[#allocation12 + $0x1d8] sm:$0xff]  ;;  %v1544_v3 = vld [vmem:[#allocation12 + $0x1c0] sm:$0xff] }
 0x41f   :  { %v4600_v59 = vpack.c.bf16 %v1546_v13, %v1544_v3  ;;  %v7334_v3 = vld [vmem:[#allocation41_spill] sm:$0xff]  ;;  %v7335_v13 = vld [vmem:[#allocation42_spill] sm:$0xff] }
 0x421   :  { %4661 = vmatpush1.bf16.msra.mxu0 %v6468_v31 }
 0x422   :  { %4663 = vmatprep.subr.bf16.mxu0 %v6471_v15 }
 0x425   :  { %4665 = vmatpush1.bf16.msra.mxu0 %v6474_v14 }
 0x426   :  { %4667 = vmatprep.subr.bf16.mxu0 %v6477_v45 }
 0x429   :  { %4669 = vmatpush1.bf16.msra.mxu0 %v6480_v0 }
 0x42a   :  { %4735 = vmatprep.subr.bf16.mxu0 %v6253_v58  ;;  %v1537_v58 = vld [vmem:[#allocation12 + $0x188] sm:$0xff] }
 0x42b   :  { %v4590_v42 = vpack.c.bf16 %v1539_v47, %v1537_v58  ;;  %v7317_v47 = vld [vmem:[#allocation24_spill] sm:$0xff] }
 0x42c   :  { %1752 = vmatmul.mubr.f32.vlgmr.msra.gmra.mrb[6].mxu0 %v7316_v16  ;;  %v1550_v16 = vld [vmem:[#allocation12 + $0x1f0] sm:$0xff] }
 0x42d   :  { %4737 = vmatpush1.bf16.msra.mxu0 %v6258_v24  ;;  %v1536_v24 = vld [vmem:[#allocation12 + $0x180] sm:$0xff]  ;;  %4591 = vmatprep.subr.bf16.mxu1 %v4590_v42  ;;  %v4604_v58 = vpack.c.bf16 %v1550_v16, %v1548_v32 }
 0x42e   :  { %4739 = vmatprep.subr.bf16.mxu0 %v6260_v25  ;;  %v4592_v25 = vpack.c.bf16 %v1538_v19, %v1536_v24  ;;  %v7319_v24 = vld [vmem:[#allocation26_spill] sm:$0xff]  ;;  %v7320_v19 = vld [vmem:[#allocation27_spill] sm:$0xff] }
 0x430   :  { %4593 = vmatpush1.bf16.msra.mxu1 %v4592_v25 }
 0x431   :  { %4741 = vmatpush1.bf16.msra.mxu0 %v6264_v10  ;;  %v1541_v10 = vld [vmem:[#allocation12 + $0x1a8] sm:$0xff] }
 0x432   :  { %4743 = vmatprep.subr.bf16.mxu0 %v6270_v12  ;;  %v1543_v12 = vld [vmem:[#allocation12 + $0x1b8] sm:$0xff] }
 0x435   :  { %4745 = vmatpush1.bf16.msra.mxu0 %v6276_v35  ;;  %v4594_v35 = vpack.c.bf16 %v1543_v12, %v1541_v10  ;;  %v7324_v10 = vld [vmem:[#allocation31_spill] sm:$0xff]  ;;  %v7325_v12 = vld [vmem:[#allocation32_spill] sm:$0xff] }
 0x436   :  { %4747 = vmatprep.subr.bf16.mxu0 %v6282_v18  ;;  %v1540_v18 = vld [vmem:[#allocation12 + $0x1a0] sm:$0xff] }
 0x437   :  { %4595 = vmatprep.subr.bf16.mxu1 %v4594_v35 }
 0x439   :  { %4749 = vmatpush1.bf16.msra.mxu0 %v6288_v60  ;;  %v1542_v60 = vld [vmem:[#allocation12 + $0x1b0] sm:$0xff] }
 0x43a   :  { %4751 = vmatprep.subr.bf16.mxu0 %v6294_v63  ;;  %v4596_v63 = vpack.c.bf16 %v1542_v60, %v1540_v18  ;;  %v7328_v18 = vld [vmem:[#allocation35_spill] sm:$0xff]  ;;  %v7329_v60 = vld [vmem:[#allocation36_spill] sm:$0xff] }
 0x43c   :  { %4597 = vmatpush1.bf16.msra.mxu1 %v4596_v63 }
 0x43d   :  { %4753 = vmatpush1.bf16.msra.mxu0 %v6300_v7  ;;  %v1545_v7 = vld [vmem:[#allocation12 + $0x1c8] sm:$0xff] }
 0x43e   :  { %4755 = vmatprep.subr.bf16.mxu0 %v6306_v43  ;;  %v4598_v43 = vpack.c.bf16 %v1547_v50, %v1545_v7  ;;  %v7331_v7 = vld [vmem:[#allocation38_spill] sm:$0xff]  ;;  %v7332_v50 = vld [vmem:[#allocation39_spill] sm:$0xff] }
 0x440   :  { %4599 = vmatprep.subr.bf16.mxu1 %v4598_v43 }
 0x441   :  { %4757 = vmatpush1.bf16.msra.mxu0 %v6312_v27  ;;  %4601 = vmatpush1.bf16.msra.mxu1 %v4600_v59  ;;  %v1549_v27 = vld [vmem:[#allocation12 + $0x1e8] sm:$0xff] }
 0x442   :  { %4759 = vmatprep.subr.bf16.mxu0 %v6318_v62  ;;  %v4602_v62 = vpack.c.bf16 %v1551_v2, %v1549_v27  ;;  %v7337_v27 = vld [vmem:[#allocation44_spill] sm:$0xff] }
 0x444   :  { %4603 = vmatprep.subr.bf16.mxu1 %v4602_v62 }
 0x445   :  { %4761 = vmatpush1.bf16.msra.mxu0 %v6324_v22  ;;  %4605 = vmatpush1.bf16.msra.mxu1 %v4604_v58 }
 0x446   :  { %4763 = vmatprep.subr.bf16.mxu0 %v6330_v34  ;;  %4671 = vmatprep.subr.bf16.mxu1 %v6228_v41  ;;  %v1451_v41 = vld [vmem:[%s7187_s6] sm:$0x3] }
 0x447   :  { %v1456_v22 = vrot.slane %v1451_v41, %v6102_v9  ;;  %v1460_v34 = vrot.slane %v1451_v41, %v6108_v23 }
 0x449   :  { %4765 = vmatpush1.bf16.msra.mxu0 %v6336_v38 }
 0x44a   :  { %4767 = vmatprep.subr.bf16.mxu0 %v6342_v46 }
 0x44d   :  { %4769 = vmatpush1.bf16.msra.mxu0 %v6348_v55 }
 0x44e   :  { %4771 = vmatprep.subr.bf16.mxu0 %v6354_v5 }
 0x451   :  { %4773 = vmatpush1.bf16.msra.mxu0 %v6360_v8 }
 0x452   :  { %4775 = vmatprep.subr.bf16.mxu0 %v6366_v30 }
 0x455   :  { %4777 = vmatpush1.bf16.msra.mxu0 %v6372_v44 }
 0x456   :  { %4779 = vmatprep.subr.bf16.mxu0 %v6378_v49 }
 0x459   :  { %4781 = vmatpush1.bf16.msra.mxu0 %v6384_v21 }
 0x45a   :  { %4783 = vmatprep.subr.bf16.mxu0 %v4590_v42  ;;  %v7318_v42 = vld [vmem:[#allocation25_spill] sm:$0xff] }
 0x45d   :  { %4785 = vmatpush1.bf16.msra.mxu0 %v4592_v25  ;;  %v7321_v25 = vld [vmem:[#allocation28_spill] sm:$0xff] }
 0x45e   :  { %4787 = vmatprep.subr.bf16.mxu0 %v4594_v35  ;;  %v7326_v35 = vld [vmem:[#allocation33_spill] sm:$0xff] }
 0x461   :  { %4789 = vmatpush1.bf16.msra.mxu0 %v4596_v63  ;;  %v7330_v63 = vld [vmem:[#allocation37_spill] sm:$0xff] }
 0x462   :  { %4791 = vmatprep.subr.bf16.mxu0 %v4598_v43  ;;  %v7333_v43 = vld [vmem:[#allocation40_spill] sm:$0xff] }
 0x465   :  { %4793 = vmatpush1.bf16.msra.mxu0 %v4600_v59  ;;  %v7336_v59 = vld [vmem:[#allocation43_spill] sm:$0xff] }
 0x466   :  { %4795 = vmatprep.subr.bf16.mxu0 %v4602_v62 }
 0x469   :  { %4797 = vmatpush1.bf16.msra.mxu0 %v4604_v58 }
 0x4bf   :  { %v1446_v38 = vpop.f32.mrb[4].mxu0 }
 0x4c0   :  { %v1463_v46 = vadd.f32 %v1456_v22, %v1446_v38  ;;  %v1448_v55 = vpop.f32.mrb[5].mxu0  ;;  %v2082_v22 = vld [vmem:[#allocation9 + $0x8] sm:$0xff]  ;;  %v2083_v38 = vld [vmem:[#allocation9 + $0x10] sm:$0xff] }
 0x4c1   :  { %v1464_v5 = vadd.f32 %v1460_v34, %v1448_v55  ;;  %v2084_v34 = vld [vmem:[#allocation9 + $0x18] sm:$0xff] }
 0x4c2   :  { %5613 = vtanh.f32 %v1463_v46  ;;  %v2088_v55 = vld [vmem:[#allocation9 + $0x38] sm:$0xff] }
 0x4c3   :  { %5615 = vtanh.f32 %v1464_v5 }
 0x4cc   :  { %v5614_v8 = vpop.eup %5613 }
 0x4cd   :  { %v5616_v30 = vpop.eup %5615 }
 0x4ce   :  { %v1469_v44 = vcombine.low %v5614_v8, %v5616_v30  ;;  %1616 = vmatprep.mubr.f32.mxu1 %v5616_v30 }
 0x4cf   :  { %1617 = vmatmul.mubr.f32.vlgmr.msra.gmra.mrb[6].mxu1 %v5614_v8 }
 0x4d0   :  { %v1476_v49 = vrot.slane %v1469_v44, %v6126_v29  ;;  %4673 = vmatpush1.bf16.msra.mxu1 %v6236_v56  ;;  %v7322_v56 = vld [vmem:[#allocation29_spill] sm:$0xff]  ;;  %v2087_v44 = vld [vmem:[#allocation9 + $0x30] sm:$0xff] }
 0x4d1   :  { %4675 = vmatprep.subr.bf16.mxu1 %v6238_v20  ;;  %v7323_v20 = vld [vmem:[#allocation30_spill] sm:$0xff] }
 0x4d2   :  { %v1483_v21 = vrot.slane %v1476_v49, %v6126_v29  ;;  %v2092_v49 = vld [vmem:[#allocation9 + $0x58] sm:$0xff] }
 0x4d4   :  { %1486 = vst.msk [vmem:[#allocation2 + $0x2] ss:$8 sm:$0x3] %vm6131_vm0, %v1483_v21  ;;  %4677 = vmatpush1.bf16.msra.mxu1 %v6242_v33  ;;  %v7327_v33 = vld [vmem:[#allocation34_spill] sm:$0xff] }
 0x4d5   :  { %4679 = vmatprep.subr.bf16.mxu1 %v7317_v47 }
 0x4d8   :  { %4681 = vmatpush1.bf16.msra.mxu1 %v7318_v42  ;;  %v2089_v42 = vld [vmem:[#allocation9 + $0x40] sm:$0xff] }
 0x4d9   :  { %4683 = vmatprep.subr.bf16.mxu1 %v7319_v24  ;;  %v2091_v24 = vld [vmem:[#allocation9 + $0x50] sm:$0xff] }
 0x4dc   :  { %4685 = vmatpush1.bf16.msra.mxu1 %v7320_v19  ;;  %v2094_v19 = vld [vmem:[#allocation9 + $0x68] sm:$0xff] }
 0x4dd   :  { %4687 = vmatprep.subr.bf16.mxu1 %v7321_v25  ;;  %v2096_v25 = vld [vmem:[#allocation9 + $0x78] sm:$0xff] }
 0x4e0   :  { %4689 = vmatpush1.bf16.msra.mxu1 %v7322_v56  ;;  %v6570_v56 = vpack.c.bf16 %v2091_v24, %v2089_v42  ;;  %v2234_v24 = vld [vmem:[#allocation11 + $0x40] sm:$0xff] }
 0x4e1   :  { %4691 = vmatprep.subr.bf16.mxu1 %v7323_v20  ;;  %v6573_v20 = vpack.c.bf16 %v2096_v25, %v2094_v19  ;;  %v2236_v19 = vld [vmem:[#allocation11 + $0x50] sm:$0xff] }
 0x4e4   :  { %4693 = vmatpush1.bf16.msra.mxu1 %v7324_v10  ;;  %v2093_v10 = vld [vmem:[#allocation9 + $0x60] sm:$0xff] }
 0x4e5   :  { %4695 = vmatprep.subr.bf16.mxu1 %v7325_v12  ;;  %v2095_v12 = vld [vmem:[#allocation9 + $0x70] sm:$0xff] }
 0x4e8   :  { %4697 = vmatpush1.bf16.msra.mxu1 %v7326_v35  ;;  %v2098_v35 = vld [vmem:[#allocation9 + $0x88] sm:$0xff] }
 0x4e9   :  { %4699 = vmatprep.subr.bf16.mxu1 %v7327_v33  ;;  %v2100_v33 = vld [vmem:[#allocation9 + $0x98] sm:$0xff] }
 0x4ec   :  { %4701 = vmatpush1.bf16.msra.mxu1 %v7328_v18  ;;  %v6576_v18 = vpack.c.bf16 %v2095_v12, %v2093_v10  ;;  %v2239_v10 = vld [vmem:[#allocation11 + $0x68] sm:$0xff]  ;;  %v2241_v12 = vld [vmem:[#allocation11 + $0x78] sm:$0xff] }
 0x4ed   :  { %4703 = vmatprep.subr.bf16.mxu1 %v7329_v60  ;;  %v6579_v60 = vpack.c.bf16 %v2100_v33, %v2098_v35  ;;  %v2238_v35 = vld [vmem:[#allocation11 + $0x60] sm:$0xff]  ;;  %v2240_v33 = vld [vmem:[#allocation11 + $0x70] sm:$0xff] }
 0x4f0   :  { %4705 = vmatpush1.bf16.msra.mxu1 %v7330_v63  ;;  %v2097_v63 = vld [vmem:[#allocation9 + $0x80] sm:$0xff] }
 0x4f1   :  { %4707 = vmatprep.subr.bf16.mxu1 %v7331_v7  ;;  %v2099_v7 = vld [vmem:[#allocation9 + $0x90] sm:$0xff] }
 0x4f4   :  { %4709 = vmatpush1.bf16.msra.mxu1 %v7332_v50  ;;  %v2102_v50 = vld [vmem:[#allocation9 + $0xa8] sm:$0xff] }
 0x4f5   :  { %4711 = vmatprep.subr.bf16.mxu1 %v7333_v43  ;;  %v2104_v43 = vld [vmem:[#allocation9 + $0xb8] sm:$0xff] }
 0x4f8   :  { %4713 = vmatpush1.bf16.msra.mxu1 %v7334_v3  ;;  %v6582_v3 = vpack.c.bf16 %v2099_v7, %v2097_v63  ;;  %v2405_v63 = vld [vmem:[#allocation12 + $0x8] sm:$0xff]  ;;  %v2407_v7 = vld [vmem:[#allocation12 + $0x18] sm:$0xff] }
 0x4f9   :  { %4715 = vmatprep.subr.bf16.mxu1 %v7335_v13  ;;  %v6585_v13 = vpack.c.bf16 %v2104_v43, %v2102_v50  ;;  %v2404_v50 = vld [vmem:[#allocation12] sm:$0xff]  ;;  %v6635_v43 = vpack.c.bf16 %v2236_v19, %v2234_v24  ;;  %v2418_v24 = vld [vmem:[#allocation12 + $0x70] sm:$0xff] }
 0x4fb   :  { %7346 = vst [vmem:[#allocation25_spill] sm:$0xff] %v6635_v43 }
 0x4fc   :  { %4717 = vmatpush1.bf16.msra.mxu1 %v7336_v59  ;;  %v2101_v59 = vld [vmem:[#allocation9 + $0xa0] sm:$0xff] }
 0x4fd   :  { %4719 = vmatprep.subr.bf16.mxu1 %v7337_v27  ;;  %v2103_v27 = vld [vmem:[#allocation9 + $0xb0] sm:$0xff] }
 0x4ff   :  { %v1753_v2 = vpop.f32.mrb[6].mxu0 }
 0x500   :  { %v1760_v62 = vrot.slane %v1753_v2, 5  ;;  %v1755_v32 = vpop.f32.mrb[7].mxu0  ;;  %4721 = vmatpush1.bf16.msra.mxu1 %v6375_v17  ;;  %v6552_v17 = vpack.c.bf16 %v2084_v34, %v2082_v22  ;;  %v6588_v2 = vpack.c.bf16 %v2103_v27, %v2101_v59  ;;  %v2228_v22 = vld [vmem:[#allocation11 + $0x10] sm:$0xff]  ;;  %v2231_v34 = vld [vmem:[#allocation11 + $0x28] sm:$0xff]  ;;  %v6637_v59 = vpack.c.bf16 %v2407_v7, %v2405_v63 }
 0x501   :  { %v1761_v16 = vrot.slane %v1755_v32, 5  ;;  %4723 = vmatprep.subr.bf16.mxu1 %v6381_v26  ;;  %v2081_v26 = vld [vmem:[#allocation9] sm:$0xff]  ;;  %v7339_v32 = vld [vmem:[#allocation46_spill] sm:$0xff] }
 0x502   :  { %v1764_v58 = vadd.f32 %v6112_v40, %v1760_v62  ;;  %v6558_v8 = vpack.c.bf16 %v2083_v38, %v2081_v26  ;;  %v7338_v62 = vld [vmem:[#allocation45_spill] sm:$0xff]  ;;  %v2233_v26 = vld [vmem:[#allocation11 + $0x38] sm:$0xff]  ;;  %v2406_v27 = vld [vmem:[#allocation12 + $0x10] sm:$0xff] }
 0x503   :  { %v1765_v41 = vadd.f32 %v6114_v54, %v1761_v16  ;;  %v7340_v16 = vld [vmem:[#allocation47_spill] sm:$0xff] }
 0x504   :  { %5617 = vtanh.f32 %v1764_v58  ;;  %4725 = vmatpush1.bf16.msra.mxu1 %v6387_v6  ;;  %v2086_v6 = vld [vmem:[#allocation9 + $0x28] sm:$0xff]  ;;  %v7341_v58 = vld [vmem:[#allocation48_spill] sm:$0xff] }
 0x505   :  { %5619 = vtanh.f32 %v1765_v41  ;;  %4727 = vmatprep.subr.bf16.mxu1 %v6391_v57  ;;  %v6561_v30 = vpack.c.bf16 %v2088_v55, %v2086_v6  ;;  %v6622_v55 = vpack.c.bf16 %v2233_v26, %v2231_v34  ;;  %v2244_v34 = vld [vmem:[#allocation11 + $0x90] sm:$0xff]  ;;  %v2417_v26 = vld [vmem:[#allocation12 + $0x68] sm:$0xff] }
 0x508   :  { %4729 = vmatpush1.bf16.msra.mxu1 %v6397_v28 }
 0x509   :  { %4731 = vmatprep.subr.bf16.mxu1 %v6400_v51  ;;  %v2085_v51 = vld [vmem:[#allocation9 + $0x20] sm:$0xff] }
 0x50a   :  { %v6564_v21 = vpack.c.bf16 %v2087_v44, %v2085_v51  ;;  %v2235_v51 = vld [vmem:[#allocation11 + $0x48] sm:$0xff]  ;;  %v2237_v44 = vld [vmem:[#allocation11 + $0x58] sm:$0xff] }
 0x50b   :  { %v6629_v42 = vpack.c.bf16 %v2237_v44, %v2235_v51  ;;  %v2246_v51 = vld [vmem:[#allocation11 + $0xa0] sm:$0xff] }
 0x50c   :  { %4733 = vmatpush1.bf16.msra.mxu1 %v6403_v1  ;;  %v2090_v1 = vld [vmem:[#allocation9 + $0x48] sm:$0xff] }
 0x50d   :  { %4799 = vmatprep.subr.bf16.mxu1 %v6552_v17  ;;  %v6567_v47 = vpack.c.bf16 %v2092_v49, %v2090_v1  ;;  %7345 = vst [vmem:[#allocation24_spill] sm:$0xff] %v6629_v42 }
 0x50e   :  { %v6556_v46 = vpop.eup %5617 }
 0x50f   :  { %v5620_v5 = vpop.eup %5619  ;;  %v1834_v28 = vrot.slane %v6556_v46, 3 }
 0x510   :  { %v1835_v57 = vrot.slane %v5620_v5, 3  ;;  %v2230_v5 = vld [vmem:[#allocation11 + $0x20] sm:$0xff] }
 0x512   :  { %1902 = vmatprep.mubr.f32.mxu1 %v1835_v57 }
 0x513   :  { %1903 = vmatmul.mubr.f32.vlgmr.msra.gmra.mrb[6].mxu1 %v1834_v28 }
 0x514   :  { %4801 = vmatpush1.bf16.msra.mxu1 %v6558_v8  ;;  %2209 = vmatprep.mubr.f32.mxu1 %v1835_v57  ;;  %v2232_v57 = vld [vmem:[#allocation11 + $0x30] sm:$0xff] }
 0x515   :  { %4803 = vmatprep.subr.bf16.mxu1 %v6561_v30  ;;  %v6626_v49 = vpack.c.bf16 %v2232_v57, %v2230_v5  ;;  %v2249_v5 = vld [vmem:[#allocation11 + $0xb8] sm:$0xff] }
 0x518   :  { %4805 = vmatpush1.bf16.msra.mxu1 %v6564_v21 }
 0x519   :  { %4807 = vmatprep.subr.bf16.mxu1 %v6567_v47 }
 0x51c   :  { %4809 = vmatpush1.bf16.msra.mxu1 %v6570_v56 }
 0x51d   :  { %4811 = vmatprep.subr.bf16.mxu1 %v6573_v20 }
 0x520   :  { %4813 = vmatpush1.bf16.msra.mxu1 %v6576_v18 }
 0x521   :  { %4815 = vmatprep.subr.bf16.mxu1 %v6579_v60 }
 0x524   :  { %4817 = vmatpush1.bf16.msra.mxu1 %v6582_v3 }
 0x525   :  { %4819 = vmatprep.subr.bf16.mxu1 %v6585_v13 }
 0x528   :  { %4821 = vmatpush1.bf16.msra.mxu1 %v6588_v2 }
 0x529   :  { %4823 = vmatprep.subr.bf16.mxu1 %v6423_v4  ;;  %v7342_v4 = vld [vmem:[#allocation49_spill] sm:$0xff] }
 0x52c   :  { %4825 = vmatpush1.bf16.msra.mxu1 %v6426_v53  ;;  %v7343_v53 = vld [vmem:[#allocation50_spill] sm:$0xff] }
 0x52d   :  { %4827 = vmatprep.subr.bf16.mxu1 %v6429_v61  ;;  %v7344_v61 = vld [vmem:[#allocation51_spill] sm:$0xff] }
 0x530   :  { %4829 = vmatpush1.bf16.msra.mxu1 %v6432_v52  ;;  %v2227_v52 = vld [vmem:[#allocation11 + $0x8] sm:$0xff] }
 0x531   :  { %4831 = vmatprep.subr.bf16.mxu1 %v6435_v48  ;;  %v2229_v48 = vld [vmem:[#allocation11 + $0x18] sm:$0xff] }
 0x534   :  { %4833 = vmatpush1.bf16.msra.mxu1 %v6438_v11  ;;  %v6612_v11 = vpack.c.bf16 %v2229_v48, %v2227_v52  ;;  %v2413_v52 = vld [vmem:[#allocation12 + $0x48] sm:$0xff] }
 0x535   :  { %4835 = vmatprep.subr.bf16.mxu1 %v6441_v36  ;;  %v1909_v36 = vld [vmem:[%s7187_s6] sm:$0x3] }
 0x536   :  { %4863 = vmatprep.subr.bf16.mxu0 %v6612_v11  ;;  %v2243_v48 = vld [vmem:[#allocation11 + $0x88] sm:$0xff] }
 0x538   :  { %4837 = vmatpush1.bf16.msra.mxu1 %v7338_v62  ;;  %v2409_v62 = vld [vmem:[#allocation12 + $0x28] sm:$0xff] }
 0x539   :  { %4839 = vmatprep.subr.bf16.mxu1 %v7339_v32  ;;  %v2411_v32 = vld [vmem:[#allocation12 + $0x38] sm:$0xff] }
 0x53c   :  { %4841 = vmatpush1.bf16.msra.mxu1 %v7340_v16  ;;  %v6640_v16 = vpack.c.bf16 %v2241_v12, %v2239_v10  ;;  %v2421_v10 = vld [vmem:[#allocation12 + $0x88] sm:$0xff]  ;;  %v2423_v12 = vld [vmem:[#allocation12 + $0x98] sm:$0xff] }
 0x53d   :  { %4843 = vmatprep.subr.bf16.mxu1 %v7341_v58  ;;  %v6642_v58 = vpack.c.bf16 %v2406_v27, %v2404_v50  ;;  %v2250_v50 = vld [vmem:[#allocation11 + $0xc0] sm:$0xff]  ;;  %v6678_v27 = vpack.c.bf16 %v2423_v12, %v2421_v10 }
 0x53e   :  { %7347 = vst [vmem:[#allocation26_spill] sm:$0xff] %v6640_v16 }
 0x540   :  { %4845 = vmatpush1.bf16.msra.mxu1 %v7342_v4  ;;  %v6644_v4 = vpack.c.bf16 %v2411_v32, %v2409_v62  ;;  %v2420_v62 = vld [vmem:[#allocation12 + $0x80] sm:$0xff]  ;;  %v2422_v32 = vld [vmem:[#allocation12 + $0x90] sm:$0xff] }
 0x541   :  { %4847 = vmatprep.subr.bf16.mxu1 %v7343_v53  ;;  %v2408_v53 = vld [vmem:[#allocation12 + $0x20] sm:$0xff] }
 0x544   :  { %4849 = vmatpush1.bf16.msra.mxu1 %v7344_v61  ;;  %v2410_v61 = vld [vmem:[#allocation12 + $0x30] sm:$0xff] }
 0x545   :  { %4851 = vmatprep.subr.bf16.mxu1 %v6465_v37  ;;  %v1914_v37 = vrot.slane %v1909_v36, %v6102_v9 }
 0x548   :  { %4853 = vmatpush1.bf16.msra.mxu1 %v6468_v31  ;;  %v1918_v31 = vrot.slane %v1909_v36, %v6108_v23  ;;  %v2245_v36 = vld [vmem:[#allocation11 + $0x98] sm:$0xff] }
 0x549   :  { %4855 = vmatprep.subr.bf16.mxu1 %v6471_v15 }
 0x54c   :  { %4857 = vmatpush1.bf16.msra.mxu1 %v6474_v14 }
 0x54d   :  { %4859 = vmatprep.subr.bf16.mxu1 %v6477_v45 }
 0x550   :  { %4861 = vmatpush1.bf16.msra.mxu1 %v6480_v0  ;;  %v2226_v0 = vld [vmem:[#allocation11] sm:$0xff] }
 0x551   :  { %v6620_v46 = vpack.c.bf16 %v2228_v22, %v2226_v0  ;;  %4927 = vmatprep.subr.bf16.mxu1 %v6637_v59  ;;  %v2414_v0 = vld [vmem:[#allocation12 + $0x50] sm:$0xff]  ;;  %v6657_v22 = vpack.c.bf16 %v2245_v36, %v2243_v48  ;;  %v2427_v48 = vld [vmem:[#allocation12 + $0xb8] sm:$0xff]  ;;  %v2255_v36 = vld [vmem:[#allocation11 + $0xe8] sm:$0xff] }
 0x553   :  { %2210 = vmatmul.mubr.f32.vlgmr.msra.gmra.mrb[8].mxu1 %v1834_v28  ;;  %7349 = vst [vmem:[#allocation28_spill] sm:$0xff] %v6657_v22 }
 0x554   :  { %4929 = vmatpush1.bf16.msra.mxu1 %v6642_v58 }
 0x555   :  { %4931 = vmatprep.subr.bf16.mxu1 %v6644_v4 }
 0x5e6   :  { %v1904_v15 = vpop.f32.mrb[6].mxu1 }
 0x5e7   :  { %v1921_v14 = vadd.f32 %v1914_v37, %v1904_v15  ;;  %v1906_v45 = vpop.f32.mrb[7].mxu1  ;;  %v2415_v37 = vld [vmem:[#allocation12 + $0x58] sm:$0xff]  ;;  %v6651_v15 = vpack.c.bf16 %v2240_v33, %v2238_v35  ;;  %v2251_v35 = vld [vmem:[#allocation11 + $0xc8] sm:$0xff] }
 0x5e8   :  { %v1922_v41 = vadd.f32 %v1918_v31, %v1906_v45  ;;  %v6648_v31 = vpack.c.bf16 %v2410_v61, %v2408_v53  ;;  %v6654_v45 = vpack.c.bf16 %v2415_v37, %v2413_v52  ;;  %v2253_v33 = vld [vmem:[#allocation11 + $0xd8] sm:$0xff]  ;;  %v2252_v61 = vld [vmem:[#allocation11 + $0xd0] sm:$0xff]  ;;  %v2425_v52 = vld [vmem:[#allocation12 + $0xa8] sm:$0xff] }
 0x5e9   :  { %5621 = vtanh.f32 %v1921_v14  ;;  %7348 = vst [vmem:[#allocation27_spill] sm:$0xff] %v6651_v15  ;;  %v2242_v14 = vld [vmem:[#allocation11 + $0x80] sm:$0xff]  ;;  %v6681_v53 = vpack.c.bf16 %v2253_v33, %v2251_v35  ;;  %v2257_v37 = vld [vmem:[#allocation11 + $0xf8] sm:$0xff] }
 0x5ea   :  { %5623 = vtanh.f32 %v1922_v41  ;;  %v2412_v41 = vld [vmem:[#allocation12 + $0x40] sm:$0xff]  ;;  %4933 = vmatpush1.bf16.msra.mxu1 %v6648_v31 }
 0x5eb   :  { %v6660_v57 = vpack.c.bf16 %v2414_v0, %v2412_v41  ;;  %4935 = vmatprep.subr.bf16.mxu1 %v6654_v45  ;;  %7353 = vst [vmem:[#allocation32_spill] sm:$0xff] %v6681_v53  ;;  %v6687_v41 = vpack.c.bf16 %v2252_v61, %v2250_v50  ;;  %v2254_v0 = vld [vmem:[#allocation11 + $0xe0] sm:$0xff]  ;;  %v2260_v61 = vld [vmem:[#allocation11 + $0x110] sm:$0xff] }
 0x5ec   :  { %v2258_v35 = vld [vmem:[#allocation11 + $0x100] sm:$0xff] }
 0x5ed   :  { %7354 = vst [vmem:[#allocation33_spill] sm:$0xff] %v6687_v41  ;;  %v2428_v50 = vld [vmem:[#allocation12 + $0xc0] sm:$0xff] }
 0x5ee   :  { %4937 = vmatpush1.bf16.msra.mxu1 %v6660_v57 }
 0x5f3   :  { %v5622_v38 = vpop.eup %5621 }
 0x5f4   :  { %v5624_v6 = vpop.eup %5623 }
 0x5f5   :  { %v1927_v28 = vcombine.low %v5622_v38, %v5624_v6  ;;  %2074 = vmatprep.mubr.f32.mxu0 %v5624_v6  ;;  %v2247_v6 = vld [vmem:[#allocation11 + $0xa8] sm:$0xff] }
 0x5f6   :  { %2075 = vmatmul.mubr.f32.vlgmr.msra.gmra.mrb[8].mxu0 %v5622_v38  ;;  %v2419_v38 = vld [vmem:[#allocation12 + $0x78] sm:$0xff]  ;;  %v6669_v19 = vpack.c.bf16 %v2249_v5, %v2247_v6  ;;  %v6693_v6 = vpack.c.bf16 %v2257_v37, %v2255_v36  ;;  %v2256_v5 = vld [vmem:[#allocation11 + $0xf0] sm:$0xff]  ;;  %v2263_v36 = vld [vmem:[#allocation11 + $0x128] sm:$0xff] }
 0x5f7   :  { %v1934_v1 = vrot.slane %v1927_v28, %v6126_v29  ;;  %4865 = vmatpush1.bf16.msra.mxu0 %v6620_v46  ;;  %v6663_v28 = vpack.c.bf16 %v2244_v34, %v2242_v14  ;;  %v6666_v44 = vpack.c.bf16 %v2419_v38, %v2417_v26  ;;  %v6684_v14 = vpack.c.bf16 %v2422_v32, %v2420_v62  ;;  %v2424_v26 = vld [vmem:[#allocation12 + $0xa0] sm:$0xff]  ;;  %v2426_v38 = vld [vmem:[#allocation12 + $0xb0] sm:$0xff]  ;;  %v2265_v37 = vld [vmem:[#allocation11 + $0x138] sm:$0xff] }
 0x5f8   :  { %4867 = vmatprep.subr.bf16.mxu0 %v6622_v55  ;;  %7351 = vst [vmem:[#allocation30_spill] sm:$0xff] %v6669_v19  ;;  %v6690_v34 = vpack.c.bf16 %v2427_v48, %v2425_v52  ;;  %7355 = vst [vmem:[#allocation34_spill] sm:$0xff] %v6693_v6  ;;  %v6696_v10 = vpack.c.bf16 %v2426_v38, %v2424_v26  ;;  %v6699_v12 = vpack.c.bf16 %v2256_v5, %v2254_v0  ;;  %v2430_v62 = vld [vmem:[#allocation12 + $0xd0] sm:$0xff]  ;;  %v2433_v52 = vld [vmem:[#allocation12 + $0xe8] sm:$0xff] }
 0x5f9   :  { %v1941_v25 = vrot.slane %v1934_v1, %v6126_v29  ;;  %7350 = vst [vmem:[#allocation29_spill] sm:$0xff] %v6663_v28  ;;  %v2416_v1 = vld [vmem:[#allocation12 + $0x60] sm:$0xff]  ;;  %4939 = vmatprep.subr.bf16.mxu1 %v6666_v44  ;;  %v2435_v48 = vld [vmem:[#allocation12 + $0xf8] sm:$0xff]  ;;  %v6708_v0 = vpack.c.bf16 %v2430_v62, %v2428_v50  ;;  %v6711_v26 = vpack.c.bf16 %v2260_v61, %v2258_v35  ;;  %v2267_v50 = vld [vmem:[#allocation11 + $0x148] sm:$0xff] }
 0x5fa   :  { %v6672_v63 = vpack.c.bf16 %v2418_v24, %v2416_v1  ;;  %v2431_v1 = vld [vmem:[#allocation12 + $0xd8] sm:$0xff]  ;;  %v2259_v24 = vld [vmem:[#allocation11 + $0x108] sm:$0xff]  ;;  %7356 = vst [vmem:[#allocation35_spill] sm:$0xff] %v6699_v12  ;;  %v2262_v38 = vld [vmem:[#allocation11 + $0x120] sm:$0xff]  ;;  %v6714_v5 = vpack.c.bf16 %v2435_v48, %v2433_v52 }
 0x5fb   :  { %1944 = vst.msk [vmem:[#allocation2 + $0x3] ss:$8 sm:$0x3] %vm6131_vm0, %v1941_v25  ;;  %4869 = vmatpush1.bf16.msra.mxu0 %v6626_v49  ;;  %v2248_v25 = vld [vmem:[#allocation11 + $0xb0] sm:$0xff]  ;;  %7358 = vst [vmem:[#allocation37_spill] sm:$0xff] %v6711_v26  ;;  %v2269_v62 = vld [vmem:[#allocation11 + $0x158] sm:$0xff] }
 0x5fc   :  { %4871 = vmatprep.subr.bf16.mxu0 %v6629_v42  ;;  %v6675_v7 = vpack.c.bf16 %v2248_v25, %v2246_v51  ;;  %4941 = vmatpush1.bf16.msra.mxu1 %v6672_v63  ;;  %v2429_v51 = vld [vmem:[#allocation12 + $0xc8] sm:$0xff]  ;;  %v2261_v25 = vld [vmem:[#allocation11 + $0x118] sm:$0xff]  ;;  %v2266_v52 = vld [vmem:[#allocation11 + $0x140] sm:$0xff] }
 0x5fd   :  { %4943 = vmatprep.subr.bf16.mxu1 %v6678_v27  ;;  %v6702_v33 = vpack.c.bf16 %v2431_v1, %v2429_v51  ;;  %v6705_v32 = vpack.c.bf16 %v2261_v25, %v2259_v24  ;;  %v2432_v51 = vld [vmem:[#allocation12 + $0xe0] sm:$0xff]  ;;  %v2434_v1 = vld [vmem:[#allocation12 + $0xf0] sm:$0xff]  ;;  %v6717_v24 = vpack.c.bf16 %v2265_v37, %v2263_v36  ;;  %v2287_v42 = vld [vmem:[#allocation11 + $0x1e8] sm:$0xff] }
 0x5fe   :  { %7352 = vst [vmem:[#allocation31_spill] sm:$0xff] %v6675_v7  ;;  %v2264_v25 = vld [vmem:[#allocation11 + $0x130] sm:$0xff]  ;;  %v6720_v35 = vpack.c.bf16 %v2434_v1, %v2432_v51  ;;  %v2436_v36 = vld [vmem:[#allocation12 + $0x100] sm:$0xff]  ;;  %v2271_v51 = vld [vmem:[#allocation11 + $0x168] sm:$0xff] }
 0x5ff   :  { %4873 = vmatpush1.bf16.msra.mxu0 %v6635_v43  ;;  %7357 = vst [vmem:[#allocation36_spill] sm:$0xff] %v6705_v32  ;;  %7359 = vst [vmem:[#allocation38_spill] sm:$0xff] %v6717_v24  ;;  %v6723_v61 = vpack.c.bf16 %v2264_v25, %v2262_v38  ;;  %v2438_v37 = vld [vmem:[#allocation12 + $0x110] sm:$0xff]  ;;  %v2273_v1 = vld [vmem:[#allocation11 + $0x178] sm:$0xff] }
 0x600   :  { %4875 = vmatprep.subr.bf16.mxu0 %v6640_v16  ;;  %4945 = vmatpush1.bf16.msra.mxu1 %v6684_v14  ;;  %v6732_v38 = vpack.c.bf16 %v2438_v37, %v2436_v36  ;;  %v2275_v36 = vld [vmem:[#allocation11 + $0x188] sm:$0xff]  ;;  %v2277_v37 = vld [vmem:[#allocation11 + $0x198] sm:$0xff] }
 0x601   :  { %4947 = vmatprep.subr.bf16.mxu1 %v6690_v34  ;;  %7360 = vst [vmem:[#allocation39_spill] sm:$0xff] %v6723_v61  ;;  %v2283_v16 = vld [vmem:[#allocation11 + $0x1c8] sm:$0xff]  ;;  %v2285_v43 = vld [vmem:[#allocation11 + $0x1d8] sm:$0xff] }
 0x603   :  { %4877 = vmatpush1.bf16.msra.mxu0 %v6651_v15  ;;  %v2451_v15 = vld [vmem:[#allocation12 + $0x178] sm:$0xff] }
 0x604   :  { %4879 = vmatprep.subr.bf16.mxu0 %v6657_v22  ;;  %4949 = vmatpush1.bf16.msra.mxu1 %v6696_v10  ;;  %v2449_v22 = vld [vmem:[#allocation12 + $0x168] sm:$0xff] }
 0x605   :  { %4951 = vmatprep.subr.bf16.mxu1 %v6702_v33 }
 0x607   :  { %4881 = vmatpush1.bf16.msra.mxu0 %v6663_v28  ;;  %v2447_v28 = vld [vmem:[#allocation12 + $0x158] sm:$0xff] }
 0x608   :  { %4883 = vmatprep.subr.bf16.mxu0 %v6669_v19  ;;  %4953 = vmatpush1.bf16.msra.mxu1 %v6708_v0  ;;  %v2445_v19 = vld [vmem:[#allocation12 + $0x148] sm:$0xff] }
 0x609   :  { %4955 = vmatprep.subr.bf16.mxu1 %v6714_v5 }
 0x60b   :  { %4885 = vmatpush1.bf16.msra.mxu0 %v6675_v7  ;;  %v2443_v7 = vld [vmem:[#allocation12 + $0x138] sm:$0xff] }
 0x60c   :  { %4887 = vmatprep.subr.bf16.mxu0 %v6681_v53  ;;  %v2441_v53 = vld [vmem:[#allocation12 + $0x128] sm:$0xff]  ;;  %4957 = vmatpush1.bf16.msra.mxu1 %v6720_v35 }
 0x60f   :  { %4889 = vmatpush1.bf16.msra.mxu0 %v6687_v41  ;;  %v2439_v41 = vld [vmem:[#allocation12 + $0x118] sm:$0xff] }
 0x610   :  { %4891 = vmatprep.subr.bf16.mxu0 %v6693_v6  ;;  %v2437_v6 = vld [vmem:[#allocation12 + $0x108] sm:$0xff] }
 0x611   :  { %v6726_v48 = vpack.c.bf16 %v2439_v41, %v2437_v6  ;;  %v2270_v41 = vld [vmem:[#allocation11 + $0x160] sm:$0xff]  ;;  %v6738_v6 = vpack.c.bf16 %v2443_v7, %v2441_v53  ;;  %v6750_v53 = vpack.c.bf16 %v2447_v28, %v2445_v19  ;;  %v6762_v28 = vpack.c.bf16 %v2451_v15, %v2449_v22 }
 0x612   :  { %v2274_v7 = vld [vmem:[#allocation11 + $0x180] sm:$0xff] }
 0x613   :  { %4893 = vmatpush1.bf16.msra.mxu0 %v6699_v12  ;;  %v2268_v12 = vld [vmem:[#allocation11 + $0x150] sm:$0xff]  ;;  %4959 = vmatprep.subr.bf16.mxu1 %v6726_v48  ;;  %v2448_v19 = vld [vmem:[#allocation12 + $0x160] sm:$0xff] }
 0x614   :  { %4895 = vmatprep.subr.bf16.mxu0 %v6705_v32  ;;  %v6729_v32 = vpack.c.bf16 %v2269_v62, %v2267_v50  ;;  %v6735_v25 = vpack.c.bf16 %v2268_v12, %v2266_v52  ;;  %v2440_v50 = vld [vmem:[#allocation12 + $0x120] sm:$0xff]  ;;  %v2442_v62 = vld [vmem:[#allocation12 + $0x130] sm:$0xff]  ;;  %4961 = vmatpush1.bf16.msra.mxu1 %v6732_v38 }
 0x615   :  { %v6744_v12 = vpack.c.bf16 %v2442_v62, %v2440_v50  ;;  %4963 = vmatprep.subr.bf16.mxu1 %v6738_v6  ;;  %v2279_v50 = vld [vmem:[#allocation11 + $0x1a8] sm:$0xff]  ;;  %v2281_v62 = vld [vmem:[#allocation11 + $0x1b8] sm:$0xff] }
 0x616   :  { %7361 = vst [vmem:[#allocation40_spill] sm:$0xff] %v6729_v32  ;;  %7362 = vst [vmem:[#allocation41_spill] sm:$0xff] %v6735_v25 }
 0x617   :  { %4897 = vmatpush1.bf16.msra.mxu0 %v6711_v26  ;;  %v2272_v26 = vld [vmem:[#allocation11 + $0x170] sm:$0xff] }
 0x618   :  { %4899 = vmatprep.subr.bf16.mxu0 %v6717_v24  ;;  %v6741_v24 = vpack.c.bf16 %v2273_v1, %v2271_v51  ;;  %v6747_v52 = vpack.c.bf16 %v2272_v26, %v2270_v41  ;;  %v2444_v51 = vld [vmem:[#allocation12 + $0x140] sm:$0xff]  ;;  %v2446_v1 = vld [vmem:[#allocation12 + $0x150] sm:$0xff]  ;;  %4965 = vmatpush1.bf16.msra.mxu1 %v6744_v12 }
 0x619   :  { %v6756_v26 = vpack.c.bf16 %v2446_v1, %v2444_v51  ;;  %4967 = vmatprep.subr.bf16.mxu1 %v6750_v53 }
 0x61a   :  { %7363 = vst [vmem:[#allocation42_spill] sm:$0xff] %v6741_v24  ;;  %7364 = vst [vmem:[#allocation43_spill] sm:$0xff] %v6747_v52 }
 0x61b   :  { %4901 = vmatpush1.bf16.msra.mxu0 %v6723_v61  ;;  %v2276_v61 = vld [vmem:[#allocation11 + $0x190] sm:$0xff] }
 0x61c   :  { %4903 = vmatprep.subr.bf16.mxu0 %v6729_v32  ;;  %v6753_v32 = vpack.c.bf16 %v2277_v37, %v2275_v36  ;;  %v6759_v41 = vpack.c.bf16 %v2276_v61, %v2274_v7  ;;  %v2450_v36 = vld [vmem:[#allocation12 + $0x170] sm:$0xff]  ;;  %v6765_v37 = vpack.c.bf16 %v2281_v62, %v2279_v50  ;;  %4969 = vmatpush1.bf16.msra.mxu1 %v6756_v26  ;;  %v2282_v62 = vld [vmem:[#allocation11 + $0x1c0] sm:$0xff] }
 0x61d   :  { %v6768_v1 = vpack.c.bf16 %v2450_v36, %v2448_v19  ;;  %4971 = vmatprep.subr.bf16.mxu1 %v6762_v28  ;;  %v6775_v50 = vpack.c.bf16 %v2285_v43, %v2283_v16  ;;  %v2289_v19 = vld [vmem:[#allocation11 + $0x1f8] sm:$0xff]  ;;  %v2286_v16 = vld [vmem:[#allocation11 + $0x1e0] sm:$0xff] }
 0x61e   :  { %7365 = vst [vmem:[#allocation44_spill] sm:$0xff] %v6753_v32  ;;  %v6784_v43 = vpack.c.bf16 %v2289_v19, %v2287_v42  ;;  %v2566_v42 = vld [vmem:[#allocation9 + $0xd8] sm:$0xff] }
 0x61f   :  { %4905 = vmatpush1.bf16.msra.mxu0 %v6735_v25  ;;  %v2280_v25 = vld [vmem:[#allocation11 + $0x1b0] sm:$0xff] }
 0x620   :  { %4907 = vmatprep.subr.bf16.mxu0 %v6741_v24  ;;  %v2278_v24 = vld [vmem:[#allocation11 + $0x1a0] sm:$0xff]  ;;  %4973 = vmatpush1.bf16.msra.mxu1 %v6768_v1 }
 0x621   :  { %v6771_v15 = vpack.c.bf16 %v2280_v25, %v2278_v24  ;;  %v2288_v25 = vld [vmem:[#allocation11 + $0x1f0] sm:$0xff] }
 0x623   :  { %4909 = vmatpush1.bf16.msra.mxu0 %v6747_v52 }
 0x624   :  { %4911 = vmatprep.subr.bf16.mxu0 %v6753_v32  ;;  %v2284_v32 = vld [vmem:[#allocation11 + $0x1d0] sm:$0xff] }
 0x625   :  { %v6781_v24 = vpack.c.bf16 %v2284_v32, %v2282_v62  ;;  %v2572_v62 = vld [vmem:[#allocation9 + $0x108] sm:$0xff] }
 0x626   :  { %v2211_v51 = vpop.f32.mrb[8].mxu1 }
 0x627   :  { %v2218_v61 = vrot.slane %v2211_v51, 4  ;;  %v2213_v7 = vpop.f32.mrb[9].mxu1  ;;  %4913 = vmatpush1.bf16.msra.mxu0 %v6759_v41  ;;  %v6787_v51 = vpack.c.bf16 %v2288_v25, %v2286_v16  ;;  %v2576_v16 = vld [vmem:[#allocation9 + $0x128] sm:$0xff]  ;;  %v2578_v25 = vld [vmem:[#allocation9 + $0x138] sm:$0xff] }
 0x628   :  { %v2219_v22 = vrot.slane %v2213_v7, 4  ;;  %4915 = vmatprep.subr.bf16.mxu0 %v6765_v37 }
 0x629   :  { %v2222_v52 = vadd.f32 %v6112_v40, %v2218_v61 }
 0x62a   :  { %v2223_v36 = vadd.f32 %v6114_v54, %v2219_v22  ;;  %v2568_v22 = vld [vmem:[#allocation9 + $0xe8] sm:$0xff] }
 0x62b   :  { %5625 = vtanh.f32 %v2222_v52  ;;  %4917 = vmatpush1.bf16.msra.mxu0 %v6771_v15 }
 0x62c   :  { %5627 = vtanh.f32 %v2223_v36  ;;  %4919 = vmatprep.subr.bf16.mxu0 %v6775_v50  ;;  %v2571_v36 = vld [vmem:[#allocation9 + $0x100] sm:$0xff] }
 0x62f   :  { %4921 = vmatpush1.bf16.msra.mxu0 %v6781_v24 }
 0x630   :  { %4923 = vmatprep.subr.bf16.mxu0 %v6784_v43 }
 0x633   :  { %4925 = vmatpush1.bf16.msra.mxu0 %v6787_v51 }
 0x634   :  { %4991 = vmatprep.subr.bf16.mxu0 %v6552_v17  ;;  %v2564_v17 = vld [vmem:[#allocation9 + $0xc8] sm:$0xff] }
 0x635   :  { %v6792_v52 = vpop.eup %5625 }
 0x636   :  { %v5628_v32 = vpop.eup %5627  ;;  %v7254_v7 = vrot.slane %v6792_v52, 4 }
 0x637   :  { %v2293_v61 = vrot.slane %v5628_v32, 4 }
 0x639   :  { %2360 = vmatprep.mubr.f32.mxu0 %v2293_v61 }
 0x63a   :  { %2361 = vmatmul.mubr.f32.vlgmr.msra.gmra.mrb[8].mxu0 %v7254_v7  ;;  %v2587_v7 = vld [vmem:[#allocation9 + $0x180] sm:$0xff] }
 0x63b   :  { %4993 = vmatpush1.bf16.msra.mxu0 %v6558_v8  ;;  %2667 = vmatprep.mubr.f32.mxu0 %v2293_v61  ;;  %v6807_v8 = vpack.c.bf16 %v2566_v42, %v2564_v17  ;;  %v6825_v61 = vpack.c.bf16 %v2578_v25, %v2576_v16  ;;  %v2575_v17 = vld [vmem:[#allocation9 + $0x120] sm:$0xff]  ;;  %v2577_v42 = vld [vmem:[#allocation9 + $0x130] sm:$0xff] }
 0x63c   :  { %4995 = vmatprep.subr.bf16.mxu0 %v6561_v30  ;;  %v2563_v30 = vld [vmem:[#allocation9 + $0xc0] sm:$0xff]  ;;  %v2585_v25 = vld [vmem:[#allocation9 + $0x170] sm:$0xff] }
 0x63d   :  { %v2583_v16 = vld [vmem:[#allocation9 + $0x160] sm:$0xff] }
 0x63f   :  { %4997 = vmatpush1.bf16.msra.mxu0 %v6564_v21  ;;  %v2565_v21 = vld [vmem:[#allocation9 + $0xd0] sm:$0xff] }
 0x640   :  { %4999 = vmatprep.subr.bf16.mxu0 %v6567_v47  ;;  %v2570_v47 = vld [vmem:[#allocation9 + $0xf8] sm:$0xff] }
 0x643   :  { %5001 = vmatpush1.bf16.msra.mxu0 %v6570_v56  ;;  %v6810_v56 = vpack.c.bf16 %v2565_v21, %v2563_v30  ;;  %v2580_v30 = vld [vmem:[#allocation9 + $0x148] sm:$0xff]  ;;  %v2582_v21 = vld [vmem:[#allocation9 + $0x158] sm:$0xff] }
 0x644   :  { %5003 = vmatprep.subr.bf16.mxu0 %v6573_v20  ;;  %v6813_v20 = vpack.c.bf16 %v2570_v47, %v2568_v22  ;;  %v6828_v22 = vpack.c.bf16 %v2577_v42, %v2575_v17  ;;  %v6831_v47 = vpack.c.bf16 %v2582_v21, %v2580_v30  ;;  %v2588_v17 = vld [vmem:[#allocation9 + $0x188] sm:$0xff]  ;;  %v2590_v42 = vld [vmem:[#allocation9 + $0x198] sm:$0xff]  ;;  %v6840_v30 = vpack.c.bf16 %v2585_v25, %v2583_v16 }
 0x645   :  { %v6843_v21 = vpack.c.bf16 %v2590_v42, %v2588_v17  ;;  %v2596_v16 = vld [vmem:[#allocation9 + $0x1c8] sm:$0xff]  ;;  %v2598_v25 = vld [vmem:[#allocation9 + $0x1d8] sm:$0xff] }
 0x646   :  { %7366 = vst [vmem:[#allocation45_spill] sm:$0xff] %v6828_v22  ;;  %7367 = vst [vmem:[#allocation46_spill] sm:$0xff] %v6831_v47  ;;  %v6855_v42 = vpack.c.bf16 %v2598_v25, %v2596_v16  ;;  %v2462_v16 = vld [vmem:[#allocation12 + $0x1d0] sm:$0xff] }
 0x647   :  { %5005 = vmatpush1.bf16.msra.mxu0 %v6576_v18  ;;  %v2567_v18 = vld [vmem:[#allocation9 + $0xe0] sm:$0xff]  ;;  %7370 = vst [vmem:[#allocation49_spill] sm:$0xff] %v6840_v30  ;;  %7371 = vst [vmem:[#allocation50_spill] sm:$0xff] %v6843_v21 }
 0x648   :  { %5007 = vmatprep.subr.bf16.mxu0 %v6579_v60  ;;  %v2569_v60 = vld [vmem:[#allocation9 + $0xf0] sm:$0xff] }
 0x64b   :  { %5009 = vmatpush1.bf16.msra.mxu0 %v6582_v3  ;;  %v2574_v3 = vld [vmem:[#allocation9 + $0x118] sm:$0xff] }
 0x64c   :  { %5011 = vmatprep.subr.bf16.mxu0 %v6585_v13  ;;  %v6816_v13 = vpack.c.bf16 %v2569_v60, %v2567_v18  ;;  %v6819_v19 = vpack.c.bf16 %v2574_v3, %v2572_v62  ;;  %v2579_v18 = vld [vmem:[#allocation9 + $0x140] sm:$0xff]  ;;  %v2581_v60 = vld [vmem:[#allocation9 + $0x150] sm:$0xff]  ;;  %v2584_v62 = vld [vmem:[#allocation9 + $0x168] sm:$0xff] }
 0x64d   :  { %v2586_v3 = vld [vmem:[#allocation9 + $0x178] sm:$0xff] }
 0x64f   :  { %5013 = vmatpush1.bf16.msra.mxu0 %v6588_v2  ;;  %v2573_v2 = vld [vmem:[#allocation9 + $0x110] sm:$0xff] }
 0x650   :  { %5015 = vmatprep.subr.bf16.mxu0 %v6807_v8  ;;  %v6822_v32 = vpack.c.bf16 %v2573_v2, %v2571_v36  ;;  %v6834_v36 = vpack.c.bf16 %v2581_v60, %v2579_v18  ;;  %v6837_v2 = vpack.c.bf16 %v2586_v3, %v2584_v62  ;;  %v2592_v18 = vld [vmem:[#allocation9 + $0x1a8] sm:$0xff]  ;;  %v2594_v60 = vld [vmem:[#allocation9 + $0x1b8] sm:$0xff] }
 0x651   :  { %v6849_v3 = vpack.c.bf16 %v2594_v60, %v2592_v18 }
 0x652   :  { %7368 = vst [vmem:[#allocation47_spill] sm:$0xff] %v6834_v36  ;;  %7369 = vst [vmem:[#allocation48_spill] sm:$0xff] %v6837_v2 }
 0x653   :  { %5017 = vmatpush1.bf16.msra.mxu0 %v6810_v56 }
 0x654   :  { %5019 = vmatprep.subr.bf16.mxu0 %v6813_v20 }
 0x657   :  { %5021 = vmatpush1.bf16.msra.mxu0 %v6816_v13 }
 0x658   :  { %5023 = vmatprep.subr.bf16.mxu0 %v6819_v19 }
 0x65b   :  { %5025 = vmatpush1.bf16.msra.mxu0 %v6822_v32 }
 0x65c   :  { %5027 = vmatprep.subr.bf16.mxu0 %v6825_v61 }
 0x65f   :  { %5029 = vmatpush1.bf16.msra.mxu0 %v6828_v22  ;;  %v2589_v22 = vld [vmem:[#allocation9 + $0x190] sm:$0xff] }
 0x660   :  { %5031 = vmatprep.subr.bf16.mxu0 %v6831_v47  ;;  %v6846_v62 = vpack.c.bf16 %v2589_v22, %v2587_v7  ;;  %v2591_v47 = vld [vmem:[#allocation9 + $0x1a0] sm:$0xff]  ;;  %v2600_v7 = vld [vmem:[#allocation9 + $0x1e8] sm:$0xff]  ;;  %v2602_v22 = vld [vmem:[#allocation9 + $0x1f8] sm:$0xff] }
 0x661   :  { %v6861_v60 = vpack.c.bf16 %v2602_v22, %v2600_v7  ;;  %v2467_v7 = vld [vmem:[#allocation12 + $0x1f8] sm:$0xff]  ;;  %v2464_v22 = vld [vmem:[#allocation12 + $0x1e0] sm:$0xff] }
 0x662   :  { %7372 = vst [vmem:[#allocation51_spill] sm:$0xff] %v6846_v62 }
 0x663   :  { %5033 = vmatpush1.bf16.msra.mxu0 %v6834_v36  ;;  %v2593_v36 = vld [vmem:[#allocation9 + $0x1b0] sm:$0xff] }
 0x664   :  { %5035 = vmatprep.subr.bf16.mxu0 %v6837_v2  ;;  %v6852_v17 = vpack.c.bf16 %v2593_v36, %v2591_v47  ;;  %v2595_v2 = vld [vmem:[#allocation9 + $0x1c0] sm:$0xff]  ;;  %v7373_v36 = vrot.slane %v6792_v52, 4 }
 0x667   :  { %5037 = vmatpush1.bf16.msra.mxu0 %v6840_v30  ;;  %v2597_v30 = vld [vmem:[#allocation9 + $0x1d0] sm:$0xff] }
 0x668   :  { %5039 = vmatprep.subr.bf16.mxu0 %v6843_v21  ;;  %v6858_v18 = vpack.c.bf16 %v2597_v30, %v2595_v2  ;;  %v2599_v21 = vld [vmem:[#allocation9 + $0x1e0] sm:$0xff]  ;;  %v2455_v2 = vld [vmem:[#allocation12 + $0x198] sm:$0xff]  ;;  %v2454_v30 = vld [vmem:[#allocation12 + $0x190] sm:$0xff] }
 0x66b   :  { %5041 = vmatpush1.bf16.msra.mxu0 %v6846_v62  ;;  %v2601_v62 = vld [vmem:[#allocation9 + $0x1f0] sm:$0xff] }
 0x66c   :  { %5043 = vmatprep.subr.bf16.mxu0 %v6849_v3  ;;  %v6864_v47 = vpack.c.bf16 %v2601_v62, %v2599_v21  ;;  %v2463_v21 = vld [vmem:[#allocation12 + $0x1d8] sm:$0xff]  ;;  %v2460_v62 = vld [vmem:[#allocation12 + $0x1c0] sm:$0xff] }
 0x66d   :  { %v4984_v25 = vpack.c.bf16 %v2462_v16, %v2460_v62  ;;  %v7391_v62 = vld [vmem:[#allocation41_spill] sm:$0xff]  ;;  %v7392_v16 = vld [vmem:[#allocation42_spill] sm:$0xff] }
 0x66f   :  { %5045 = vmatpush1.bf16.msra.mxu0 %v6852_v17 }
 0x670   :  { %5047 = vmatprep.subr.bf16.mxu0 %v6855_v42 }
 0x673   :  { %5049 = vmatpush1.bf16.msra.mxu0 %v6858_v18 }
 0x674   :  { %5051 = vmatprep.subr.bf16.mxu0 %v6861_v60 }
 0x677   :  { %5053 = vmatpush1.bf16.msra.mxu0 %v6864_v47 }
 0x678   :  { %5119 = vmatprep.subr.bf16.mxu0 %v6637_v59  ;;  %v2453_v59 = vld [vmem:[#allocation12 + $0x188] sm:$0xff] }
 0x679   :  { %v4974_v52 = vpack.c.bf16 %v2455_v2, %v2453_v59  ;;  %v7374_v2 = vld [vmem:[#allocation24_spill] sm:$0xff] }
 0x67a   :  { %2668 = vmatmul.mubr.f32.vlgmr.msra.gmra.mrb[10].mxu0 %v7373_v36  ;;  %v2466_v36 = vld [vmem:[#allocation12 + $0x1f0] sm:$0xff] }
 0x67b   :  { %5121 = vmatpush1.bf16.msra.mxu0 %v6642_v58  ;;  %v2452_v58 = vld [vmem:[#allocation12 + $0x180] sm:$0xff]  ;;  %4975 = vmatprep.subr.bf16.mxu1 %v4974_v52  ;;  %v4988_v59 = vpack.c.bf16 %v2466_v36, %v2464_v22 }
 0x67c   :  { %5123 = vmatprep.subr.bf16.mxu0 %v6644_v4  ;;  %v4976_v4 = vpack.c.bf16 %v2454_v30, %v2452_v58  ;;  %v7376_v58 = vld [vmem:[#allocation26_spill] sm:$0xff]  ;;  %v7377_v30 = vld [vmem:[#allocation27_spill] sm:$0xff] }
 0x67e   :  { %4977 = vmatpush1.bf16.msra.mxu1 %v4976_v4 }
 0x67f   :  { %5125 = vmatpush1.bf16.msra.mxu0 %v6648_v31  ;;  %v2457_v31 = vld [vmem:[#allocation12 + $0x1a8] sm:$0xff] }
 0x680   :  { %5127 = vmatprep.subr.bf16.mxu0 %v6654_v45  ;;  %v2459_v45 = vld [vmem:[#allocation12 + $0x1b8] sm:$0xff] }
 0x683   :  { %5129 = vmatpush1.bf16.msra.mxu0 %v6660_v57  ;;  %v4978_v57 = vpack.c.bf16 %v2459_v45, %v2457_v31  ;;  %v7381_v31 = vld [vmem:[#allocation31_spill] sm:$0xff]  ;;  %v7382_v45 = vld [vmem:[#allocation32_spill] sm:$0xff] }
 0x684   :  { %5131 = vmatprep.subr.bf16.mxu0 %v6666_v44  ;;  %v2456_v44 = vld [vmem:[#allocation12 + $0x1a0] sm:$0xff] }
 0x685   :  { %4979 = vmatprep.subr.bf16.mxu1 %v4978_v57 }
 0x687   :  { %5133 = vmatpush1.bf16.msra.mxu0 %v6672_v63  ;;  %v2458_v63 = vld [vmem:[#allocation12 + $0x1b0] sm:$0xff] }
 0x688   :  { %5135 = vmatprep.subr.bf16.mxu0 %v6678_v27  ;;  %v4980_v27 = vpack.c.bf16 %v2458_v63, %v2456_v44  ;;  %v7385_v44 = vld [vmem:[#allocation35_spill] sm:$0xff]  ;;  %v7386_v63 = vld [vmem:[#allocation36_spill] sm:$0xff] }
 0x68a   :  { %4981 = vmatpush1.bf16.msra.mxu1 %v4980_v27 }
 0x68b   :  { %5137 = vmatpush1.bf16.msra.mxu0 %v6684_v14  ;;  %v2461_v14 = vld [vmem:[#allocation12 + $0x1c8] sm:$0xff] }
 0x68c   :  { %5139 = vmatprep.subr.bf16.mxu0 %v6690_v34  ;;  %v4982_v34 = vpack.c.bf16 %v2463_v21, %v2461_v14  ;;  %v7388_v14 = vld [vmem:[#allocation38_spill] sm:$0xff]  ;;  %v7389_v21 = vld [vmem:[#allocation39_spill] sm:$0xff] }
 0x68e   :  { %4983 = vmatprep.subr.bf16.mxu1 %v4982_v34 }
 0x68f   :  { %5141 = vmatpush1.bf16.msra.mxu0 %v6696_v10  ;;  %4985 = vmatpush1.bf16.msra.mxu1 %v4984_v25  ;;  %v2465_v10 = vld [vmem:[#allocation12 + $0x1e8] sm:$0xff] }
 0x690   :  { %5143 = vmatprep.subr.bf16.mxu0 %v6702_v33  ;;  %v4986_v33 = vpack.c.bf16 %v2467_v7, %v2465_v10  ;;  %v7394_v10 = vld [vmem:[#allocation44_spill] sm:$0xff] }
 0x692   :  { %4987 = vmatprep.subr.bf16.mxu1 %v4986_v33 }
 0x693   :  { %5145 = vmatpush1.bf16.msra.mxu0 %v6708_v0  ;;  %4989 = vmatpush1.bf16.msra.mxu1 %v4988_v59 }
 0x694   :  { %5147 = vmatprep.subr.bf16.mxu0 %v6714_v5  ;;  %5055 = vmatprep.subr.bf16.mxu1 %v6612_v11  ;;  %v2367_v11 = vld [vmem:[%s7187_s6] sm:$0x3] }
 0x695   :  { %v2372_v0 = vrot.slane %v2367_v11, %v6102_v9  ;;  %v2376_v5 = vrot.slane %v2367_v11, %v6108_v23 }
 0x697   :  { %5149 = vmatpush1.bf16.msra.mxu0 %v6720_v35 }
 0x698   :  { %5151 = vmatprep.subr.bf16.mxu0 %v6726_v48 }
 0x69b   :  { %5153 = vmatpush1.bf16.msra.mxu0 %v6732_v38 }
 0x69c   :  { %5155 = vmatprep.subr.bf16.mxu0 %v6738_v6 }
 0x69f   :  { %5157 = vmatpush1.bf16.msra.mxu0 %v6744_v12 }
 0x6a0   :  { %5159 = vmatprep.subr.bf16.mxu0 %v6750_v53 }
 0x6a3   :  { %5161 = vmatpush1.bf16.msra.mxu0 %v6756_v26 }
 0x6a4   :  { %5163 = vmatprep.subr.bf16.mxu0 %v6762_v28 }
 0x6a7   :  { %5165 = vmatpush1.bf16.msra.mxu0 %v6768_v1 }
 0x6a8   :  { %5167 = vmatprep.subr.bf16.mxu0 %v4974_v52  ;;  %v7375_v52 = vld [vmem:[#allocation25_spill] sm:$0xff] }
 0x6ab   :  { %5169 = vmatpush1.bf16.msra.mxu0 %v4976_v4  ;;  %v7378_v4 = vld [vmem:[#allocation28_spill] sm:$0xff] }
 0x6ac   :  { %5171 = vmatprep.subr.bf16.mxu0 %v4978_v57  ;;  %v7383_v57 = vld [vmem:[#allocation33_spill] sm:$0xff] }
 0x6af   :  { %5173 = vmatpush1.bf16.msra.mxu0 %v4980_v27  ;;  %v7387_v27 = vld [vmem:[#allocation37_spill] sm:$0xff] }
 0x6b0   :  { %5175 = vmatprep.subr.bf16.mxu0 %v4982_v34  ;;  %v7390_v34 = vld [vmem:[#allocation40_spill] sm:$0xff] }
 0x6b3   :  { %5177 = vmatpush1.bf16.msra.mxu0 %v4984_v25  ;;  %v7393_v25 = vld [vmem:[#allocation43_spill] sm:$0xff] }
 0x6b4   :  { %5179 = vmatprep.subr.bf16.mxu0 %v4986_v33 }
 0x6b7   :  { %5181 = vmatpush1.bf16.msra.mxu0 %v4988_v59 }
 0x70d   :  { %v2362_v35 = vpop.f32.mrb[8].mxu0 }
 0x70e   :  { %v2379_v48 = vadd.f32 %v2372_v0, %v2362_v35  ;;  %v2364_v38 = vpop.f32.mrb[9].mxu0  ;;  %v2998_v0 = vld [vmem:[#allocation9 + $0x8] sm:$0xff]  ;;  %v2999_v35 = vld [vmem:[#allocation9 + $0x10] sm:$0xff] }
 0x70f   :  { %v2380_v6 = vadd.f32 %v2376_v5, %v2364_v38  ;;  %v3000_v5 = vld [vmem:[#allocation9 + $0x18] sm:$0xff] }
 0x710   :  { %5629 = vtanh.f32 %v2379_v48  ;;  %v3004_v38 = vld [vmem:[#allocation9 + $0x38] sm:$0xff] }
 0x711   :  { %5631 = vtanh.f32 %v2380_v6 }
 0x71a   :  { %v5630_v12 = vpop.eup %5629 }
 0x71b   :  { %v5632_v53 = vpop.eup %5631 }
 0x71c   :  { %v2385_v26 = vcombine.low %v5630_v12, %v5632_v53  ;;  %2532 = vmatprep.mubr.f32.mxu1 %v5632_v53 }
 0x71d   :  { %2533 = vmatmul.mubr.f32.vlgmr.msra.gmra.mrb[10].mxu1 %v5630_v12 }
 0x71e   :  { %v2392_v28 = vrot.slane %v2385_v26, %v6126_v29  ;;  %5057 = vmatpush1.bf16.msra.mxu1 %v6620_v46  ;;  %v7379_v46 = vld [vmem:[#allocation29_spill] sm:$0xff]  ;;  %v3003_v26 = vld [vmem:[#allocation9 + $0x30] sm:$0xff] }
 0x71f   :  { %5059 = vmatprep.subr.bf16.mxu1 %v6622_v55  ;;  %v7380_v55 = vld [vmem:[#allocation30_spill] sm:$0xff] }
 0x720   :  { %v2399_v1 = vrot.slane %v2392_v28, %v6126_v29  ;;  %v3008_v28 = vld [vmem:[#allocation9 + $0x58] sm:$0xff] }
 0x722   :  { %2402 = vst.msk [vmem:[#allocation2 + $0x4] ss:$8 sm:$0x3] %vm6131_vm0, %v2399_v1  ;;  %5061 = vmatpush1.bf16.msra.mxu1 %v6626_v49  ;;  %v7384_v49 = vld [vmem:[#allocation34_spill] sm:$0xff] }
 0x723   :  { %5063 = vmatprep.subr.bf16.mxu1 %v7374_v2 }
 0x726   :  { %5065 = vmatpush1.bf16.msra.mxu1 %v7375_v52  ;;  %v3005_v52 = vld [vmem:[#allocation9 + $0x40] sm:$0xff] }
 0x727   :  { %5067 = vmatprep.subr.bf16.mxu1 %v7376_v58  ;;  %v3007_v58 = vld [vmem:[#allocation9 + $0x50] sm:$0xff] }
 0x72a   :  { %5069 = vmatpush1.bf16.msra.mxu1 %v7377_v30  ;;  %v3010_v30 = vld [vmem:[#allocation9 + $0x68] sm:$0xff] }
 0x72b   :  { %5071 = vmatprep.subr.bf16.mxu1 %v7378_v4  ;;  %v3012_v4 = vld [vmem:[#allocation9 + $0x78] sm:$0xff] }
 0x72e   :  { %5073 = vmatpush1.bf16.msra.mxu1 %v7379_v46  ;;  %v6954_v46 = vpack.c.bf16 %v3007_v58, %v3005_v52  ;;  %v3150_v58 = vld [vmem:[#allocation11 + $0x40] sm:$0xff] }
 0x72f   :  { %5075 = vmatprep.subr.bf16.mxu1 %v7380_v55  ;;  %v6957_v55 = vpack.c.bf16 %v3012_v4, %v3010_v30  ;;  %v3152_v30 = vld [vmem:[#allocation11 + $0x50] sm:$0xff] }
 0x732   :  { %5077 = vmatpush1.bf16.msra.mxu1 %v7381_v31  ;;  %v3009_v31 = vld [vmem:[#allocation9 + $0x60] sm:$0xff] }
 0x733   :  { %5079 = vmatprep.subr.bf16.mxu1 %v7382_v45  ;;  %v3011_v45 = vld [vmem:[#allocation9 + $0x70] sm:$0xff] }
 0x736   :  { %5081 = vmatpush1.bf16.msra.mxu1 %v7383_v57  ;;  %v3014_v57 = vld [vmem:[#allocation9 + $0x88] sm:$0xff] }
 0x737   :  { %5083 = vmatprep.subr.bf16.mxu1 %v7384_v49  ;;  %v3016_v49 = vld [vmem:[#allocation9 + $0x98] sm:$0xff] }
 0x73a   :  { %5085 = vmatpush1.bf16.msra.mxu1 %v7385_v44  ;;  %v6960_v44 = vpack.c.bf16 %v3011_v45, %v3009_v31  ;;  %v3155_v31 = vld [vmem:[#allocation11 + $0x68] sm:$0xff]  ;;  %v3157_v45 = vld [vmem:[#allocation11 + $0x78] sm:$0xff] }
 0x73b   :  { %5087 = vmatprep.subr.bf16.mxu1 %v7386_v63  ;;  %v6963_v63 = vpack.c.bf16 %v3016_v49, %v3014_v57  ;;  %v3154_v57 = vld [vmem:[#allocation11 + $0x60] sm:$0xff]  ;;  %v3156_v49 = vld [vmem:[#allocation11 + $0x70] sm:$0xff] }
 0x73e   :  { %5089 = vmatpush1.bf16.msra.mxu1 %v7387_v27  ;;  %v3013_v27 = vld [vmem:[#allocation9 + $0x80] sm:$0xff] }
 0x73f   :  { %5091 = vmatprep.subr.bf16.mxu1 %v7388_v14  ;;  %v3015_v14 = vld [vmem:[#allocation9 + $0x90] sm:$0xff] }
 0x742   :  { %5093 = vmatpush1.bf16.msra.mxu1 %v7389_v21  ;;  %v3018_v21 = vld [vmem:[#allocation9 + $0xa8] sm:$0xff] }
 0x743   :  { %5095 = vmatprep.subr.bf16.mxu1 %v7390_v34  ;;  %v3020_v34 = vld [vmem:[#allocation9 + $0xb8] sm:$0xff] }
 0x746   :  { %5097 = vmatpush1.bf16.msra.mxu1 %v7391_v62  ;;  %v6966_v62 = vpack.c.bf16 %v3015_v14, %v3013_v27  ;;  %v3321_v27 = vld [vmem:[#allocation12 + $0x8] sm:$0xff]  ;;  %v3323_v14 = vld [vmem:[#allocation12 + $0x18] sm:$0xff] }
 0x747   :  { %5099 = vmatprep.subr.bf16.mxu1 %v7392_v16  ;;  %v6969_v16 = vpack.c.bf16 %v3020_v34, %v3018_v21  ;;  %v3320_v21 = vld [vmem:[#allocation12] sm:$0xff]  ;;  %v7019_v34 = vpack.c.bf16 %v3152_v30, %v3150_v58  ;;  %v3334_v58 = vld [vmem:[#allocation12 + $0x70] sm:$0xff] }
 0x74a   :  { %5101 = vmatpush1.bf16.msra.mxu1 %v7393_v25  ;;  %v3017_v25 = vld [vmem:[#allocation9 + $0xa0] sm:$0xff] }
 0x74b   :  { %5103 = vmatprep.subr.bf16.mxu1 %v7394_v10  ;;  %v3019_v10 = vld [vmem:[#allocation9 + $0xb0] sm:$0xff] }
 0x74d   :  { %v2669_v7 = vpop.f32.mrb[10].mxu0 }
 0x74e   :  { %v2676_v33 = vrot.slane %v2669_v7, 3  ;;  %v2671_v22 = vpop.f32.mrb[11].mxu0  ;;  %5105 = vmatpush1.bf16.msra.mxu1 %v6759_v41  ;;  %v6936_v41 = vpack.c.bf16 %v3000_v5, %v2998_v0  ;;  %v6972_v7 = vpack.c.bf16 %v3019_v10, %v3017_v25  ;;  %v3144_v0 = vld [vmem:[#allocation11 + $0x10] sm:$0xff]  ;;  %v3147_v5 = vld [vmem:[#allocation11 + $0x28] sm:$0xff]  ;;  %v5310_v25 = vpack.c.bf16 %v3323_v14, %v3321_v27 }
 0x74f   :  { %v2677_v36 = vrot.slane %v2671_v22, 3  ;;  %5107 = vmatprep.subr.bf16.mxu1 %v6765_v37  ;;  %v2997_v37 = vld [vmem:[#allocation9] sm:$0xff]  ;;  %v7396_v22 = vld [vmem:[#allocation46_spill] sm:$0xff] }
 0x750   :  { %v2680_v59 = vadd.f32 %v6112_v40, %v2676_v33  ;;  %v6942_v12 = vpack.c.bf16 %v2999_v35, %v2997_v37  ;;  %v7395_v33 = vld [vmem:[#allocation45_spill] sm:$0xff]  ;;  %v3149_v37 = vld [vmem:[#allocation11 + $0x38] sm:$0xff]  ;;  %v3322_v10 = vld [vmem:[#allocation12 + $0x10] sm:$0xff] }
 0x751   :  { %v2681_v11 = vadd.f32 %v6114_v54, %v2677_v36  ;;  %v7397_v36 = vld [vmem:[#allocation47_spill] sm:$0xff] }
 0x752   :  { %5633 = vtanh.f32 %v2680_v59  ;;  %5109 = vmatpush1.bf16.msra.mxu1 %v6771_v15  ;;  %v3002_v15 = vld [vmem:[#allocation9 + $0x28] sm:$0xff]  ;;  %v7398_v59 = vld [vmem:[#allocation48_spill] sm:$0xff] }
 0x753   :  { %5635 = vtanh.f32 %v2681_v11  ;;  %5111 = vmatprep.subr.bf16.mxu1 %v6775_v50  ;;  %v6945_v53 = vpack.c.bf16 %v3004_v38, %v3002_v15  ;;  %v7006_v38 = vpack.c.bf16 %v3149_v37, %v3147_v5  ;;  %v3160_v5 = vld [vmem:[#allocation11 + $0x90] sm:$0xff]  ;;  %v3333_v37 = vld [vmem:[#allocation12 + $0x68] sm:$0xff] }
 0x756   :  { %5113 = vmatpush1.bf16.msra.mxu1 %v6781_v24 }
 0x757   :  { %5115 = vmatprep.subr.bf16.mxu1 %v6784_v43  ;;  %v3001_v43 = vld [vmem:[#allocation9 + $0x20] sm:$0xff] }
 0x758   :  { %v6948_v1 = vpack.c.bf16 %v3003_v26, %v3001_v43  ;;  %v3151_v43 = vld [vmem:[#allocation11 + $0x48] sm:$0xff]  ;;  %v3153_v26 = vld [vmem:[#allocation11 + $0x58] sm:$0xff] }
 0x759   :  { %v7013_v52 = vpack.c.bf16 %v3153_v26, %v3151_v43  ;;  %v3162_v43 = vld [vmem:[#allocation11 + $0xa0] sm:$0xff] }
 0x75a   :  { %5117 = vmatpush1.bf16.msra.mxu1 %v6787_v51  ;;  %v3006_v51 = vld [vmem:[#allocation9 + $0x48] sm:$0xff] }
 0x75b   :  { %5183 = vmatprep.subr.bf16.mxu1 %v6936_v41  ;;  %v6951_v2 = vpack.c.bf16 %v3008_v28, %v3006_v51 }
 0x75c   :  { %v6940_v48 = vpop.eup %5633 }
 0x75d   :  { %v5636_v6 = vpop.eup %5635  ;;  %v2750_v24 = vrot.slane %v6940_v48, 5 }
 0x75e   :  { %v2751_v50 = vrot.slane %v5636_v6, 5  ;;  %v3146_v6 = vld [vmem:[#allocation11 + $0x20] sm:$0xff] }
 0x760   :  { %2818 = vmatprep.mubr.f32.mxu1 %v2751_v50 }
 0x761   :  { %2819 = vmatmul.mubr.f32.vlgmr.msra.gmra.mrb[10].mxu1 %v2750_v24 }
 0x762   :  { %5185 = vmatpush1.bf16.msra.mxu1 %v6942_v12  ;;  %3125 = vmatprep.mubr.f32.mxu1 %v2751_v50  ;;  %v3148_v50 = vld [vmem:[#allocation11 + $0x30] sm:$0xff] }
 0x763   :  { %5187 = vmatprep.subr.bf16.mxu1 %v6945_v53  ;;  %v7010_v28 = vpack.c.bf16 %v3148_v50, %v3146_v6  ;;  %v3165_v6 = vld [vmem:[#allocation11 + $0xb8] sm:$0xff] }
 0x766   :  { %5189 = vmatpush1.bf16.msra.mxu1 %v6948_v1 }
 0x767   :  { %5191 = vmatprep.subr.bf16.mxu1 %v6951_v2 }
 0x76a   :  { %5193 = vmatpush1.bf16.msra.mxu1 %v6954_v46 }
 0x76b   :  { %5195 = vmatprep.subr.bf16.mxu1 %v6957_v55 }
 0x76e   :  { %5197 = vmatpush1.bf16.msra.mxu1 %v6960_v44 }
 0x76f   :  { %5199 = vmatprep.subr.bf16.mxu1 %v6963_v63 }
 0x772   :  { %5201 = vmatpush1.bf16.msra.mxu1 %v6966_v62 }
 0x773   :  { %5203 = vmatprep.subr.bf16.mxu1 %v6969_v16 }
 0x776   :  { %5205 = vmatpush1.bf16.msra.mxu1 %v6972_v7 }
 0x777   :  { %5207 = vmatprep.subr.bf16.mxu1 %v6807_v8  ;;  %v7399_v8 = vld [vmem:[#allocation49_spill] sm:$0xff] }
 0x77a   :  { %5209 = vmatpush1.bf16.msra.mxu1 %v6810_v56  ;;  %v7400_v56 = vld [vmem:[#allocation50_spill] sm:$0xff] }
 0x77b   :  { %5211 = vmatprep.subr.bf16.mxu1 %v6813_v20  ;;  %v7401_v20 = vld [vmem:[#allocation51_spill] sm:$0xff] }
 0x77e   :  { %5213 = vmatpush1.bf16.msra.mxu1 %v6816_v13  ;;  %v3143_v13 = vld [vmem:[#allocation11 + $0x8] sm:$0xff] }
 0x77f   :  { %5215 = vmatprep.subr.bf16.mxu1 %v6819_v19  ;;  %v3145_v19 = vld [vmem:[#allocation11 + $0x18] sm:$0xff] }
 0x782   :  { %5217 = vmatpush1.bf16.msra.mxu1 %v6822_v32  ;;  %v6996_v32 = vpack.c.bf16 %v3145_v19, %v3143_v13  ;;  %v3329_v13 = vld [vmem:[#allocation12 + $0x48] sm:$0xff] }
 0x783   :  { %5219 = vmatprep.subr.bf16.mxu1 %v6825_v61  ;;  %v2825_v61 = vld [vmem:[%s7187_s6] sm:$0x3] }
 0x784   :  { %5247 = vmatprep.subr.bf16.mxu0 %v6996_v32  ;;  %v3159_v19 = vld [vmem:[#allocation11 + $0x88] sm:$0xff] }
 0x786   :  { %5221 = vmatpush1.bf16.msra.mxu1 %v7395_v33  ;;  %v3325_v33 = vld [vmem:[#allocation12 + $0x28] sm:$0xff] }
 0x787   :  { %5223 = vmatprep.subr.bf16.mxu1 %v7396_v22  ;;  %v3327_v22 = vld [vmem:[#allocation12 + $0x38] sm:$0xff] }
 0x78a   :  { %5225 = vmatpush1.bf16.msra.mxu1 %v7397_v36  ;;  %v7022_v36 = vpack.c.bf16 %v3157_v45, %v3155_v31  ;;  %v3337_v31 = vld [vmem:[#allocation12 + $0x88] sm:$0xff]  ;;  %v3339_v45 = vld [vmem:[#allocation12 + $0x98] sm:$0xff] }
 0x78b   :  { %5227 = vmatprep.subr.bf16.mxu1 %v7398_v59  ;;  %v5312_v59 = vpack.c.bf16 %v3322_v10, %v3320_v21  ;;  %v3166_v21 = vld [vmem:[#allocation11 + $0xc0] sm:$0xff] }
 0x78c   :  { %v3336_v10 = vld [vmem:[#allocation12 + $0x80] sm:$0xff] }
 0x78e   :  { %5229 = vmatpush1.bf16.msra.mxu1 %v7399_v8  ;;  %v5314_v8 = vpack.c.bf16 %v3327_v22, %v3325_v33  ;;  %v3338_v33 = vld [vmem:[#allocation12 + $0x90] sm:$0xff] }
 0x78f   :  { %5231 = vmatprep.subr.bf16.mxu1 %v7400_v56  ;;  %v3324_v56 = vld [vmem:[#allocation12 + $0x20] sm:$0xff] }
 0x792   :  { %5233 = vmatpush1.bf16.msra.mxu1 %v7401_v20  ;;  %v3326_v20 = vld [vmem:[#allocation12 + $0x30] sm:$0xff] }
 0x793   :  { %5235 = vmatprep.subr.bf16.mxu1 %v6849_v3  ;;  %v2830_v3 = vrot.slane %v2825_v61, %v6102_v9 }
 0x796   :  { %5237 = vmatpush1.bf16.msra.mxu1 %v6852_v17  ;;  %v2834_v17 = vrot.slane %v2825_v61, %v6108_v23  ;;  %v3161_v61 = vld [vmem:[#allocation11 + $0x98] sm:$0xff] }
 0x797   :  { %5239 = vmatprep.subr.bf16.mxu1 %v6855_v42 }
 0x79a   :  { %5241 = vmatpush1.bf16.msra.mxu1 %v6858_v18 }
 0x79b   :  { %5243 = vmatprep.subr.bf16.mxu1 %v6861_v60 }
 0x79e   :  { %5245 = vmatpush1.bf16.msra.mxu1 %v6864_v47  ;;  %v3142_v47 = vld [vmem:[#allocation11] sm:$0xff] }
 0x79f   :  { %v7004_v48 = vpack.c.bf16 %v3144_v0, %v3142_v47  ;;  %5311 = vmatprep.subr.bf16.mxu1 %v5310_v25  ;;  %v3330_v47 = vld [vmem:[#allocation12 + $0x50] sm:$0xff]  ;;  %v7028_v0 = vpack.c.bf16 %v3161_v61, %v3159_v19  ;;  %v5326_v25 = vpack.c.bf16 %v3339_v45, %v3337_v31  ;;  %v5328_v19 = vpack.c.bf16 %v3338_v33, %v3336_v10  ;;  %v3349_v45 = vld [vmem:[#allocation12 + $0xe8] sm:$0xff]  ;;  %v3178_v10 = vld [vmem:[#allocation11 + $0x120] sm:$0xff] }
 0x7a0   :  { %v3176_v31 = vld [vmem:[#allocation11 + $0x110] sm:$0xff] }
 0x7a1   :  { %3126 = vmatmul.mubr.f32.vlgmr.msra.gmra.mrb[12].mxu1 %v2750_v24 }
 0x7a2   :  { %5313 = vmatpush1.bf16.msra.mxu1 %v5312_v59  ;;  %v3168_v59 = vld [vmem:[#allocation11 + $0xd0] sm:$0xff] }
 0x7a3   :  { %5315 = vmatprep.subr.bf16.mxu1 %v5314_v8  ;;  %v3341_v8 = vld [vmem:[#allocation12 + $0xa8] sm:$0xff]  ;;  %v7043_v61 = vpack.c.bf16 %v3168_v59, %v3166_v21  ;;  %v3348_v59 = vld [vmem:[#allocation12 + $0xe0] sm:$0xff] }
 0x834   :  { %v2820_v42 = vpop.f32.mrb[10].mxu1 }
 0x835   :  { %v2837_v18 = vadd.f32 %v2830_v3, %v2820_v42  ;;  %v2822_v60 = vpop.f32.mrb[11].mxu1  ;;  %v3331_v3 = vld [vmem:[#allocation12 + $0x58] sm:$0xff]  ;;  %v7025_v42 = vpack.c.bf16 %v3156_v49, %v3154_v57  ;;  %v3167_v57 = vld [vmem:[#allocation11 + $0xc8] sm:$0xff] }
 0x836   :  { %v2838_v11 = vadd.f32 %v2834_v17, %v2822_v60  ;;  %v5316_v17 = vpack.c.bf16 %v3326_v20, %v3324_v56  ;;  %v5318_v60 = vpack.c.bf16 %v3331_v3, %v3329_v13  ;;  %v3169_v49 = vld [vmem:[#allocation11 + $0xd8] sm:$0xff]  ;;  %v3171_v20 = vld [vmem:[#allocation11 + $0xe8] sm:$0xff]  ;;  %v3170_v3 = vld [vmem:[#allocation11 + $0xe0] sm:$0xff] }
 0x837   :  { %5637 = vtanh.f32 %v2837_v18  ;;  %v3158_v18 = vld [vmem:[#allocation11 + $0x80] sm:$0xff]  ;;  %v7040_v22 = vpack.c.bf16 %v3169_v49, %v3167_v57  ;;  %v3343_v56 = vld [vmem:[#allocation12 + $0xb8] sm:$0xff]  ;;  %v3179_v49 = vld [vmem:[#allocation11 + $0x128] sm:$0xff] }
 0x838   :  { %5639 = vtanh.f32 %v2838_v11  ;;  %v3328_v11 = vld [vmem:[#allocation12 + $0x40] sm:$0xff]  ;;  %5317 = vmatpush1.bf16.msra.mxu1 %v5316_v17  ;;  %v3173_v13 = vld [vmem:[#allocation11 + $0xf8] sm:$0xff]  ;;  %v5330_v17 = vpack.c.bf16 %v3343_v56, %v3341_v8  ;;  %v3350_v8 = vld [vmem:[#allocation12 + $0xf0] sm:$0xff] }
 0x839   :  { %v5320_v50 = vpack.c.bf16 %v3330_v47, %v3328_v11  ;;  %5319 = vmatprep.subr.bf16.mxu1 %v5318_v60  ;;  %v3342_v60 = vld [vmem:[#allocation12 + $0xb0] sm:$0xff]  ;;  %v7046_v11 = vpack.c.bf16 %v3173_v13, %v3171_v20  ;;  %v3351_v57 = vld [vmem:[#allocation12 + $0xf8] sm:$0xff]  ;;  %v3353_v13 = vld [vmem:[#allocation12 + $0x108] sm:$0xff] }
 0x83a   :  { %v3172_v47 = vld [vmem:[#allocation11 + $0xf0] sm:$0xff]  ;;  %v5338_v33 = vpack.c.bf16 %v3351_v57, %v3349_v45  ;;  %v3186_v57 = vld [vmem:[#allocation11 + $0x160] sm:$0xff] }
 0x83b   :  { %v3180_v20 = vld [vmem:[#allocation11 + $0x130] sm:$0xff] }
 0x83c   :  { %5321 = vmatpush1.bf16.msra.mxu1 %v5320_v50  ;;  %v7049_v50 = vpack.c.bf16 %v3172_v47, %v3170_v3  ;;  %v3183_v3 = vld [vmem:[#allocation11 + $0x148] sm:$0xff]  ;;  %v3182_v47 = vld [vmem:[#allocation11 + $0x140] sm:$0xff] }
 0x841   :  { %v5638_v35 = vpop.eup %5637 }
 0x842   :  { %v5640_v15 = vpop.eup %5639 }
 0x843   :  { %v2843_v24 = vcombine.low %v5638_v35, %v5640_v15  ;;  %2990 = vmatprep.mubr.f32.mxu0 %v5640_v15  ;;  %v3163_v15 = vld [vmem:[#allocation11 + $0xa8] sm:$0xff] }
 0x844   :  { %2991 = vmatmul.mubr.f32.vlgmr.msra.gmra.mrb[12].mxu0 %v5638_v35  ;;  %v3335_v35 = vld [vmem:[#allocation12 + $0x78] sm:$0xff]  ;;  %v7034_v30 = vpack.c.bf16 %v3165_v6, %v3163_v15 }
 0x845   :  { %v2850_v51 = vrot.slane %v2843_v24, %v6126_v29  ;;  %5249 = vmatpush1.bf16.msra.mxu0 %v7004_v48  ;;  %v7031_v24 = vpack.c.bf16 %v3160_v5, %v3158_v18  ;;  %v5322_v26 = vpack.c.bf16 %v3335_v35, %v3333_v37  ;;  %v3340_v18 = vld [vmem:[#allocation12 + $0xa0] sm:$0xff]  ;;  %v3345_v5 = vld [vmem:[#allocation12 + $0xc8] sm:$0xff]  ;;  %v3347_v37 = vld [vmem:[#allocation12 + $0xd8] sm:$0xff] }
 0x846   :  { %5251 = vmatprep.subr.bf16.mxu0 %v7006_v38  ;;  %v3175_v35 = vld [vmem:[#allocation11 + $0x108] sm:$0xff]  ;;  %v3177_v15 = vld [vmem:[#allocation11 + $0x118] sm:$0xff]  ;;  %v5332_v6 = vpack.c.bf16 %v3342_v60, %v3340_v18  ;;  %v5340_v18 = vpack.c.bf16 %v3350_v8, %v3348_v59  ;;  %v7061_v60 = vpack.c.bf16 %v3180_v20, %v3178_v10 }
 0x847   :  { %v2857_v4 = vrot.slane %v2850_v51, %v6126_v29  ;;  %v3332_v51 = vld [vmem:[#allocation12 + $0x60] sm:$0xff]  ;;  %5323 = vmatprep.subr.bf16.mxu1 %v5322_v26  ;;  %v5334_v26 = vpack.c.bf16 %v3347_v37, %v3345_v5  ;;  %v3361_v59 = vld [vmem:[#allocation12 + $0x148] sm:$0xff]  ;;  %v3363_v8 = vld [vmem:[#allocation12 + $0x158] sm:$0xff] }
 0x848   :  { %v5324_v27 = vpack.c.bf16 %v3334_v58, %v3332_v51  ;;  %v3344_v51 = vld [vmem:[#allocation12 + $0xc0] sm:$0xff]  ;;  %v3346_v58 = vld [vmem:[#allocation12 + $0xd0] sm:$0xff]  ;;  %v3191_v20 = vld [vmem:[#allocation11 + $0x188] sm:$0xff] }
 0x849   :  { %2860 = vst.msk [vmem:[#allocation2 + $0x5] ss:$8 sm:$0x3] %vm6131_vm0, %v2857_v4  ;;  %5253 = vmatpush1.bf16.msra.mxu0 %v7010_v28  ;;  %v3164_v4 = vld [vmem:[#allocation11 + $0xb0] sm:$0xff]  ;;  %v5336_v21 = vpack.c.bf16 %v3346_v58, %v3344_v51  ;;  %v3352_v37 = vld [vmem:[#allocation12 + $0x100] sm:$0xff]  ;;  %v3187_v51 = vld [vmem:[#allocation11 + $0x168] sm:$0xff] }
 0x84a   :  { %5255 = vmatprep.subr.bf16.mxu0 %v7013_v52  ;;  %v7037_v14 = vpack.c.bf16 %v3164_v4, %v3162_v43  ;;  %5325 = vmatpush1.bf16.msra.mxu1 %v5324_v27  ;;  %v3174_v43 = vld [vmem:[#allocation11 + $0x100] sm:$0xff]  ;;  %v7052_v4 = vpack.c.bf16 %v3177_v15, %v3175_v35  ;;  %v3181_v27 = vld [vmem:[#allocation11 + $0x138] sm:$0xff]  ;;  %v3354_v35 = vld [vmem:[#allocation12 + $0x110] sm:$0xff] }
 0x84b   :  { %5327 = vmatprep.subr.bf16.mxu1 %v5326_v25  ;;  %v7055_v25 = vpack.c.bf16 %v3176_v31, %v3174_v43  ;;  %v7058_v56 = vpack.c.bf16 %v3181_v27, %v3179_v49  ;;  %v3357_v43 = vld [vmem:[#allocation12 + $0x128] sm:$0xff]  ;;  %v3189_v58 = vld [vmem:[#allocation11 + $0x178] sm:$0xff]  ;;  %v5344_v31 = vpack.c.bf16 %v3354_v35, %v3352_v37  ;;  %v3356_v27 = vld [vmem:[#allocation12 + $0x120] sm:$0xff] }
 0x84c   :  { %v7070_v10 = vpack.c.bf16 %v3189_v58, %v3187_v51  ;;  %v3192_v35 = vld [vmem:[#allocation11 + $0x190] sm:$0xff]  ;;  %v3197_v51 = vld [vmem:[#allocation11 + $0x1b8] sm:$0xff] }
 0x84d   :  { %5257 = vmatpush1.bf16.msra.mxu0 %v7019_v34 }
 0x84e   :  { %5259 = vmatprep.subr.bf16.mxu0 %v7022_v36  ;;  %5329 = vmatpush1.bf16.msra.mxu1 %v5328_v19  ;;  %v3355_v19 = vld [vmem:[#allocation12 + $0x118] sm:$0xff] }
 0x84f   :  { %5331 = vmatprep.subr.bf16.mxu1 %v5330_v17  ;;  %v3185_v17 = vld [vmem:[#allocation11 + $0x158] sm:$0xff]  ;;  %v5342_v5 = vpack.c.bf16 %v3355_v19, %v3353_v13 }
 0x850   :  { %v7064_v15 = vpack.c.bf16 %v3185_v17, %v3183_v3  ;;  %v3193_v13 = vld [vmem:[#allocation11 + $0x198] sm:$0xff]  ;;  %v3190_v17 = vld [vmem:[#allocation11 + $0x180] sm:$0xff] }
 0x851   :  { %5261 = vmatpush1.bf16.msra.mxu0 %v7025_v42  ;;  %v7076_v37 = vpack.c.bf16 %v3193_v13, %v3191_v20  ;;  %v3201_v20 = vld [vmem:[#allocation11 + $0x1d8] sm:$0xff] }
 0x852   :  { %5263 = vmatprep.subr.bf16.mxu0 %v7028_v0  ;;  %5333 = vmatpush1.bf16.msra.mxu1 %v5332_v6  ;;  %v3184_v6 = vld [vmem:[#allocation11 + $0x150] sm:$0xff] }
 0x853   :  { %5335 = vmatprep.subr.bf16.mxu1 %v5334_v26  ;;  %v3359_v26 = vld [vmem:[#allocation12 + $0x138] sm:$0xff]  ;;  %v7067_v45 = vpack.c.bf16 %v3184_v6, %v3182_v47  ;;  %v3360_v47 = vld [vmem:[#allocation12 + $0x140] sm:$0xff]  ;;  %7402 = vst [vmem:[#allocation24_spill] sm:$0xff] %v7076_v37  ;;  %v3365_v6 = vld [vmem:[#allocation12 + $0x168] sm:$0xff] }
 0x854   :  { %v5346_v49 = vpack.c.bf16 %v3359_v26, %v3357_v43  ;;  %v3367_v43 = vld [vmem:[#allocation12 + $0x178] sm:$0xff]  ;;  %v3195_v26 = vld [vmem:[#allocation11 + $0x1a8] sm:$0xff] }
 0x855   :  { %5265 = vmatpush1.bf16.msra.mxu0 %v7031_v24 }
 0x856   :  { %5267 = vmatprep.subr.bf16.mxu0 %v7034_v30  ;;  %5337 = vmatpush1.bf16.msra.mxu1 %v5336_v21  ;;  %v3358_v21 = vld [vmem:[#allocation12 + $0x130] sm:$0xff] }
 0x857   :  { %5339 = vmatprep.subr.bf16.mxu1 %v5338_v33  ;;  %v3188_v33 = vld [vmem:[#allocation11 + $0x170] sm:$0xff]  ;;  %v5348_v19 = vpack.c.bf16 %v3358_v21, %v3356_v27  ;;  %v7082_v21 = vpack.c.bf16 %v3197_v51, %v3195_v26  ;;  %v3203_v51 = vld [vmem:[#allocation11 + $0x1e8] sm:$0xff] }
 0x858   :  { %v7073_v3 = vpack.c.bf16 %v3188_v33, %v3186_v57  ;;  %v5354_v57 = vpack.c.bf16 %v3367_v43, %v3365_v6  ;;  %v3366_v27 = vld [vmem:[#allocation12 + $0x170] sm:$0xff]  ;;  %v3194_v33 = vld [vmem:[#allocation11 + $0x1a0] sm:$0xff] }
 0x859   :  { %5269 = vmatpush1.bf16.msra.mxu0 %v7037_v14  ;;  %v3198_v6 = vld [vmem:[#allocation11 + $0x1c0] sm:$0xff]  ;;  %v3200_v43 = vld [vmem:[#allocation11 + $0x1d0] sm:$0xff] }
 0x85a   :  { %5271 = vmatprep.subr.bf16.mxu0 %v7040_v22  ;;  %5341 = vmatpush1.bf16.msra.mxu1 %v5340_v18  ;;  %v5350_v18 = vpack.c.bf16 %v3363_v8, %v3361_v59  ;;  %v3196_v59 = vld [vmem:[#allocation11 + $0x1b0] sm:$0xff]  ;;  %v3199_v8 = vld [vmem:[#allocation11 + $0x1c8] sm:$0xff] }
 0x85b   :  { %5343 = vmatprep.subr.bf16.mxu1 %v5342_v5  ;;  %v3362_v5 = vld [vmem:[#allocation12 + $0x150] sm:$0xff] }
 0x85c   :  { %v5352_v58 = vpack.c.bf16 %v3362_v5, %v3360_v47 }
 0x85d   :  { %5273 = vmatpush1.bf16.msra.mxu0 %v7043_v61 }
 0x85e   :  { %5275 = vmatprep.subr.bf16.mxu0 %v7046_v11  ;;  %5345 = vmatpush1.bf16.msra.mxu1 %v5344_v31  ;;  %v7079_v31 = vpack.c.bf16 %v3192_v35, %v3190_v17  ;;  %v7085_v17 = vpack.c.bf16 %v3196_v59, %v3194_v33  ;;  %v7088_v35 = vpack.c.bf16 %v3201_v20, %v3199_v8  ;;  %v3204_v33 = vld [vmem:[#allocation11 + $0x1f0] sm:$0xff] }
 0x85f   :  { %5347 = vmatprep.subr.bf16.mxu1 %v5346_v49  ;;  %v3364_v49 = vld [vmem:[#allocation12 + $0x160] sm:$0xff] }
 0x861   :  { %5277 = vmatpush1.bf16.msra.mxu0 %v7049_v50 }
 0x862   :  { %5279 = vmatprep.subr.bf16.mxu0 %v7052_v4  ;;  %5349 = vmatpush1.bf16.msra.mxu1 %v5348_v19  ;;  %v5356_v19 = vpack.c.bf16 %v3366_v27, %v3364_v49  ;;  %v7093_v49 = vpack.c.bf16 %v3200_v43, %v3198_v6  ;;  %v3202_v27 = vld [vmem:[#allocation11 + $0x1e0] sm:$0xff] }
 0x863   :  { %5351 = vmatprep.subr.bf16.mxu1 %v5350_v18  ;;  %v7099_v59 = vpack.c.bf16 %v3204_v33, %v3202_v27  ;;  %v3487_v43 = vld [vmem:[#allocation9 + $0x100] sm:$0xff]  ;;  %v3493_v33 = vld [vmem:[#allocation9 + $0x130] sm:$0xff] }
 0x865   :  { %5281 = vmatpush1.bf16.msra.mxu0 %v7055_v25 }
 0x866   :  { %5283 = vmatprep.subr.bf16.mxu0 %v7058_v56  ;;  %5353 = vmatpush1.bf16.msra.mxu1 %v5352_v58 }
 0x867   :  { %5355 = vmatprep.subr.bf16.mxu1 %v5354_v57 }
 0x869   :  { %5285 = vmatpush1.bf16.msra.mxu0 %v7061_v60 }
 0x86a   :  { %5287 = vmatprep.subr.bf16.mxu0 %v7064_v15  ;;  %5357 = vmatpush1.bf16.msra.mxu1 %v5356_v19 }
 0x86d   :  { %5289 = vmatpush1.bf16.msra.mxu0 %v7067_v45 }
 0x86e   :  { %5291 = vmatprep.subr.bf16.mxu0 %v7070_v10 }
 0x871   :  { %5293 = vmatpush1.bf16.msra.mxu0 %v7073_v3 }
 0x872   :  { %5295 = vmatprep.subr.bf16.mxu0 %v7076_v37  ;;  %v3205_v37 = vld [vmem:[#allocation11 + $0x1f8] sm:$0xff] }
 0x873   :  { %v7096_v57 = vpack.c.bf16 %v3205_v37, %v3203_v51  ;;  %v3482_v37 = vld [vmem:[#allocation9 + $0xd8] sm:$0xff] }
 0x874   :  { %v3127_v13 = vpop.f32.mrb[12].mxu1  ;;  %v3494_v51 = vld [vmem:[#allocation9 + $0x138] sm:$0xff] }
 0x875   :  { %v3134_v47 = vrot.slane %v3127_v13, 2  ;;  %v3129_v5 = vpop.f32.mrb[13].mxu1  ;;  %5297 = vmatpush1.bf16.msra.mxu0 %v7079_v31 }
 0x876   :  { %v3135_v18 = vrot.slane %v3129_v5, 2  ;;  %5299 = vmatprep.subr.bf16.mxu0 %v7082_v21  ;;  %v3486_v5 = vld [vmem:[#allocation9 + $0xf8] sm:$0xff] }
 0x877   :  { %v3138_v26 = vadd.f32 %v6112_v40, %v3134_v47  ;;  %v3481_v47 = vld [vmem:[#allocation9 + $0xd0] sm:$0xff] }
 0x878   :  { %v3139_v58 = vadd.f32 %v6114_v54, %v3135_v18  ;;  %v3488_v18 = vld [vmem:[#allocation9 + $0x108] sm:$0xff] }
 0x879   :  { %5641 = vtanh.f32 %v3138_v26  ;;  %5301 = vmatpush1.bf16.msra.mxu0 %v7085_v17  ;;  %v3492_v26 = vld [vmem:[#allocation9 + $0x128] sm:$0xff] }
 0x87a   :  { %5643 = vtanh.f32 %v3139_v58  ;;  %5303 = vmatprep.subr.bf16.mxu0 %v7088_v35  ;;  %v5410_v27 = vpack.c.bf16 %v3494_v51, %v3492_v26  ;;  %v3510_v26 = vld [vmem:[#allocation9 + $0x1b8] sm:$0xff] }
 0x87d   :  { %5305 = vmatpush1.bf16.msra.mxu0 %v7093_v49 }
 0x87e   :  { %5307 = vmatprep.subr.bf16.mxu0 %v7096_v57 }
 0x881   :  { %5309 = vmatpush1.bf16.msra.mxu0 %v7099_v59 }
 0x882   :  { %5375 = vmatprep.subr.bf16.mxu0 %v6936_v41  ;;  %v3480_v41 = vld [vmem:[#allocation9 + $0xc8] sm:$0xff] }
 0x883   :  { %v7104_v8 = vpop.eup %5641 }
 0x884   :  { %v5644_v20 = vpop.eup %5643  ;;  %v3208_v19 = vrot.slane %v7104_v8, 6 }
 0x885   :  { %v3209_v13 = vrot.slane %v5644_v20, 6  ;;  %v3496_v20 = vld [vmem:[#allocation9 + $0x148] sm:$0xff] }
 0x887   :  { %3276 = vmatprep.mubr.f32.mxu0 %v3209_v13 }
 0x888   :  { %3277 = vmatmul.mubr.f32.vlgmr.msra.gmra.mrb[12].mxu0 %v3208_v19 }
 0x889   :  { %5377 = vmatpush1.bf16.msra.mxu0 %v6942_v12  ;;  %3583 = vmatprep.mubr.f32.mxu0 %v3209_v13  ;;  %v5398_v12 = vpack.c.bf16 %v3482_v37, %v3480_v41  ;;  %v3498_v13 = vld [vmem:[#allocation9 + $0x158] sm:$0xff] }
 0x88a   :  { %5379 = vmatprep.subr.bf16.mxu0 %v6945_v53  ;;  %v3479_v53 = vld [vmem:[#allocation9 + $0xc0] sm:$0xff]  ;;  %v5414_v37 = vpack.c.bf16 %v3498_v13, %v3496_v20  ;;  %v3514_v20 = vld [vmem:[#allocation9 + $0x1d8] sm:$0xff] }
 0x88d   :  { %5381 = vmatpush1.bf16.msra.mxu0 %v6948_v1  ;;  %v3484_v1 = vld [vmem:[#allocation9 + $0xe8] sm:$0xff] }
 0x88e   :  { %5383 = vmatprep.subr.bf16.mxu0 %v6951_v2  ;;  %v5400_v2 = vpack.c.bf16 %v3481_v47, %v3479_v53  ;;  %v3497_v53 = vld [vmem:[#allocation9 + $0x150] sm:$0xff]  ;;  %v3500_v47 = vld [vmem:[#allocation9 + $0x168] sm:$0xff] }
 0x891   :  { %5385 = vmatpush1.bf16.msra.mxu0 %v6954_v46  ;;  %v5402_v46 = vpack.c.bf16 %v3486_v5, %v3484_v1  ;;  %v3502_v1 = vld [vmem:[#allocation9 + $0x178] sm:$0xff] }
 0x892   :  { %5387 = vmatprep.subr.bf16.mxu0 %v6957_v55  ;;  %v3483_v55 = vld [vmem:[#allocation9 + $0xe0] sm:$0xff] }
 0x895   :  { %5389 = vmatpush1.bf16.msra.mxu0 %v6960_v44  ;;  %v3485_v44 = vld [vmem:[#allocation9 + $0xf0] sm:$0xff] }
 0x896   :  { %5391 = vmatprep.subr.bf16.mxu0 %v6963_v63  ;;  %v3490_v63 = vld [vmem:[#allocation9 + $0x118] sm:$0xff]  ;;  %v5404_v6 = vpack.c.bf16 %v3485_v44, %v3483_v55  ;;  %v3501_v55 = vld [vmem:[#allocation9 + $0x170] sm:$0xff]  ;;  %v3504_v44 = vld [vmem:[#allocation9 + $0x188] sm:$0xff] }
 0x899   :  { %5393 = vmatpush1.bf16.msra.mxu0 %v6966_v62  ;;  %v5406_v62 = vpack.c.bf16 %v3490_v63, %v3488_v18  ;;  %v3506_v18 = vld [vmem:[#allocation9 + $0x198] sm:$0xff] }
 0x89a   :  { %5395 = vmatprep.subr.bf16.mxu0 %v6969_v16  ;;  %v3489_v16 = vld [vmem:[#allocation9 + $0x110] sm:$0xff] }
 0x89b   :  { %v5408_v58 = vpack.c.bf16 %v3489_v16, %v3487_v43  ;;  %v3505_v43 = vld [vmem:[#allocation9 + $0x190] sm:$0xff]  ;;  %v3508_v16 = vld [vmem:[#allocation9 + $0x1a8] sm:$0xff] }
 0x89d   :  { %5397 = vmatpush1.bf16.msra.mxu0 %v6972_v7  ;;  %v3491_v7 = vld [vmem:[#allocation9 + $0x120] sm:$0xff] }
 0x89e   :  { %5399 = vmatprep.subr.bf16.mxu0 %v5398_v12  ;;  %v5412_v41 = vpack.c.bf16 %v3493_v33, %v3491_v7  ;;  %v3495_v12 = vld [vmem:[#allocation9 + $0x140] sm:$0xff]  ;;  %v3509_v7 = vld [vmem:[#allocation9 + $0x1b0] sm:$0xff]  ;;  %v3512_v33 = vld [vmem:[#allocation9 + $0x1c8] sm:$0xff] }
 0x89f   :  { %v5416_v5 = vpack.c.bf16 %v3497_v53, %v3495_v12  ;;  %v3513_v12 = vld [vmem:[#allocation9 + $0x1d0] sm:$0xff]  ;;  %v3516_v53 = vld [vmem:[#allocation9 + $0x1e8] sm:$0xff] }
 0x8a1   :  { %5401 = vmatpush1.bf16.msra.mxu0 %v5400_v2  ;;  %v5418_v2 = vpack.c.bf16 %v3502_v1, %v3500_v47  ;;  %v3518_v47 = vld [vmem:[#allocation9 + $0x1f8] sm:$0xff] }
 0x8a2   :  { %5403 = vmatprep.subr.bf16.mxu0 %v5402_v46  ;;  %v3499_v46 = vld [vmem:[#allocation9 + $0x160] sm:$0xff] }
 0x8a3   :  { %v5420_v63 = vpack.c.bf16 %v3501_v55, %v3499_v46  ;;  %v3517_v46 = vld [vmem:[#allocation9 + $0x1f0] sm:$0xff] }
 0x8a5   :  { %5405 = vmatpush1.bf16.msra.mxu0 %v5404_v6  ;;  %v5422_v6 = vpack.c.bf16 %v3506_v18, %v3504_v44  ;;  %v3369_v44 = vld [vmem:[#allocation12 + $0x188] sm:$0xff]  ;;  %v3371_v18 = vld [vmem:[#allocation12 + $0x198] sm:$0xff] }
 0x8a6   :  { %5407 = vmatprep.subr.bf16.mxu0 %v5406_v62  ;;  %v3503_v62 = vld [vmem:[#allocation9 + $0x180] sm:$0xff] }
 0x8a7   :  { %v5424_v51 = vpack.c.bf16 %v3505_v43, %v3503_v62  ;;  %v3370_v62 = vld [vmem:[#allocation12 + $0x190] sm:$0xff] }
 0x8a9   :  { %5409 = vmatpush1.bf16.msra.mxu0 %v5408_v58  ;;  %v5426_v58 = vpack.c.bf16 %v3510_v26, %v3508_v16  ;;  %v3373_v16 = vld [vmem:[#allocation12 + $0x1a8] sm:$0xff]  ;;  %v3375_v26 = vld [vmem:[#allocation12 + $0x1b8] sm:$0xff] }
 0x8aa   :  { %5411 = vmatprep.subr.bf16.mxu0 %v5410_v27  ;;  %v3507_v27 = vld [vmem:[#allocation9 + $0x1a0] sm:$0xff] }
 0x8ab   :  { %v5428_v13 = vpack.c.bf16 %v3509_v7, %v3507_v27  ;;  %v3374_v27 = vld [vmem:[#allocation12 + $0x1b0] sm:$0xff] }
 0x8ad   :  { %5413 = vmatpush1.bf16.msra.mxu0 %v5412_v41  ;;  %v5430_v41 = vpack.c.bf16 %v3514_v20, %v3512_v33  ;;  %v3377_v33 = vld [vmem:[#allocation12 + $0x1c8] sm:$0xff]  ;;  %v3379_v20 = vld [vmem:[#allocation12 + $0x1d8] sm:$0xff] }
 0x8ae   :  { %5415 = vmatprep.subr.bf16.mxu0 %v5414_v37  ;;  %v3511_v37 = vld [vmem:[#allocation9 + $0x1c0] sm:$0xff]  ;;  %v5366_v8 = vpack.c.bf16 %v3379_v20, %v3377_v33 }
 0x8af   :  { %v5432_v1 = vpack.c.bf16 %v3513_v12, %v3511_v37  ;;  %v3381_v37 = vld [vmem:[#allocation12 + $0x1e8] sm:$0xff]  ;;  %v3383_v12 = vld [vmem:[#allocation12 + $0x1f8] sm:$0xff] }
 0x8b1   :  { %5417 = vmatpush1.bf16.msra.mxu0 %v5416_v5  ;;  %v5434_v5 = vpack.c.bf16 %v3518_v47, %v3516_v53  ;;  %v5370_v53 = vpack.c.bf16 %v3383_v12, %v3381_v37  ;;  %v3380_v47 = vld [vmem:[#allocation12 + $0x1e0] sm:$0xff] }
 0x8b2   :  { %5419 = vmatprep.subr.bf16.mxu0 %v5418_v2  ;;  %v3515_v2 = vld [vmem:[#allocation9 + $0x1e0] sm:$0xff] }
 0x8b3   :  { %v5436_v55 = vpack.c.bf16 %v3517_v46, %v3515_v2  ;;  %v3283_v2 = vld [vmem:[%s7187_s6] sm:$0x3] }
 0x8b4   :  { %v3288_v46 = vrot.slane %v3283_v2, %v6102_v9 }
 0x8b5   :  { %5421 = vmatpush1.bf16.msra.mxu0 %v5420_v63  ;;  %v5358_v63 = vpack.c.bf16 %v3371_v18, %v3369_v44 }
 0x8b6   :  { %5423 = vmatprep.subr.bf16.mxu0 %v5422_v6  ;;  %v3368_v6 = vld [vmem:[#allocation12 + $0x180] sm:$0xff] }
 0x8b7   :  { %v5360_v43 = vpack.c.bf16 %v3370_v62, %v3368_v6  ;;  %5359 = vmatprep.subr.bf16.mxu1 %v5358_v63 }
 0x8b9   :  { %5425 = vmatpush1.bf16.msra.mxu0 %v5424_v51  ;;  %5361 = vmatpush1.bf16.msra.mxu1 %v5360_v43  ;;  %v5362_v51 = vpack.c.bf16 %v3375_v26, %v3373_v16 }
 0x8ba   :  { %5427 = vmatprep.subr.bf16.mxu0 %v5426_v58  ;;  %v3372_v58 = vld [vmem:[#allocation12 + $0x1a0] sm:$0xff] }
 0x8bb   :  { %v5364_v7 = vpack.c.bf16 %v3374_v27, %v3372_v58  ;;  %5363 = vmatprep.subr.bf16.mxu1 %v5362_v51 }
 0x8bd   :  { %5429 = vmatpush1.bf16.msra.mxu0 %v5428_v13  ;;  %5365 = vmatpush1.bf16.msra.mxu1 %v5364_v7  ;;  %v3378_v13 = vld [vmem:[#allocation12 + $0x1d0] sm:$0xff] }
 0x8be   :  { %5431 = vmatprep.subr.bf16.mxu0 %v5430_v41  ;;  %5367 = vmatprep.subr.bf16.mxu1 %v5366_v8 }
 0x8c1   :  { %5433 = vmatpush1.bf16.msra.mxu0 %v5432_v1  ;;  %v3382_v1 = vld [vmem:[#allocation12 + $0x1f0] sm:$0xff] }
 0x8c2   :  { %5435 = vmatprep.subr.bf16.mxu0 %v5434_v5  ;;  %v5372_v5 = vpack.c.bf16 %v3382_v1, %v3380_v47 }
 0x8c5   :  { %5437 = vmatpush1.bf16.msra.mxu0 %v5436_v55  ;;  %v3292_v55 = vrot.slane %v3283_v2, %v6108_v23 }
 0x8c8   :  { %3584 = vmatmul.mubr.f32.vlgmr.msra.gmra.mrb[14].mxu0 %v3208_v19  ;;  %v3376_v19 = vld [vmem:[#allocation12 + $0x1c0] sm:$0xff] }
 0x8c9   :  { %v5368_v41 = vpack.c.bf16 %v3378_v13, %v3376_v19 }
 0x8cb   :  { %5369 = vmatpush1.bf16.msra.mxu1 %v5368_v41 }
 0x8cc   :  { %5371 = vmatprep.subr.bf16.mxu1 %v5370_v53 }
 0x8cf   :  { %5373 = vmatpush1.bf16.msra.mxu1 %v5372_v5 }
 0x8d0   :  { %5439 = vmatprep.subr.bf16.mxu1 %v6996_v32 }
 0x95b   :  { %v3278_v44 = vpop.f32.mrb[12].mxu0 }
 0x95c   :  { %v3295_v18 = vadd.f32 %v3288_v46, %v3278_v44  ;;  %v3280_v63 = vpop.f32.mrb[13].mxu0 }
 0x95d   :  { %v3296_v6 = vadd.f32 %v3292_v55, %v3280_v63 }
 0x95e   :  { %5645 = vtanh.f32 %v3295_v18 }
 0x95f   :  { %5647 = vtanh.f32 %v3296_v6 }
 0x968   :  { %v5646_v62 = vpop.eup %5645 }
 0x969   :  { %v5648_v43 = vpop.eup %5647 }
 0x96a   :  { %v3301_v16 = vcombine.low %v5646_v62, %v5648_v43  ;;  %3448 = vmatprep.mubr.f32.mxu1 %v5648_v43 }
 0x96b   :  { %3449 = vmatmul.mubr.f32.vlgmr.msra.gmra.mrb[14].mxu1 %v5646_v62 }
 0x96c   :  { %v3308_v32 = vrot.slane %v3301_v16, %v6126_v29  ;;  %5441 = vmatpush1.bf16.msra.mxu1 %v7004_v48  ;;  %v7403_v48 = vld [vmem:[#allocation24_spill] sm:$0xff] }
 0x96d   :  { %5443 = vmatprep.subr.bf16.mxu1 %v7006_v38 }
 0x96e   :  { %v3315_v26 = vrot.slane %v3308_v32, %v6126_v29 }
 0x970   :  { %3318 = vst.msk [vmem:[#allocation2 + $0x6] ss:$8 sm:$0x3] %vm6131_vm0, %v3315_v26  ;;  %5445 = vmatpush1.bf16.msra.mxu1 %v7010_v28 }
 0x971   :  { %5447 = vmatprep.subr.bf16.mxu1 %v7013_v52 }
 0x974   :  { %5449 = vmatpush1.bf16.msra.mxu1 %v7019_v34 }
 0x975   :  { %5451 = vmatprep.subr.bf16.mxu1 %v7022_v36 }
 0x978   :  { %5453 = vmatpush1.bf16.msra.mxu1 %v7025_v42 }
 0x979   :  { %5455 = vmatprep.subr.bf16.mxu1 %v7028_v0 }
 0x97c   :  { %5457 = vmatpush1.bf16.msra.mxu1 %v7031_v24 }
 0x97d   :  { %5459 = vmatprep.subr.bf16.mxu1 %v7034_v30 }
 0x980   :  { %5461 = vmatpush1.bf16.msra.mxu1 %v7037_v14 }
 0x981   :  { %5463 = vmatprep.subr.bf16.mxu1 %v7040_v22 }
 0x984   :  { %5465 = vmatpush1.bf16.msra.mxu1 %v7043_v61 }
 0x985   :  { %5467 = vmatprep.subr.bf16.mxu1 %v7046_v11 }
 0x988   :  { %5469 = vmatpush1.bf16.msra.mxu1 %v7049_v50 }
 0x989   :  { %5471 = vmatprep.subr.bf16.mxu1 %v7052_v4 }
 0x98c   :  { %5473 = vmatpush1.bf16.msra.mxu1 %v7055_v25 }
 0x98d   :  { %5475 = vmatprep.subr.bf16.mxu1 %v7058_v56 }
 0x990   :  { %5477 = vmatpush1.bf16.msra.mxu1 %v7061_v60 }
 0x991   :  { %5479 = vmatprep.subr.bf16.mxu1 %v7064_v15 }
 0x994   :  { %5481 = vmatpush1.bf16.msra.mxu1 %v7067_v45 }
 0x995   :  { %5483 = vmatprep.subr.bf16.mxu1 %v7070_v10 }
 0x998   :  { %5485 = vmatpush1.bf16.msra.mxu1 %v7073_v3 }
 0x999   :  { %5487 = vmatprep.subr.bf16.mxu1 %v7403_v48 }
 0x99b   :  { %v3585_v38 = vpop.f32.mrb[14].mxu0 }
 0x99c   :  { %v3592_v28 = vrot.slane %v3585_v38, 1  ;;  %v3587_v52 = vpop.f32.mrb[15].mxu0  ;;  %5489 = vmatpush1.bf16.msra.mxu1 %v7079_v31 }
 0x99d   :  { %v3593_v34 = vrot.slane %v3587_v52, 1  ;;  %5491 = vmatprep.subr.bf16.mxu1 %v7082_v21 }
 0x99e   :  { %v3596_v36 = vadd.f32 %v6112_v40, %v3592_v28  ;;  %v3741_v40 = vld [vmem:[%s7187_s6] sm:$0x3] }
 0x99f   :  { %v3597_v42 = vadd.f32 %v6114_v54, %v3593_v34  ;;  %v3746_v54 = vrot.slane %v3741_v40, %v6102_v9  ;;  %v3750_v22 = vrot.slane %v3741_v40, %v6108_v23 }
 0x9a0   :  { %5649 = vtanh.f32 %v3596_v36  ;;  %5493 = vmatpush1.bf16.msra.mxu1 %v7085_v17 }
 0x9a1   :  { %5651 = vtanh.f32 %v3597_v42  ;;  %5495 = vmatprep.subr.bf16.mxu1 %v7088_v35 }
 0x9a4   :  { %5497 = vmatpush1.bf16.msra.mxu1 %v7093_v49 }
 0x9a5   :  { %5499 = vmatprep.subr.bf16.mxu1 %v7096_v57 }
 0x9a8   :  { %5501 = vmatpush1.bf16.msra.mxu1 %v7099_v59 }
 0x9aa   :  { %v5650_v0 = vpop.eup %5649 }
 0x9ab   :  { %v5652_v24 = vpop.eup %5651  ;;  %v3666_v14 = vrot.slane %v5650_v0, 7 }
 0x9ac   :  { %v3667_v30 = vrot.slane %v5652_v24, 7 }
 0x9ae   :  { %3734 = vmatprep.mubr.f32.mxu1 %v3667_v30 }
 0x9af   :  { %3735 = vmatmul.mubr.f32.vlgmr.msra.gmra.mrb[14].mxu1 %v3666_v14 }
 0xa82   :  { %v3736_v61 = vpop.f32.mrb[14].mxu1 }
 0xa83   :  { %v3753_v11 = vadd.f32 %v3746_v54, %v3736_v61  ;;  %v3738_v50 = vpop.f32.mrb[15].mxu1 }
 0xa84   :  { %v3754_v4 = vadd.f32 %v3750_v22, %v3738_v50 }
 0xa85   :  { %5653 = vtanh.f32 %v3753_v11 }
 0xa86   :  { %5655 = vtanh.f32 %v3754_v4 }
 0xa8f   :  { %v5654_v25 = vpop.eup %5653 }
 0xa90   :  { %v5656_v56 = vpop.eup %5655 }
 0xa91   :  { %v3759_v60 = vcombine.low %v5654_v25, %v5656_v56 }
 0xa93   :  { %v3766_v15 = vrot.slane %v3759_v60, %v6126_v29 }
 0xa95   :  { %v3773_v45 = vrot.slane %v3766_v15, %v6126_v29 }
 0xa97   :  { %3776 = vst.msk [vmem:[#allocation2 + $0x7] ss:$8 sm:$0x3] %vm6131_vm0, %v3773_v45 }
 0xa98   :  { %5773 = dma.done.wait [#allocation5], 8192 }
 0xa99   :  { %5774 = vsyncadd [#allocation5], 4294959104 }
 0xa9a   :  { %5775 = dma.done.wait [#allocation5 + $0x1], 64 }
 0xa9b   :  { %5776 = vsyncadd [#allocation5 + $0x1], 4294967232  ;;  %v3789_v10 = vld [vmem:[#allocation3 + $0x8] sm:$0xff]  ;;  %v3791_v3 = vld [vmem:[#allocation3 + $0x18] sm:$0xff]  ;;  %vm3963_vm1 = vcmask 7168  }
 0xa9c   :  { %v3788_v31 = vld [vmem:[#allocation3] sm:$0xff]  ;;  %v5502_v21 = vpack.c.bf16 %v3791_v3, %v3789_v10  ;;  %v3790_v17 = vld [vmem:[#allocation3 + $0x10] sm:$0xff]  ;;  %v3793_v35 = vld [vmem:[#allocation3 + $0x28] sm:$0xff] }
 0xa9d   :  { %v3795_v49 = vld [vmem:[#allocation3 + $0x38] sm:$0xff]  ;;  %v5504_v57 = vpack.c.bf16 %v3790_v17, %v3788_v31  ;;  %v3792_v51 = vld [vmem:[#allocation3 + $0x20] sm:$0xff]  ;;  %v3794_v58 = vld [vmem:[#allocation3 + $0x30] sm:$0xff] }
 0xa9e   :  { %v5506_v59 = vpack.c.bf16 %v3795_v49, %v3793_v35  ;;  %v3797_v27 = vld [vmem:[#allocation3 + $0x48] sm:$0xff]  ;;  %5503 = vmatprep.subr.bf16.mxu0 %v5502_v21  ;;  %v3799_v29 = vld [vmem:[#allocation3 + $0x58] sm:$0xff]  ;;  %v5508_v39 = vpack.c.bf16 %v3794_v58, %v3792_v51  ;;  %v3796_v33 = vld [vmem:[#allocation3 + $0x40] sm:$0xff] }
 0xa9f   :  { %5505 = vmatpush1.bf16.msra.mxu0 %v5504_v57  ;;  %v5510_v7 = vpack.c.bf16 %v3799_v29, %v3797_v27  ;;  %v3798_v20 = vld [vmem:[#allocation3 + $0x50] sm:$0xff]  ;;  %v3801_v8 = vld [vmem:[#allocation3 + $0x68] sm:$0xff]  ;;  %v3803_v19 = vld [vmem:[#allocation3 + $0x78] sm:$0xff] }
 0xaa0   :  { %5507 = vmatprep.subr.bf16.mxu0 %v5506_v59  ;;  %v5512_v13 = vpack.c.bf16 %v3798_v20, %v3796_v33  ;;  %v5514_v41 = vpack.c.bf16 %v3803_v19, %v3801_v8  ;;  %v3800_v37 = vld [vmem:[#allocation3 + $0x60] sm:$0xff]  ;;  %v3802_v12 = vld [vmem:[#allocation3 + $0x70] sm:$0xff]  ;;  %v3805_v53 = vld [vmem:[#allocation3 + $0x88] sm:$0xff] }
 0xaa1   :  { %v3807_v47 = vld [vmem:[#allocation3 + $0x98] sm:$0xff]  ;;  %v5516_v1 = vpack.c.bf16 %v3802_v12, %v3800_v37  ;;  %v3804_v2 = vld [vmem:[#allocation3 + $0x80] sm:$0xff]  ;;  %v3806_v46 = vld [vmem:[#allocation3 + $0x90] sm:$0xff] }
 0xaa2   :  { %v5518_v5 = vpack.c.bf16 %v3807_v47, %v3805_v53  ;;  %v3809_v55 = vld [vmem:[#allocation3 + $0xa8] sm:$0xff]  ;;  %v3811_v44 = vld [vmem:[#allocation3 + $0xb8] sm:$0xff]  ;;  %v5520_v18 = vpack.c.bf16 %v3806_v46, %v3804_v2  ;;  %v3808_v6 = vld [vmem:[#allocation3 + $0xa0] sm:$0xff] }
 0xaa3   :  { %5509 = vmatpush1.bf16.msra.mxu0 %v5508_v39  ;;  %v5522_v63 = vpack.c.bf16 %v3811_v44, %v3809_v55  ;;  %v3810_v62 = vld [vmem:[#allocation3 + $0xb0] sm:$0xff]  ;;  %v3813_v43 = vld [vmem:[#allocation3 + $0xc8] sm:$0xff]  ;;  %v3815_v16 = vld [vmem:[#allocation3 + $0xd8] sm:$0xff] }
 0xaa4   :  { %5511 = vmatprep.subr.bf16.mxu0 %v5510_v7  ;;  %v5524_v32 = vpack.c.bf16 %v3810_v62, %v3808_v6  ;;  %v5526_v26 = vpack.c.bf16 %v3815_v16, %v3813_v43  ;;  %v3812_v48 = vld [vmem:[#allocation3 + $0xc0] sm:$0xff]  ;;  %v3814_v38 = vld [vmem:[#allocation3 + $0xd0] sm:$0xff]  ;;  %v3787_v28 = vld [vmem:[#allocation2 + $0x8] sm:$0xff] }
 0xaa5   :  { %v3817_v52 = vld [vmem:[#allocation3 + $0xe8] sm:$0xff]  ;;  %v3819_v34 = vld [vmem:[#allocation3 + $0xf8] sm:$0xff]  ;;  %3928 = vmatprep.mubr.f32.mxu0 %v3787_v28  ;;  %v5528_v36 = vpack.c.bf16 %v3814_v38, %v3812_v48  ;;  %v3816_v0 = vld [vmem:[#allocation3 + $0xe0] sm:$0xff] }
 0xaa6   :  { %v5530_v42 = vpack.c.bf16 %v3819_v34, %v3817_v52  ;;  %v3818_v24 = vld [vmem:[#allocation3 + $0xf0] sm:$0xff]  ;;  %v3821_v30 = vld [vmem:[#allocation3 + $0x108] sm:$0xff]  ;;  %v3823_v14 = vld [vmem:[#allocation3 + $0x118] sm:$0xff] }
 0xaa7   :  { %5513 = vmatpush1.bf16.msra.mxu0 %v5512_v13  ;;  %v5532_v40 = vpack.c.bf16 %v3818_v24, %v3816_v0  ;;  %v5534_v54 = vpack.c.bf16 %v3823_v14, %v3821_v30  ;;  %v3820_v22 = vld [vmem:[#allocation3 + $0x100] sm:$0xff]  ;;  %v3822_v61 = vld [vmem:[#allocation3 + $0x110] sm:$0xff]  ;;  %v3825_v11 = vld [vmem:[#allocation3 + $0x128] sm:$0xff] }
 0xaa8   :  { %5515 = vmatprep.subr.bf16.mxu0 %v5514_v41  ;;  %v3827_v50 = vld [vmem:[#allocation3 + $0x138] sm:$0xff]  ;;  %v5536_v4 = vpack.c.bf16 %v3822_v61, %v3820_v22  ;;  %v3824_v56 = vld [vmem:[#allocation3 + $0x120] sm:$0xff]  ;;  %v3826_v60 = vld [vmem:[#allocation3 + $0x130] sm:$0xff] }
 0xaa9   :  { %v5538_v25 = vpack.c.bf16 %v3827_v50, %v3825_v11  ;;  %v3829_v15 = vld [vmem:[#allocation3 + $0x148] sm:$0xff]  ;;  %v3831_v45 = vld [vmem:[#allocation3 + $0x158] sm:$0xff]  ;;  %v5540_v10 = vpack.c.bf16 %v3826_v60, %v3824_v56  ;;  %v3828_v31 = vld [vmem:[#allocation3 + $0x140] sm:$0xff] }
 0xaaa   :  { %v5542_v3 = vpack.c.bf16 %v3831_v45, %v3829_v15  ;;  %v3830_v21 = vld [vmem:[#allocation3 + $0x150] sm:$0xff]  ;;  %v3833_v17 = vld [vmem:[#allocation3 + $0x168] sm:$0xff]  ;;  %v3835_v35 = vld [vmem:[#allocation3 + $0x178] sm:$0xff] }
 0xaab   :  { %5517 = vmatpush1.bf16.msra.mxu0 %v5516_v1  ;;  %v5544_v49 = vpack.c.bf16 %v3830_v21, %v3828_v31  ;;  %v5546_v57 = vpack.c.bf16 %v3835_v35, %v3833_v17  ;;  %v3832_v59 = vld [vmem:[#allocation3 + $0x160] sm:$0xff]  ;;  %v3834_v51 = vld [vmem:[#allocation3 + $0x170] sm:$0xff]  ;;  %v3837_v58 = vld [vmem:[#allocation3 + $0x188] sm:$0xff] }
 0xaac   :  { %5519 = vmatprep.subr.bf16.mxu0 %v5518_v5  ;;  %v3839_v27 = vld [vmem:[#allocation3 + $0x198] sm:$0xff]  ;;  %v5548_v29 = vpack.c.bf16 %v3834_v51, %v3832_v59  ;;  %v3836_v7 = vld [vmem:[#allocation3 + $0x180] sm:$0xff]  ;;  %v3838_v33 = vld [vmem:[#allocation3 + $0x190] sm:$0xff] }
 0xaad   :  { %v5550_v39 = vpack.c.bf16 %v3839_v27, %v3837_v58  ;;  %v3841_v20 = vld [vmem:[#allocation3 + $0x1a8] sm:$0xff]  ;;  %v3843_v8 = vld [vmem:[#allocation3 + $0x1b8] sm:$0xff]  ;;  %v5552_v19 = vpack.c.bf16 %v3838_v33, %v3836_v7  ;;  %v3840_v41 = vld [vmem:[#allocation3 + $0x1a0] sm:$0xff] }
 0xaae   :  { %v5554_v13 = vpack.c.bf16 %v3843_v8, %v3841_v20  ;;  %v3842_v37 = vld [vmem:[#allocation3 + $0x1b0] sm:$0xff]  ;;  %v3845_v12 = vld [vmem:[#allocation3 + $0x1c8] sm:$0xff]  ;;  %v3847_v53 = vld [vmem:[#allocation3 + $0x1d8] sm:$0xff] }
 0xaaf   :  { %5521 = vmatpush1.bf16.msra.mxu0 %v5520_v18  ;;  %v5556_v47 = vpack.c.bf16 %v3842_v37, %v3840_v41  ;;  %v5558_v1 = vpack.c.bf16 %v3847_v53, %v3845_v12  ;;  %v3844_v5 = vld [vmem:[#allocation3 + $0x1c0] sm:$0xff]  ;;  %v3846_v2 = vld [vmem:[#allocation3 + $0x1d0] sm:$0xff]  ;;  %v3849_v46 = vld [vmem:[#allocation3 + $0x1e8] sm:$0xff] }
 0xab0   :  { %5523 = vmatprep.subr.bf16.mxu0 %v5522_v63  ;;  %v3851_v55 = vld [vmem:[#allocation3 + $0x1f8] sm:$0xff]  ;;  %v5560_v44 = vpack.c.bf16 %v3846_v2, %v3844_v5  ;;  %v3848_v63 = vld [vmem:[#allocation3 + $0x1e0] sm:$0xff]  ;;  %v3850_v6 = vld [vmem:[#allocation3 + $0x1f0] sm:$0xff] }
 0xab1   :  { %v5562_v18 = vpack.c.bf16 %v3851_v55, %v3849_v46  ;;  %v5564_v62 = vpack.c.bf16 %v3850_v6, %v3848_v63  ;;  %v3786_v43 = vld [vmem:[#allocation2] sm:$0xff]  ;;  %v3852_v16 = vld [vmem:[#allocation4] ss:$2 sm:$0x3] }
 0xab2   :  { %v3938_v48 = vld [vmem:[#allocation4 + $0x1] ss:$2 sm:$0x3] }
 0xab3   :  { %5525 = vmatpush1.bf16.msra.mxu0 %v5524_v32  ;;  %v3857_v32 = vrot.slane %v3852_v16, %v6102_v9  ;;  %v3943_v34 = vrot.slane %v3938_v48, %v6102_v9 }
 0xab4   :  { %5527 = vmatprep.subr.bf16.mxu0 %v5526_v26  ;;  %v3861_v26 = vrot.slane %v3852_v16, %v6108_v23 }
 0xab7   :  { %5529 = vmatpush1.bf16.msra.mxu0 %v5528_v36 }
 0xab8   :  { %5531 = vmatprep.subr.bf16.mxu0 %v5530_v42  ;;  %v3947_v42 = vrot.slane %v3938_v48, %v6108_v23 }
 0xabb   :  { %5533 = vmatpush1.bf16.msra.mxu0 %v5532_v40 }
 0xabc   :  { %5535 = vmatprep.subr.bf16.mxu0 %v5534_v54  ;;  %v3995_v54 = vld [vmem:[#allocation6] ss:$0 sm:$0xff] }
 0xabf   :  { %5537 = vmatpush1.bf16.msra.mxu0 %v5536_v4 }
 0xac0   :  { %5539 = vmatprep.subr.bf16.mxu0 %v5538_v25 }
 0xac3   :  { %5541 = vmatpush1.bf16.msra.mxu0 %v5540_v10 }
 0xac4   :  { %5543 = vmatprep.subr.bf16.mxu0 %v5542_v3 }
 0xac7   :  { %5545 = vmatpush1.bf16.msra.mxu0 %v5544_v49 }
 0xac8   :  { %5547 = vmatprep.subr.bf16.mxu0 %v5546_v57 }
 0xacb   :  { %5549 = vmatpush1.bf16.msra.mxu0 %v5548_v29 }
 0xacc   :  { %5551 = vmatprep.subr.bf16.mxu0 %v5550_v39 }
 0xacf   :  { %5553 = vmatpush1.bf16.msra.mxu0 %v5552_v19 }
 0xad0   :  { %5555 = vmatprep.subr.bf16.mxu0 %v5554_v13 }
 0xad3   :  { %5557 = vmatpush1.bf16.msra.mxu0 %v5556_v47 }
 0xad4   :  { %5559 = vmatprep.subr.bf16.mxu0 %v5558_v1 }
 0xad7   :  { %5561 = vmatpush1.bf16.msra.mxu0 %v5560_v44 }
 0xad8   :  { %5563 = vmatprep.subr.bf16.mxu0 %v5562_v18 }
 0xadb   :  { %5565 = vmatpush1.bf16.msra.mxu0 %v5564_v62 }
 0xade   :  { %3929 = vmatmul.mubr.f32.vlgmr.msra.gmra.mrb[16].mxu0 %v3786_v43 }
 0xbb1   :  { %v3930_v38 = vpop.f32.mrb[16].mxu0 }
 0xbb2   :  { %v3931_v28 = vadd.f32 %v3930_v38, %v3857_v32  ;;  %v3932_v52 = vpop.f32.mrb[17].mxu0 }
 0xbb3   :  { %v3933_v36 = vadd.f32 %v3932_v52, %v3861_v26 }
 0xbb4   :  { %v3935_v0 = vmax.f32 %v3931_v28, 0.0 }
 0xbb5   :  { %v3936_v24 = vmax.f32 %v3933_v36, 0.0 }
 0xbb6   :  { %v3950_v30 = vmul.f32 %v3943_v34, %v3935_v0 }
 0xbb7   :  { %v3951_v14 = vmul.f32 %v3947_v42, %v3936_v24 }
 0xbb9   :  { %v3952_v40 = vadd.f32 %v3951_v14, %v3950_v30 }
 0xbbb   :  { %3953 = vadd.xlane.f32.xlu0 %v3952_v40 }
 0xc48   :  { %v3954_v22 = vpop.xlane.xlu0 %3953 }
 0xc49   :  { %v3962_v61 = vadd.f32 %v3995_v54, %v3954_v22 }
 0xc4b   :  { %3964 = vst.msk [vmem:[%s7191_s10] sm:$0xff] %vm3963_vm1, %v3962_v61 }
 0xc4c   :  { %3969 = vsyncpa [#allocation8], 1 }
 0xc4d   :  { %3970 = vsyncpa [#allocation10], 1 }
 0xc4e   :  { %3971 = vsyncpa [#allocation13], 1 }
 0xc4f   :  { %3972 = vsyncmov [#allocation5] }
 0xc52   :  { %s3973_s26 = vpop.sfrf %3972 }
 0xc53   :  { %p3996_p12 = scmp.ne.s32.totalorder %s3973_s26, 0 }
 0xc55   :  { %3977 = shalt.err (%p3996_p12)  }
 0xc56   :  { %3979 = vsyncmov [#allocation5 + $0x1] }
 0xc59   :  { %s3980_s27 = vpop.sfrf %3979 }
 0xc5a   :  { %p3997_p13 = scmp.ne.s32.totalorder %s3980_s27, 0 }
 0xc5c   :  { %3984 = shalt.err (%p3997_p13)  }

</bundles_post_ra>
